<compile_context>
chip_gen: v5e
topology: v5e:2x2
jax: 0.10.0
libtpu: 0.0.40
codegen_flags: <defaults>
</compile_context>

<pallas_src>
import math

import jax
import jax.numpy as jnp
from jax.experimental import pallas as pl
from jax.experimental.pallas import tpu as pltpu

# ---- config (small, consistent with the module) ----
ENTITY_DIM = 32          # cfg.model.entity_emb_dim
HEAD_DIM = 8             # cfg.model.head_dim
N_HEADS = ENTITY_DIM // HEAD_DIM
ATT_HIDDEN = 16          # cfg.model.attention_hidden_dim
NEWS_DIM = 400           # hardcoded in the module
NEWS_PAD = 512           # lane-dense padded output width (multiple of 128)
LN_EPS = 1e-5            # torch LayerNorm default
MAX_TB = 256             # samples per grid step (fits comfortably in scoped VMEM on v5e/v6e/v7x)


def _round_up(x, m):
    return (x + m - 1) // m * m


def _layernorm(x, gamma, beta):
    mu = jnp.mean(x, axis=-1, keepdims=True)
    var = jnp.mean((x - mu) ** 2, axis=-1, keepdims=True)
    return (x - mu) * jax.lax.rsqrt(var + LN_EPS) * gamma + beta


def hie_entity_kernel(idx_ref, table_ref,
                      wq_ref, wk_ref, wv_ref,
                      vec_ref, ap_w1_ref, ap_ref,
                      wf_ref, bf_ref,
                      o_ref):
    # Shapes (per grid step):
    #   idx_ref   : (TB*S, 1) int32       entity ids (token-major)
    #   table_ref : (Vpad, D)             padded embedding table (VMEM resident)
    #   wq/wk/wv  : (D, D)                projection weights
    #   vec_ref   : (8, D)                rows: bq, bk, bv, ln1_g, ln1_b, ln2_g, ln2_b, 0
    #   ap_w1_ref : (D, H)
    #   ap_ref    : (8, H)                rows: ap_b1, ap_w2^T, [ap_b2, 0...], 0...
    #   wf_ref    : (D, NEWS_PAD), bf_ref : (1, NEWS_PAD)
    #   o_ref     : (TB, NEWS_PAD)
    TBS = idx_ref.shape[0]
    TB = o_ref.shape[0]
    S = TBS // TB
    D = table_ref.shape[1]
    Vp = table_ref.shape[0]

    # ---- unpack small parameters (kept 2-D for clean broadcasting) ----
    bq = vec_ref[0:1, :]
    bk = vec_ref[1:2, :]
    bv = vec_ref[2:3, :]
    ln1_g = vec_ref[3:4, :]
    ln1_b = vec_ref[4:5, :]
    ln2_g = vec_ref[5:6, :]
    ln2_b = vec_ref[6:7, :]
    ap_b1 = ap_ref[0:1, :]        # (1, H)
    ap_w2 = ap_ref[1:2, :]        # (1, H)  (= ap_w2^T)
    ap_b2 = ap_ref[2:3, 0:1]      # (1, 1)

    # ---- in-kernel embedding gather as a one-hot matmul (tiny vocab) ----
    idx = idx_ref[...]                                               # (TBS, 1) int32
    iota = jax.lax.broadcasted_iota(jnp.int32, (TBS, Vp), 1)
    onehot = (iota == idx).astype(jnp.float32)                       # (TBS, Vp)
    x = jnp.dot(onehot, table_ref[...], preferred_element_type=jnp.float32)  # (TBS, D)

    # ---- MultiHeadAttention (NRMS-style self-attention, no output proj) ----
    # QKV projections on the flattened (TB*S, D) slab (big-M MXU matmuls).
    q = jnp.dot(x, wq_ref[...], preferred_element_type=jnp.float32) + bq
    k = jnp.dot(x, wk_ref[...], preferred_element_type=jnp.float32) + bk
    v = jnp.dot(x, wv_ref[...], preferred_element_type=jnp.float32) + bv

    q3 = q.reshape(TB, S, D)
    k3 = k.reshape(TB, S, D)
    v3 = v.reshape(TB, S, D)

    scale = 1.0 / math.sqrt(HEAD_DIM)
    heads = []
    for h in range(N_HEADS):                     # static unroll; batched over TB samples
        lo = h * HEAD_DIM
        qh = q3[:, :, lo:lo + HEAD_DIM]
        kh = k3[:, :, lo:lo + HEAD_DIM]
        vh = v3[:, :, lo:lo + HEAD_DIM]
        s = jnp.einsum('bqd,bkd->bqk', qh, kh,
                       preferred_element_type=jnp.float32) * scale   # (TB, S, S)
        s = s - jnp.max(s, axis=-1, keepdims=True)
        p = jnp.exp(s)
        p = p * pl.reciprocal(jnp.sum(p, axis=-1, keepdims=True), approx=True)
        heads.append(jnp.einsum('bqk,bkd->bqd', p, vh,
                                preferred_element_type=jnp.float32))  # (TB, S, hd)
    ctx = jnp.concatenate(heads, axis=-1)                             # (TB, S, D)

    # ---- LayerNorm(entity_dim) ----
    y = _layernorm(ctx, ln1_g, ln1_b)                                 # (TB, S, D)

    # ---- AttentionPooling(entity_dim, attention_hidden_dim) ----
    y2 = y.reshape(TBS, D)
    e = jnp.tanh(jnp.dot(y2, ap_w1_ref[...],
                         preferred_element_type=jnp.float32) + ap_b1)  # (TBS, H)
    e3 = e.reshape(TB, S, ATT_HIDDEN)
    z = jnp.sum(e3 * ap_w2, axis=-1, keepdims=True) + ap_b2            # (TB, S, 1)
    z = z - jnp.max(z, axis=1, keepdims=True)
    a = jnp.exp(z)
    a = a * pl.reciprocal(jnp.sum(a, axis=1, keepdims=True) + 1e-8, approx=True)
    pooled = jnp.sum(a * y, axis=1)                                    # (TB, D)

    # ---- LayerNorm(entity_dim) ----
    p2 = _layernorm(pooled, ln2_g, ln2_b)                              # (TB, D)

    # ---- Linear(entity_dim -> news_dim padded to 512) + LeakyReLU(0.2) ----
    out = jnp.dot(p2, wf_ref[...], preferred_element_type=jnp.float32) + bf_ref[...]
    o_ref[...] = jnp.where(out > 0, out, 0.2 * out)                    # (TB, NEWS_PAD)


@jax.jit
def hie_entity_encoder(entity_input, params):
    """entity_input: (B, num, entity_num, entity_num) of entity ids (float or int dtype)."""
    B, num, entity_num, entity_num2 = entity_input.shape
    assert entity_num == entity_num2
    BN = B * num
    S = entity_num * entity_num
    D = ENTITY_DIM
    H = ATT_HIDDEN

    # batching: TB samples per grid step, batch padded to a multiple of TB
    TB = min(MAX_TB, _round_up(BN, 8))
    BN_pad = _round_up(BN, TB)

    # int32 ids, token-major, padded rows use id 0 (results are sliced away)
    idx = entity_input.astype(jnp.int32).reshape(BN, S)
    idx = jnp.pad(idx, ((0, BN_pad - BN), (0, 0)))
    idx = idx.reshape(BN_pad * S, 1)

    # padded embedding table (lane-aligned contraction dim for the one-hot gather)
    vocab = params["emb_table"].shape[0]
    Vp = _round_up(vocab, 128)
    table_p = jnp.pad(params["emb_table"].astype(jnp.float32), ((0, Vp - vocab), (0, 0)))

    # pack the small parameter vectors into two blocks
    vec_pack = jnp.concatenate(
        [params["bq"], params["bk"], params["bv"],
         params["ln1_g"], params["ln1_b"], params["ln2_g"], params["ln2_b"],
         jnp.zeros((1, D), jnp.float32)], axis=0)                      # (8, D)
    ap_pack = jnp.zeros((8, H), jnp.float32)
    ap_pack = ap_pack.at[0, :].set(params["ap_b1"][0])
    ap_pack = ap_pack.at[1, :].set(params["ap_w2"][:, 0])
    ap_pack = ap_pack.at[2, 0].set(params["ap_b2"][0, 0])

    # lane-dense final projection (400 -> 512 padded with zeros)
    wf_p = jnp.pad(params["wf"], ((0, 0), (0, NEWS_PAD - NEWS_DIM)))
    bf_p = jnp.pad(params["bf"], ((0, 0), (0, NEWS_PAD - NEWS_DIM)))

    in_specs = [
        pl.BlockSpec((TB * S, 1), lambda i: (i, 0)),        # entity ids
        pl.BlockSpec((Vp, D), lambda i: (0, 0)),            # embedding table
        pl.BlockSpec((D, D), lambda i: (0, 0)),             # wq
        pl.BlockSpec((D, D), lambda i: (0, 0)),             # wk
        pl.BlockSpec((D, D), lambda i: (0, 0)),             # wv
        pl.BlockSpec((8, D), lambda i: (0, 0)),             # packed D-sized vectors
        pl.BlockSpec((D, H), lambda i: (0, 0)),             # ap_w1
        pl.BlockSpec((8, H), lambda i: (0, 0)),             # packed pooling params
        pl.BlockSpec((D, NEWS_PAD), lambda i: (0, 0)),      # wf (padded)
        pl.BlockSpec((1, NEWS_PAD), lambda i: (0, 0)),      # bf (padded)
    ]

    out = pl.pallas_call(
        hie_entity_kernel,
        grid=(BN_pad // TB,),
        in_specs=in_specs,
        out_specs=pl.BlockSpec((TB, NEWS_PAD), lambda i: (i, 0)),
        out_shape=jax.ShapeDtypeStruct((BN_pad, NEWS_PAD), jnp.float32),
        compiler_params=pltpu.CompilerParams(dimension_semantics=("parallel",)),
    )(idx, table_p, params["wq"], params["wk"], params["wv"],
      vec_pack, params["ap_w1"], ap_pack, wf_p, bf_p)

    return out[:BN, :NEWS_DIM].reshape(B, num, NEWS_DIM)


def init_params(key, vocab_size):
    ks = jax.random.split(key, 16)
    D, H, O = ENTITY_DIM, ATT_HIDDEN, NEWS_DIM

    def w(k, shape, scale):
        return (scale * jax.random.normal(k, shape)).astype(jnp.float32)

    return dict(
        emb_table=w(ks[0], (vocab_size, D), 0.1),
        wq=w(ks[1], (D, D), 1.0 / math.sqrt(D)), bq=w(ks[2], (1, D), 0.01),
        wk=w(ks[3], (D, D), 1.0 / math.sqrt(D)), bk=w(ks[4], (1, D), 0.01),
        wv=w(ks[5], (D, D), 1.0 / math.sqrt(D)), bv=w(ks[6], (1, D), 0.01),
        ln1_g=jnp.ones((1, D), jnp.float32), ln1_b=jnp.zeros((1, D), jnp.float32),
        ap_w1=w(ks[7], (D, H), 1.0 / math.sqrt(D)), ap_b1=w(ks[8], (1, H), 0.01),
        ap_w2=w(ks[9], (H, 1), 1.0 / math.sqrt(H)), ap_b2=w(ks[10], (1, 1), 0.01),
        ln2_g=jnp.ones((1, D), jnp.float32), ln2_b=jnp.zeros((1, D), jnp.float32),
        wf=w(ks[11], (D, O), 1.0 / math.sqrt(D)), bf=w(ks[12], (1, O), 0.01),
    )


def reference(entity_input, p):
    """Pure-JAX reference of the same forward pass (for sanity checking)."""
    B, num, en, _ = entity_input.shape
    BN, S, D = B * num, en * en, ENTITY_DIM
    idx = entity_input.astype(jnp.int32).reshape(BN, S)
    x = p["emb_table"][idx]
    q = x @ p["wq"] + p["bq"]
    k = x @ p["wk"] + p["bk"]
    v = x @ p["wv"] + p["bv"]

    def split(t):
        return t.reshape(BN, S, N_HEADS, HEAD_DIM).transpose(0, 2, 1, 3)

    qh, kh, vh = split(q), split(k), split(v)
    s = jnp.einsum("bhqd,bhkd->bhqk", qh, kh) / math.sqrt(HEAD_DIM)
    a = jax.nn.softmax(s, axis=-1)
    ctx = jnp.einsum("bhqk,bhkd->bhqd", a, vh).transpose(0, 2, 1, 3).reshape(BN, S, D)

    def ln(t, g, b):
        mu = t.mean(-1, keepdims=True)
        var = ((t - mu) ** 2).mean(-1, keepdims=True)
        return (t - mu) / jnp.sqrt(var + LN_EPS) * g + b

    y = ln(ctx, p["ln1_g"], p["ln1_b"])
    e = jnp.tanh(y @ p["ap_w1"] + p["ap_b1"])
    z = e @ p["ap_w2"] + p["ap_b2"]
    al = jnp.exp(z - z.max(axis=1, keepdims=True))
    al = al / (al.sum(axis=1, keepdims=True) + 1e-8)
    pooled = (al * y).sum(axis=1)
    p2 = ln(pooled, p["ln2_g"], p["ln2_b"])
    out = p2 @ p["wf"] + p["bf"]
    out = jnp.where(out > 0, out, 0.2 * out)
    return out.reshape(B, num, NEWS_DIM)


if __name__ == "__main__":
    key = jax.random.PRNGKey(0)
    kp, kx = jax.random.split(key)

    vocab_size = 50
    B, num, entity_num = 2, 3, 4

    params = init_params(kp, vocab_size)
    # entity ids stored as float (as in the torch module: .long() in forward)
    entity_input = jax.random.randint(
        kx, (B, num, entity_num, entity_num), 0, vocab_size
    ).astype(jnp.float32)

    out = hie_entity_encoder(entity_input, params)
    out = jax.block_until_ready(out)

    assert out.shape == (B, num, NEWS_DIM), out.shape
    assert bool(jnp.all(jnp.isfinite(out)))

    ref = reference(entity_input, params)
    # tolerance: 5e-3 covers the EUP approximate-reciprocal softmax denominators
    assert jnp.allclose(out, ref, atol=5e-3, rtol=5e-3), \
        float(jnp.max(jnp.abs(out - ref)))

    print("KERNEL_OK")
</pallas_src>

<mosaic_0001>
module attributes {stable_mosaic.version = 11 : i64} {
  func.func @hie_entity_kernel(%arg0: i32, %arg1: memref<128x1xi32, #tpu.memory_space<vmem>>, %arg2: memref<128x32xf32, #tpu.memory_space<vmem>>, %arg3: memref<32x32xf32, #tpu.memory_space<vmem>>, %arg4: memref<32x32xf32, #tpu.memory_space<vmem>>, %arg5: memref<32x32xf32, #tpu.memory_space<vmem>>, %arg6: memref<8x32xf32, #tpu.memory_space<vmem>>, %arg7: memref<32x16xf32, #tpu.memory_space<vmem>>, %arg8: memref<8x16xf32, #tpu.memory_space<vmem>>, %arg9: memref<32x512xf32, #tpu.memory_space<vmem>>, %arg10: memref<1x512xf32, #tpu.memory_space<vmem>>, %arg11: memref<8x512xf32, #tpu.memory_space<vmem>>) attributes {dimension_semantics = [#tpu.dimension_semantics<parallel>], iteration_bounds = array<i64: 1>, scalar_prefetch = 0 : i64, scratch_operands = 0 : i64, tpu.core_type = #tpu.core_type<tc>, window_params = [{transform_indices = @transform_0, window_bounds = array<i64: 128, 1>}, {pipeline_mode = #tpu.pipeline_mode<synchronous>, transform_indices = @transform_1, window_bounds = array<i64: 128, 32>}, {pipeline_mode = #tpu.pipeline_mode<synchronous>, transform_indices = @transform_2, window_bounds = array<i64: 32, 32>}, {pipeline_mode = #tpu.pipeline_mode<synchronous>, transform_indices = @transform_3, window_bounds = array<i64: 32, 32>}, {pipeline_mode = #tpu.pipeline_mode<synchronous>, transform_indices = @transform_4, window_bounds = array<i64: 32, 32>}, {pipeline_mode = #tpu.pipeline_mode<synchronous>, transform_indices = @transform_5, window_bounds = array<i64: 8, 32>}, {pipeline_mode = #tpu.pipeline_mode<synchronous>, transform_indices = @transform_6, window_bounds = array<i64: 32, 16>}, {pipeline_mode = #tpu.pipeline_mode<synchronous>, transform_indices = @transform_7, window_bounds = array<i64: 8, 16>}, {pipeline_mode = #tpu.pipeline_mode<synchronous>, transform_indices = @transform_8, window_bounds = array<i64: 32, 512>}, {pipeline_mode = #tpu.pipeline_mode<synchronous>, transform_indices = @transform_9, window_bounds = array<i64: 1, 512>}, {transform_indices = @transform_10, window_bounds = array<i64: 8, 512>}]} {
    %c0 = arith.constant 0 : index
    %c0_0 = arith.constant 0 : index
    %0 = vector.load %arg6[%c0, %c0_0] : memref<8x32xf32, #tpu.memory_space<vmem>>, vector<1x32xf32>
    %c1 = arith.constant 1 : index
    %c0_1 = arith.constant 0 : index
    %1 = vector.load %arg6[%c1, %c0_1] : memref<8x32xf32, #tpu.memory_space<vmem>>, vector<1x32xf32>
    %c2 = arith.constant 2 : index
    %c0_2 = arith.constant 0 : index
    %2 = vector.load %arg6[%c2, %c0_2] : memref<8x32xf32, #tpu.memory_space<vmem>>, vector<1x32xf32>
    %c3 = arith.constant 3 : index
    %c0_3 = arith.constant 0 : index
    %3 = vector.load %arg6[%c3, %c0_3] : memref<8x32xf32, #tpu.memory_space<vmem>>, vector<1x32xf32>
    %c4 = arith.constant 4 : index
    %c0_4 = arith.constant 0 : index
    %4 = vector.load %arg6[%c4, %c0_4] : memref<8x32xf32, #tpu.memory_space<vmem>>, vector<1x32xf32>
    %c5 = arith.constant 5 : index
    %c0_5 = arith.constant 0 : index
    %5 = vector.load %arg6[%c5, %c0_5] : memref<8x32xf32, #tpu.memory_space<vmem>>, vector<1x32xf32>
    %c6 = arith.constant 6 : index
    %c0_6 = arith.constant 0 : index
    %6 = vector.load %arg6[%c6, %c0_6] : memref<8x32xf32, #tpu.memory_space<vmem>>, vector<1x32xf32>
    %c0_7 = arith.constant 0 : index
    %c0_8 = arith.constant 0 : index
    %7 = vector.load %arg8[%c0_7, %c0_8] : memref<8x16xf32, #tpu.memory_space<vmem>>, vector<1x16xf32>
    %c1_9 = arith.constant 1 : index
    %c0_10 = arith.constant 0 : index
    %8 = vector.load %arg8[%c1_9, %c0_10] : memref<8x16xf32, #tpu.memory_space<vmem>>, vector<1x16xf32>
    %c2_11 = arith.constant 2 : index
    %c0_12 = arith.constant 0 : index
    %9 = vector.load %arg8[%c2_11, %c0_12] : memref<8x16xf32, #tpu.memory_space<vmem>>, vector<1x1xf32>
    %c0_13 = arith.constant 0 : index
    %c0_14 = arith.constant 0 : index
    %10 = vector.load %arg1[%c0_13, %c0_14] : memref<128x1xi32, #tpu.memory_space<vmem>>, vector<128x1xi32>
    %11 = tpu.iota {dimensions = array<i32: 1>} : vector<128x128xi32>
    %12 = vector.broadcast %10 : vector<128x1xi32> to vector<128x128xi32>
    %13 = arith.cmpi eq, %11, %12 : vector<128x128xi32>
    %14 = arith.extui %13 : vector<128x128xi1> to vector<128x128xi32>
    %15 = arith.sitofp %14 : vector<128x128xi32> to vector<128x128xf32>
    %c0_15 = arith.constant 0 : index
    %c0_16 = arith.constant 0 : index
    %16 = vector.load %arg2[%c0_15, %c0_16] : memref<128x32xf32, #tpu.memory_space<vmem>>, vector<128x32xf32>
    %cst = arith.constant dense<0.000000e+00> : vector<128x32xf32>
    %17 = tpu.matmul %15, %16, %cst {dimension_numbers = #tpu.dot_dimension_numbers<[1], [0], [0], [1], [0, 0, 1, 1], [], []>} : vector<128x128xf32>, vector<128x32xf32>, vector<128x32xf32> -> vector<128x32xf32>
    %c0_17 = arith.constant 0 : index
    %c0_18 = arith.constant 0 : index
    %18 = vector.load %arg3[%c0_17, %c0_18] : memref<32x32xf32, #tpu.memory_space<vmem>>, vector<32x32xf32>
    %cst_19 = arith.constant dense<0.000000e+00> : vector<128x32xf32>
    %19 = tpu.matmul %17, %18, %cst_19 {dimension_numbers = #tpu.dot_dimension_numbers<[1], [0], [0], [1], [0, 0, 1, 1], [], []>} : vector<128x32xf32>, vector<32x32xf32>, vector<128x32xf32> -> vector<128x32xf32>
    %20 = vector.broadcast %0 : vector<1x32xf32> to vector<128x32xf32>
    %21 = arith.addf %19, %20 : vector<128x32xf32>
    %c0_20 = arith.constant 0 : index
    %c0_21 = arith.constant 0 : index
    %22 = vector.load %arg4[%c0_20, %c0_21] : memref<32x32xf32, #tpu.memory_space<vmem>>, vector<32x32xf32>
    %cst_22 = arith.constant dense<0.000000e+00> : vector<128x32xf32>
    %23 = tpu.matmul %17, %22, %cst_22 {dimension_numbers = #tpu.dot_dimension_numbers<[1], [0], [0], [1], [0, 0, 1, 1], [], []>} : vector<128x32xf32>, vector<32x32xf32>, vector<128x32xf32> -> vector<128x32xf32>
    %24 = vector.broadcast %1 : vector<1x32xf32> to vector<128x32xf32>
    %25 = arith.addf %23, %24 : vector<128x32xf32>
    %c0_23 = arith.constant 0 : index
    %c0_24 = arith.constant 0 : index
    %26 = vector.load %arg5[%c0_23, %c0_24] : memref<32x32xf32, #tpu.memory_space<vmem>>, vector<32x32xf32>
    %cst_25 = arith.constant dense<0.000000e+00> : vector<128x32xf32>
    %27 = tpu.matmul %17, %26, %cst_25 {dimension_numbers = #tpu.dot_dimension_numbers<[1], [0], [0], [1], [0, 0, 1, 1], [], []>} : vector<128x32xf32>, vector<32x32xf32>, vector<128x32xf32> -> vector<128x32xf32>
    %28 = vector.broadcast %2 : vector<1x32xf32> to vector<128x32xf32>
    %29 = arith.addf %27, %28 : vector<128x32xf32>
    %30 = vector.shape_cast %21 : vector<128x32xf32> to vector<8x16x32xf32>
    %31 = vector.shape_cast %25 : vector<128x32xf32> to vector<8x16x32xf32>
    %32 = vector.shape_cast %29 : vector<128x32xf32> to vector<8x16x32xf32>
    %33 = vector.extract_strided_slice %30 {offsets = [0, 0, 0], sizes = [8, 16, 8], strides = [1, 1, 1]} : vector<8x16x32xf32> to vector<8x16x8xf32>
    %34 = vector.extract_strided_slice %31 {offsets = [0, 0, 0], sizes = [8, 16, 8], strides = [1, 1, 1]} : vector<8x16x32xf32> to vector<8x16x8xf32>
    %35 = vector.extract_strided_slice %32 {offsets = [0, 0, 0], sizes = [8, 16, 8], strides = [1, 1, 1]} : vector<8x16x32xf32> to vector<8x16x8xf32>
    "tpu.trace_start"() <{level = 10 : i32, message = "bqd,bkd->bqk"}> : () -> ()
    %cst_26 = arith.constant dense<0.000000e+00> : vector<8x16x16xf32>
    %36 = tpu.matmul %33, %34, %cst_26 {dimension_numbers = #tpu.dot_dimension_numbers<[2], [2], [1], [1], [0, 0, 0, 1, 1, 1], [0], [0]>} : vector<8x16x8xf32>, vector<8x16x8xf32>, vector<8x16x16xf32> -> vector<8x16x16xf32>
    "tpu.trace_stop"() : () -> ()
    %cst_27 = arith.constant 0.353553385 : f32
    %37 = vector.broadcast %cst_27 : f32 to vector<8x16x16xf32>
    %38 = arith.mulf %36, %37 : vector<8x16x16xf32>
    %cst_28 = arith.constant dense<0xFF800000> : vector<8x16xf32>
    %39 = vector.multi_reduction <maximumf>, %38, %cst_28 [2] : vector<8x16x16xf32> to vector<8x16xf32>
    %40 = vector.shape_cast %39 : vector<8x16xf32> to vector<8x16x1xf32>
    %41 = vector.broadcast %40 : vector<8x16x1xf32> to vector<8x16x16xf32>
    %42 = arith.subf %38, %41 : vector<8x16x16xf32>
    %43 = math.exp %42 : vector<8x16x16xf32>
    %cst_29 = arith.constant dense<0.000000e+00> : vector<8x16xf32>
    %44 = vector.multi_reduction <add>, %43, %cst_29 [2] : vector<8x16x16xf32> to vector<8x16xf32>
    %45 = vector.shape_cast %44 : vector<8x16xf32> to vector<8x16x1xf32>
    %46 = tpu.reciprocal %45 {approx = true} : vector<8x16x1xf32> -> vector<8x16x1xf32>
    %47 = vector.broadcast %46 : vector<8x16x1xf32> to vector<8x16x16xf32>
    %48 = arith.mulf %43, %47 : vector<8x16x16xf32>
    "tpu.trace_start"() <{level = 10 : i32, message = "bqk,bkd->bqd"}> : () -> ()
    %cst_30 = arith.constant dense<0.000000e+00> : vector<8x16x8xf32>
    %49 = tpu.matmul %48, %35, %cst_30 {dimension_numbers = #tpu.dot_dimension_numbers<[2], [1], [1], [2], [0, 0, 0, 1, 1, 2], [0], [0]>} : vector<8x16x16xf32>, vector<8x16x8xf32>, vector<8x16x8xf32> -> vector<8x16x8xf32>
    "tpu.trace_stop"() : () -> ()
    %50 = vector.extract_strided_slice %30 {offsets = [0, 0, 8], sizes = [8, 16, 8], strides = [1, 1, 1]} : vector<8x16x32xf32> to vector<8x16x8xf32>
    %51 = vector.extract_strided_slice %31 {offsets = [0, 0, 8], sizes = [8, 16, 8], strides = [1, 1, 1]} : vector<8x16x32xf32> to vector<8x16x8xf32>
    %52 = vector.extract_strided_slice %32 {offsets = [0, 0, 8], sizes = [8, 16, 8], strides = [1, 1, 1]} : vector<8x16x32xf32> to vector<8x16x8xf32>
    "tpu.trace_start"() <{level = 10 : i32, message = "bqd,bkd->bqk"}> : () -> ()
    %cst_31 = arith.constant dense<0.000000e+00> : vector<8x16x16xf32>
    %53 = tpu.matmul %50, %51, %cst_31 {dimension_numbers = #tpu.dot_dimension_numbers<[2], [2], [1], [1], [0, 0, 0, 1, 1, 1], [0], [0]>} : vector<8x16x8xf32>, vector<8x16x8xf32>, vector<8x16x16xf32> -> vector<8x16x16xf32>
    "tpu.trace_stop"() : () -> ()
    %cst_32 = arith.constant 0.353553385 : f32
    %54 = vector.broadcast %cst_32 : f32 to vector<8x16x16xf32>
    %55 = arith.mulf %53, %54 : vector<8x16x16xf32>
    %cst_33 = arith.constant dense<0xFF800000> : vector<8x16xf32>
    %56 = vector.multi_reduction <maximumf>, %55, %cst_33 [2] : vector<8x16x16xf32> to vector<8x16xf32>
    %57 = vector.shape_cast %56 : vector<8x16xf32> to vector<8x16x1xf32>
    %58 = vector.broadcast %57 : vector<8x16x1xf32> to vector<8x16x16xf32>
    %59 = arith.subf %55, %58 : vector<8x16x16xf32>
    %60 = math.exp %59 : vector<8x16x16xf32>
    %cst_34 = arith.constant dense<0.000000e+00> : vector<8x16xf32>
    %61 = vector.multi_reduction <add>, %60, %cst_34 [2] : vector<8x16x16xf32> to vector<8x16xf32>
    %62 = vector.shape_cast %61 : vector<8x16xf32> to vector<8x16x1xf32>
    %63 = tpu.reciprocal %62 {approx = true} : vector<8x16x1xf32> -> vector<8x16x1xf32>
    %64 = vector.broadcast %63 : vector<8x16x1xf32> to vector<8x16x16xf32>
    %65 = arith.mulf %60, %64 : vector<8x16x16xf32>
    "tpu.trace_start"() <{level = 10 : i32, message = "bqk,bkd->bqd"}> : () -> ()
    %cst_35 = arith.constant dense<0.000000e+00> : vector<8x16x8xf32>
    %66 = tpu.matmul %65, %52, %cst_35 {dimension_numbers = #tpu.dot_dimension_numbers<[2], [1], [1], [2], [0, 0, 0, 1, 1, 2], [0], [0]>} : vector<8x16x16xf32>, vector<8x16x8xf32>, vector<8x16x8xf32> -> vector<8x16x8xf32>
    "tpu.trace_stop"() : () -> ()
    %67 = vector.extract_strided_slice %30 {offsets = [0, 0, 16], sizes = [8, 16, 8], strides = [1, 1, 1]} : vector<8x16x32xf32> to vector<8x16x8xf32>
    %68 = vector.extract_strided_slice %31 {offsets = [0, 0, 16], sizes = [8, 16, 8], strides = [1, 1, 1]} : vector<8x16x32xf32> to vector<8x16x8xf32>
    %69 = vector.extract_strided_slice %32 {offsets = [0, 0, 16], sizes = [8, 16, 8], strides = [1, 1, 1]} : vector<8x16x32xf32> to vector<8x16x8xf32>
    "tpu.trace_start"() <{level = 10 : i32, message = "bqd,bkd->bqk"}> : () -> ()
    %cst_36 = arith.constant dense<0.000000e+00> : vector<8x16x16xf32>
    %70 = tpu.matmul %67, %68, %cst_36 {dimension_numbers = #tpu.dot_dimension_numbers<[2], [2], [1], [1], [0, 0, 0, 1, 1, 1], [0], [0]>} : vector<8x16x8xf32>, vector<8x16x8xf32>, vector<8x16x16xf32> -> vector<8x16x16xf32>
    "tpu.trace_stop"() : () -> ()
    %cst_37 = arith.constant 0.353553385 : f32
    %71 = vector.broadcast %cst_37 : f32 to vector<8x16x16xf32>
    %72 = arith.mulf %70, %71 : vector<8x16x16xf32>
    %cst_38 = arith.constant dense<0xFF800000> : vector<8x16xf32>
    %73 = vector.multi_reduction <maximumf>, %72, %cst_38 [2] : vector<8x16x16xf32> to vector<8x16xf32>
    %74 = vector.shape_cast %73 : vector<8x16xf32> to vector<8x16x1xf32>
    %75 = vector.broadcast %74 : vector<8x16x1xf32> to vector<8x16x16xf32>
    %76 = arith.subf %72, %75 : vector<8x16x16xf32>
    %77 = math.exp %76 : vector<8x16x16xf32>
    %cst_39 = arith.constant dense<0.000000e+00> : vector<8x16xf32>
    %78 = vector.multi_reduction <add>, %77, %cst_39 [2] : vector<8x16x16xf32> to vector<8x16xf32>
    %79 = vector.shape_cast %78 : vector<8x16xf32> to vector<8x16x1xf32>
    %80 = tpu.reciprocal %79 {approx = true} : vector<8x16x1xf32> -> vector<8x16x1xf32>
    %81 = vector.broadcast %80 : vector<8x16x1xf32> to vector<8x16x16xf32>
    %82 = arith.mulf %77, %81 : vector<8x16x16xf32>
    "tpu.trace_start"() <{level = 10 : i32, message = "bqk,bkd->bqd"}> : () -> ()
    %cst_40 = arith.constant dense<0.000000e+00> : vector<8x16x8xf32>
    %83 = tpu.matmul %82, %69, %cst_40 {dimension_numbers = #tpu.dot_dimension_numbers<[2], [1], [1], [2], [0, 0, 0, 1, 1, 2], [0], [0]>} : vector<8x16x16xf32>, vector<8x16x8xf32>, vector<8x16x8xf32> -> vector<8x16x8xf32>
    "tpu.trace_stop"() : () -> ()
    %84 = vector.extract_strided_slice %30 {offsets = [0, 0, 24], sizes = [8, 16, 8], strides = [1, 1, 1]} : vector<8x16x32xf32> to vector<8x16x8xf32>
    %85 = vector.extract_strided_slice %31 {offsets = [0, 0, 24], sizes = [8, 16, 8], strides = [1, 1, 1]} : vector<8x16x32xf32> to vector<8x16x8xf32>
    %86 = vector.extract_strided_slice %32 {offsets = [0, 0, 24], sizes = [8, 16, 8], strides = [1, 1, 1]} : vector<8x16x32xf32> to vector<8x16x8xf32>
    "tpu.trace_start"() <{level = 10 : i32, message = "bqd,bkd->bqk"}> : () -> ()
    %cst_41 = arith.constant dense<0.000000e+00> : vector<8x16x16xf32>
    %87 = tpu.matmul %84, %85, %cst_41 {dimension_numbers = #tpu.dot_dimension_numbers<[2], [2], [1], [1], [0, 0, 0, 1, 1, 1], [0], [0]>} : vector<8x16x8xf32>, vector<8x16x8xf32>, vector<8x16x16xf32> -> vector<8x16x16xf32>
    "tpu.trace_stop"() : () -> ()
    %cst_42 = arith.constant 0.353553385 : f32
    %88 = vector.broadcast %cst_42 : f32 to vector<8x16x16xf32>
    %89 = arith.mulf %87, %88 : vector<8x16x16xf32>
    %cst_43 = arith.constant dense<0xFF800000> : vector<8x16xf32>
    %90 = vector.multi_reduction <maximumf>, %89, %cst_43 [2] : vector<8x16x16xf32> to vector<8x16xf32>
    %91 = vector.shape_cast %90 : vector<8x16xf32> to vector<8x16x1xf32>
    %92 = vector.broadcast %91 : vector<8x16x1xf32> to vector<8x16x16xf32>
    %93 = arith.subf %89, %92 : vector<8x16x16xf32>
    %94 = math.exp %93 : vector<8x16x16xf32>
    %cst_44 = arith.constant dense<0.000000e+00> : vector<8x16xf32>
    %95 = vector.multi_reduction <add>, %94, %cst_44 [2] : vector<8x16x16xf32> to vector<8x16xf32>
    %96 = vector.shape_cast %95 : vector<8x16xf32> to vector<8x16x1xf32>
    %97 = tpu.reciprocal %96 {approx = true} : vector<8x16x1xf32> -> vector<8x16x1xf32>
    %98 = vector.broadcast %97 : vector<8x16x1xf32> to vector<8x16x16xf32>
    %99 = arith.mulf %94, %98 : vector<8x16x16xf32>
    "tpu.trace_start"() <{level = 10 : i32, message = "bqk,bkd->bqd"}> : () -> ()
    %cst_45 = arith.constant dense<0.000000e+00> : vector<8x16x8xf32>
    %100 = tpu.matmul %99, %86, %cst_45 {dimension_numbers = #tpu.dot_dimension_numbers<[2], [1], [1], [2], [0, 0, 0, 1, 1, 2], [0], [0]>} : vector<8x16x16xf32>, vector<8x16x8xf32>, vector<8x16x8xf32> -> vector<8x16x8xf32>
    "tpu.trace_stop"() : () -> ()
    %101 = tpu.concatenate %49, %66, %83, %100 in 2 : vector<8x16x8xf32>, vector<8x16x8xf32>, vector<8x16x8xf32>, vector<8x16x8xf32> -> vector<8x16x32xf32>
    %cst_46 = arith.constant dense<0.000000e+00> : vector<8x16xf32>
    %102 = vector.multi_reduction <add>, %101, %cst_46 [2] : vector<8x16x32xf32> to vector<8x16xf32>
    %103 = vector.shape_cast %102 : vector<8x16xf32> to vector<8x16x1xf32>
    %cst_47 = arith.constant 3.200000e+01 : f32
    %104 = vector.broadcast %cst_47 : f32 to vector<8x16x1xf32>
    %105 = arith.divf %103, %104 : vector<8x16x1xf32>
    %106 = vector.broadcast %105 : vector<8x16x1xf32> to vector<8x16x32xf32>
    %107 = arith.subf %101, %106 : vector<8x16x32xf32>
    %108 = arith.mulf %107, %107 : vector<8x16x32xf32>
    %cst_48 = arith.constant dense<0.000000e+00> : vector<8x16xf32>
    %109 = vector.multi_reduction <add>, %108, %cst_48 [2] : vector<8x16x32xf32> to vector<8x16xf32>
    %110 = vector.shape_cast %109 : vector<8x16xf32> to vector<8x16x1xf32>
    %cst_49 = arith.constant 3.200000e+01 : f32
    %111 = vector.broadcast %cst_49 : f32 to vector<8x16x1xf32>
    %112 = arith.divf %110, %111 : vector<8x16x1xf32>
    %113 = vector.broadcast %105 : vector<8x16x1xf32> to vector<8x16x32xf32>
    %114 = arith.subf %101, %113 : vector<8x16x32xf32>
    %cst_50 = arith.constant 9.99999974E-6 : f32
    %115 = vector.broadcast %cst_50 : f32 to vector<8x16x1xf32>
    %116 = arith.addf %112, %115 : vector<8x16x1xf32>
    %117 = math.rsqrt %116 : vector<8x16x1xf32>
    %118 = vector.broadcast %117 : vector<8x16x1xf32> to vector<8x16x32xf32>
    %119 = arith.mulf %114, %118 : vector<8x16x32xf32>
    %120 = vector.shape_cast %3 : vector<1x32xf32> to vector<1x1x32xf32>
    %121 = vector.broadcast %120 : vector<1x1x32xf32> to vector<8x16x32xf32>
    %122 = arith.mulf %119, %121 : vector<8x16x32xf32>
    %123 = vector.shape_cast %4 : vector<1x32xf32> to vector<1x1x32xf32>
    %124 = vector.broadcast %123 : vector<1x1x32xf32> to vector<8x16x32xf32>
    %125 = arith.addf %122, %124 : vector<8x16x32xf32>
    %126 = vector.shape_cast %125 : vector<8x16x32xf32> to vector<128x32xf32>
    %c0_51 = arith.constant 0 : index
    %c0_52 = arith.constant 0 : index
    %127 = vector.load %arg7[%c0_51, %c0_52] : memref<32x16xf32, #tpu.memory_space<vmem>>, vector<32x16xf32>
    %cst_53 = arith.constant dense<0.000000e+00> : vector<128x16xf32>
    %128 = tpu.matmul %126, %127, %cst_53 {dimension_numbers = #tpu.dot_dimension_numbers<[1], [0], [0], [1], [0, 0, 1, 1], [], []>} : vector<128x32xf32>, vector<32x16xf32>, vector<128x16xf32> -> vector<128x16xf32>
    %129 = vector.broadcast %7 : vector<1x16xf32> to vector<128x16xf32>
    %130 = arith.addf %128, %129 : vector<128x16xf32>
    %131 = math.tanh %130 : vector<128x16xf32>
    %132 = vector.shape_cast %131 : vector<128x16xf32> to vector<8x16x16xf32>
    %133 = vector.shape_cast %8 : vector<1x16xf32> to vector<1x1x16xf32>
    %134 = vector.broadcast %133 : vector<1x1x16xf32> to vector<8x16x16xf32>
    %135 = arith.mulf %132, %134 : vector<8x16x16xf32>
    %cst_54 = arith.constant dense<0.000000e+00> : vector<8x16xf32>
    %136 = vector.multi_reduction <add>, %135, %cst_54 [2] : vector<8x16x16xf32> to vector<8x16xf32>
    %137 = vector.shape_cast %136 : vector<8x16xf32> to vector<8x16x1xf32>
    %138 = vector.shape_cast %9 : vector<1x1xf32> to vector<1x1x1xf32>
    %139 = vector.broadcast %138 : vector<1x1x1xf32> to vector<8x16x1xf32>
    %140 = arith.addf %137, %139 : vector<8x16x1xf32>
    %cst_55 = arith.constant dense<0xFF800000> : vector<8x1xf32>
    %141 = vector.multi_reduction <maximumf>, %140, %cst_55 [1] : vector<8x16x1xf32> to vector<8x1xf32>
    %142 = vector.shape_cast %141 : vector<8x1xf32> to vector<8x1x1xf32>
    %143 = vector.broadcast %142 : vector<8x1x1xf32> to vector<8x16x1xf32>
    %144 = arith.subf %140, %143 : vector<8x16x1xf32>
    %145 = math.exp %144 : vector<8x16x1xf32>
    %cst_56 = arith.constant dense<0.000000e+00> : vector<8x1xf32>
    %146 = vector.multi_reduction <add>, %145, %cst_56 [1] : vector<8x16x1xf32> to vector<8x1xf32>
    %147 = vector.shape_cast %146 : vector<8x1xf32> to vector<8x1x1xf32>
    %cst_57 = arith.constant 9.99999993E-9 : f32
    %148 = vector.broadcast %cst_57 : f32 to vector<8x1x1xf32>
    %149 = arith.addf %147, %148 : vector<8x1x1xf32>
    %150 = tpu.reciprocal %149 {approx = true} : vector<8x1x1xf32> -> vector<8x1x1xf32>
    %151 = vector.broadcast %150 : vector<8x1x1xf32> to vector<8x16x1xf32>
    %152 = arith.mulf %145, %151 : vector<8x16x1xf32>
    %153 = vector.broadcast %152 : vector<8x16x1xf32> to vector<8x16x32xf32>
    %154 = arith.mulf %153, %125 : vector<8x16x32xf32>
    %cst_58 = arith.constant dense<0.000000e+00> : vector<8x32xf32>
    %155 = vector.multi_reduction <add>, %154, %cst_58 [1] : vector<8x16x32xf32> to vector<8x32xf32>
    %cst_59 = arith.constant dense<0.000000e+00> : vector<8xf32>
    %156 = vector.multi_reduction <add>, %155, %cst_59 [1] : vector<8x32xf32> to vector<8xf32>
    %157 = vector.shape_cast %156 : vector<8xf32> to vector<8x1xf32>
    %cst_60 = arith.constant 3.200000e+01 : f32
    %158 = vector.broadcast %cst_60 : f32 to vector<8x1xf32>
    %159 = arith.divf %157, %158 : vector<8x1xf32>
    %160 = vector.broadcast %159 : vector<8x1xf32> to vector<8x32xf32>
    %161 = arith.subf %155, %160 : vector<8x32xf32>
    %162 = arith.mulf %161, %161 : vector<8x32xf32>
    %cst_61 = arith.constant dense<0.000000e+00> : vector<8xf32>
    %163 = vector.multi_reduction <add>, %162, %cst_61 [1] : vector<8x32xf32> to vector<8xf32>
    %164 = vector.shape_cast %163 : vector<8xf32> to vector<8x1xf32>
    %cst_62 = arith.constant 3.200000e+01 : f32
    %165 = vector.broadcast %cst_62 : f32 to vector<8x1xf32>
    %166 = arith.divf %164, %165 : vector<8x1xf32>
    %167 = vector.broadcast %159 : vector<8x1xf32> to vector<8x32xf32>
    %168 = arith.subf %155, %167 : vector<8x32xf32>
    %cst_63 = arith.constant 9.99999974E-6 : f32
    %169 = vector.broadcast %cst_63 : f32 to vector<8x1xf32>
    %170 = arith.addf %166, %169 : vector<8x1xf32>
    %171 = math.rsqrt %170 : vector<8x1xf32>
    %172 = vector.broadcast %171 : vector<8x1xf32> to vector<8x32xf32>
    %173 = arith.mulf %168, %172 : vector<8x32xf32>
    %174 = vector.broadcast %5 : vector<1x32xf32> to vector<8x32xf32>
    %175 = arith.mulf %173, %174 : vector<8x32xf32>
    %176 = vector.broadcast %6 : vector<1x32xf32> to vector<8x32xf32>
    %177 = arith.addf %175, %176 : vector<8x32xf32>
    %c0_64 = arith.constant 0 : index
    %c0_65 = arith.constant 0 : index
    %178 = vector.load %arg9[%c0_64, %c0_65] : memref<32x512xf32, #tpu.memory_space<vmem>>, vector<32x512xf32>
    %cst_66 = arith.constant dense<0.000000e+00> : vector<8x512xf32>
    %179 = tpu.matmul %177, %178, %cst_66 {dimension_numbers = #tpu.dot_dimension_numbers<[1], [0], [0], [1], [0, 0, 1, 1], [], []>} : vector<8x32xf32>, vector<32x512xf32>, vector<8x512xf32> -> vector<8x512xf32>
    %c0_67 = arith.constant 0 : index
    %c0_68 = arith.constant 0 : index
    %180 = vector.load %arg10[%c0_67, %c0_68] : memref<1x512xf32, #tpu.memory_space<vmem>>, vector<1x512xf32>
    %181 = vector.broadcast %180 : vector<1x512xf32> to vector<8x512xf32>
    %182 = arith.addf %179, %181 : vector<8x512xf32>
    %cst_69 = arith.constant 0.000000e+00 : f32
    %183 = vector.broadcast %cst_69 : f32 to vector<8x512xf32>
    %184 = arith.cmpf ogt, %182, %183 : vector<8x512xf32>
    %cst_70 = arith.constant 2.000000e-01 : f32
    %185 = vector.broadcast %cst_70 : f32 to vector<8x512xf32>
    %186 = arith.mulf %185, %182 : vector<8x512xf32>
    %187 = arith.select %184, %182, %186 : vector<8x512xi1>, vector<8x512xf32>
    %c0_71 = arith.constant 0 : index
    %c0_72 = arith.constant 0 : index
    %188 = vector.load %arg11[%c0_71, %c0_72] : memref<8x512xf32, #tpu.memory_space<vmem>>, vector<8x512xf32>
    tpu.vector_store %arg11[%c0_71, %c0_72], %187 {strides = array<i32>} : memref<8x512xf32, #tpu.memory_space<vmem>>, vector<8x512xf32>,
    return
  }
  func.func @transform_0(%arg0: i32) -> (i32, i32) {
    %c0_i32 = arith.constant 0 : i32
    %c0_i32_0 = arith.constant 0 : i32
    return %arg0, %c0_i32 : i32, i32
  }
  func.func @transform_1(%arg0: i32) -> (i32, i32) {
    %c0_i32 = arith.constant 0 : i32
    %c0_i32_0 = arith.constant 0 : i32
    %c0_i32_1 = arith.constant 0 : i32
    return %c0_i32, %c0_i32_0 : i32, i32
  }
  func.func @transform_2(%arg0: i32) -> (i32, i32) {
    %c0_i32 = arith.constant 0 : i32
    %c0_i32_0 = arith.constant 0 : i32
    %c0_i32_1 = arith.constant 0 : i32
    return %c0_i32, %c0_i32_0 : i32, i32
  }
  func.func @transform_3(%arg0: i32) -> (i32, i32) {
    %c0_i32 = arith.constant 0 : i32
    %c0_i32_0 = arith.constant 0 : i32
    %c0_i32_1 = arith.constant 0 : i32
    return %c0_i32, %c0_i32_0 : i32, i32
  }
  func.func @transform_4(%arg0: i32) -> (i32, i32) {
    %c0_i32 = arith.constant 0 : i32
    %c0_i32_0 = arith.constant 0 : i32
    %c0_i32_1 = arith.constant 0 : i32
    return %c0_i32, %c0_i32_0 : i32, i32
  }
  func.func @transform_5(%arg0: i32) -> (i32, i32) {
    %c0_i32 = arith.constant 0 : i32
    %c0_i32_0 = arith.constant 0 : i32
    %c0_i32_1 = arith.constant 0 : i32
    return %c0_i32, %c0_i32_0 : i32, i32
  }
  func.func @transform_6(%arg0: i32) -> (i32, i32) {
    %c0_i32 = arith.constant 0 : i32
    %c0_i32_0 = arith.constant 0 : i32
    %c0_i32_1 = arith.constant 0 : i32
    return %c0_i32, %c0_i32_0 : i32, i32
  }
  func.func @transform_7(%arg0: i32) -> (i32, i32) {
    %c0_i32 = arith.constant 0 : i32
    %c0_i32_0 = arith.constant 0 : i32
    %c0_i32_1 = arith.constant 0 : i32
    return %c0_i32, %c0_i32_0 : i32, i32
  }
  func.func @transform_8(%arg0: i32) -> (i32, i32) {
    %c0_i32 = arith.constant 0 : i32
    %c0_i32_0 = arith.constant 0 : i32
    %c0_i32_1 = arith.constant 0 : i32
    return %c0_i32, %c0_i32_0 : i32, i32
  }
  func.func @transform_9(%arg0: i32) -> (i32, i32) {
    %c0_i32 = arith.constant 0 : i32
    %c0_i32_0 = arith.constant 0 : i32
    %c0_i32_1 = arith.constant 0 : i32
    return %c0_i32, %c0_i32_0 : i32, i32
  }
  func.func @transform_10(%arg0: i32) -> (i32, i32) {
    %c0_i32 = arith.constant 0 : i32
    %c0_i32_0 = arith.constant 0 : i32
    return %arg0, %c0_i32 : i32, i32
  }
}

</mosaic_0001>

<bundles_post_ra>
// kernel: hie_entity_encoder.1
= control target key start
LH: loop header
LB: loop body
LE: loop exit
PB: predicated region body
PF: predicated region fallthrough
CT: control target
= control target key end

     0   :  { %v5923_v0 = vmov 0   ;;  %v61_v33 = vlaneseq  ;;  %v5924_v36 = vmov 1.0   ;;  %s5926_s21 = smov 112   ;;  %s5927_s22 = smov 104   ;;  %s8645_s0 = inlined_call_operand.vmem [shape: s32[128,1], index: 0, kind: input, shape index: {}]   ;;  %s8646_s1 = inlined_call_operand.vmem [shape: f32[128,32], index: 1, kind: input, shape index: {}]   ;;  %s8647_s2 = inlined_call_operand.vmem [shape: f32[32,32], index: 2, kind: input, shape index: {}]   ;;  %s8648_s5 = inlined_call_operand.vmem [shape: f32[8,32], index: 5, kind: input, shape index: {}]   ;;  %s8649_s3 = inlined_call_operand.vmem [shape: f32[32,32], index: 3, kind: input, shape index: {}]   ;;  %s8650_s4 = inlined_call_operand.vmem [shape: f32[32,32], index: 4, kind: input, shape index: {}]   ;;  %s8651_s6 = inlined_call_operand.vmem [shape: f32[32,16], index: 6, kind: input, shape index: {}]   ;;  %s8652_s7 = inlined_call_operand.vmem [shape: f32[8,16], index: 7, kind: input, shape index: {}]   ;;  %s8653_s8 = inlined_call_operand.vmem [shape: f32[32,512], index: 8, kind: input, shape index: {}]   ;;  %s8654_s9 = inlined_call_operand.vmem [shape: f32[1,512], index: 9, kind: input, shape index: {}]   ;;  %s8655_s10 = inlined_call_operand.vmem [shape: f32[8,512], index: 10, kind: output, shape index: {}]  }
   0x1   :  { %5419 = vset.pattern.permute.xlu1 %v5923_v0  ;;  %5418 = vset.pattern.permute.xlu0 %v5923_v0  ;;  %v47_v1 = vld [vmem:[%s8645_s0 + $0x10] sm:$0xff]  ;;  %v45_v2 = vld [vmem:[%s8645_s0] sm:$0xff]  ;;  %v48_v4 = vld [vmem:[%s8645_s0 + $0x18] sm:$0xff]  ;;  %s5929_s23 = smov 16   ;;  %s5930_s24 = smov 24  }
   0x2   :  { %70 = vperm.xlu1 %5419, %v47_v1   ;;  %64 = vperm.xlu0 %5418, %v45_v2   ;;  %v49_v3 = vld [vmem:[%s8645_s0 + $0x20] sm:$0xff]  ;;  %v46_v5 = vld [vmem:[%s8645_s0 + $0x8] sm:$0xff]  ;;  %v174_v7 = vld [vmem:[%s8646_s1 + $0x78] sm:$0xff]  ;;  %v6083_v34 = vand.u32 127, %v61_v33 }
   0x3   :  { %5420 = vset.pattern.permute.xlu2 %v5923_v0  ;;  %v50_v6 = vld [vmem:[%s8645_s0 + $0x28] sm:$0xff]  ;;  %175 = vmatpush.msra.mxu0 %v174_v7  ;;  %v173_v8 = vld [vmem:[%s8646_s1 + $0x70] sm:$0xff]  ;;  %v171_v10 = vld [vmem:[%s8646_s1 + $0x60] sm:$0xff] }
   0x4   :  { %76 = vperm.xlu2 %5420, %v49_v3   ;;  %v172_v9 = vld [vmem:[%s8646_s1 + $0x68] sm:$0xff]  ;;  %v52_v11 = vld [vmem:[%s8645_s0 + $0x38] sm:$0xff]  ;;  %v51_v12 = vld [vmem:[%s8645_s0 + $0x30] sm:$0xff] }
   0x5   :  { %176 = vmatpush.msra.mxu0 %v173_v8  ;;  %v170_v13 = vld [vmem:[%s8646_s1 + $0x58] sm:$0xff]  ;;  %v53_v14 = vld [vmem:[%s8645_s0 + $0x40] sm:$0xff]  ;;  %v169_v15 = vld [vmem:[%s8646_s1 + $0x50] sm:$0xff] }
   0x6   :  { %v168_v16 = vld [vmem:[%s8646_s1 + $0x48] sm:$0xff]  ;;  %v167_v17 = vld [vmem:[%s8646_s1 + $0x40] sm:$0xff]  ;;  %v55_v18 = vld [vmem:[%s8645_s0 + $0x50] sm:$0xff] }
   0x7   :  { %177 = vmatpush.msra.mxu0 %v172_v9  ;;  %v54_v19 = vld [vmem:[%s8645_s0 + $0x48] sm:$0xff]  ;;  %v166_v20 = vld [vmem:[%s8646_s1 + $0x38] sm:$0xff]  ;;  %v165_v22 = vld [vmem:[%s8646_s1 + $0x30] sm:$0xff] }
   0x8   :  { %v56_v21 = vld [vmem:[%s8645_s0 + $0x58] sm:$0xff]  ;;  %v164_v23 = vld [vmem:[%s8646_s1 + $0x28] sm:$0xff]  ;;  %v163_v24 = vld [vmem:[%s8646_s1 + $0x20] sm:$0xff] }
   0x9   :  { %178 = vmatpush.msra.mxu0 %v171_v10  ;;  %v58_v25 = vld [vmem:[%s8645_s0 + $0x68] sm:$0xff]  ;;  %v57_v26 = vld [vmem:[%s8645_s0 + $0x60] sm:$0xff]  ;;  %v162_v27 = vld [vmem:[%s8646_s1 + $0x18] sm:$0xff] }
   0xa   :  { %73 = vperm.xlu1 %5419, %v48_v4   ;;  %67 = vperm.xlu0 %5418, %v46_v5   ;;  %v59_v28 = vld [vmem:[%s8645_s0 + $0x70] sm:$0xff]  ;;  %v160_v30 = vld [vmem:[%s8646_s1 + $0x8] sm:$0xff]  ;;  %v60_v31 = vld [vmem:[%s8645_s0 + $0x78] sm:$0xff] }
   0xb   :  { %179 = vmatpush.msra.mxu0 %v170_v13  ;;  %v161_v29 = vld [vmem:[%s8646_s1 + $0x10] sm:$0xff]  ;;  %v159_v32 = vld [vmem:[%s8646_s1] sm:$0xff]  ;;  %v243_v48 = vld [vmem:[%s8647_s2 + $0x18] sm:$0xff]  ;;  %s5925_s1 = smov 120  }
   0xc   :  { %79 = vperm.xlu2 %5420, %v50_v6   ;;  %v242_v49 = vld [vmem:[%s8647_s2 + $0x10] sm:$0xff]  ;;  %5397 = vmatpush.msra.mxu1 %v243_v48  ;;  %v241_v51 = vld [vmem:[%s8647_s2 + $0x8] sm:$0xff]  ;;  %v240_v52 = vld [vmem:[%s8647_s2] sm:$0xff]  ;;  %s5928_s2 = smov 8  }
   0xd   :  { %180 = vmatpush.msra.mxu0 %v169_v15  ;;  %5398 = vmatpush.msra.mxu3 %v243_v48  ;;  %v362_v62 = vld [vmem:[%s8649_s3 + $0x18] sm:$0xff]  ;;  %v361_v63 = vld [vmem:[%s8649_s3 + $0x10] sm:$0xff]  ;;  %v360_v0 = vld [vmem:[%s8649_s3 + $0x8] sm:$0xff] }
   0xe   :  { %5399 = vmatpush.msra.mxu1 %v242_v49  ;;  %5405 = vmatpush.msra.mxu2 %v362_v62  ;;  %v359_v1 = vld [vmem:[%s8649_s3] sm:$0xff]  ;;  %v432_v8 = vld [vmem:[%s8650_s4 + $0x18] sm:$0xff]  ;;  %v431_v9 = vld [vmem:[%s8650_s4 + $0x10] sm:$0xff] }
   0xf   :  { %181 = vmatpush.msra.mxu0 %v168_v16  ;;  %5400 = vmatpush.msra.mxu3 %v242_v49  ;;  %v430_v10 = vld [vmem:[%s8650_s4 + $0x8] sm:$0xff]  ;;  %v6240_v16 = vld [vmem:[%s8648_s5] ss:$0 sm:$0xff] }
  0x10   :  { %5401 = vmatpush.msra.mxu1 %v241_v51  ;;  %5406 = vmatpush.msra.mxu2 %v361_v63 }
  0x11   :  { %182 = vmatpush.msra.mxu0 %v167_v17  ;;  %5402 = vmatpush.msra.mxu3 %v241_v51 }
  0x12   :  { %85 = vperm.xlu1 %5419, %v52_v11   ;;  %82 = vperm.xlu0 %5418, %v51_v12   ;;  %v429_v12 = vld [vmem:[%s8650_s4] sm:$0xff] }
  0x13   :  { %183 = vmatpush.msra.mxu0 %v166_v20  ;;  %5403 = vmatpush.msra.mxu1 %v240_v52 }
  0x14   :  { %88 = vperm.xlu2 %5420, %v53_v14   ;;  %5404 = vmatpush.msra.mxu3 %v240_v52 }
  0x15   :  { %184 = vmatpush.msra.mxu0 %v165_v22  ;;  %376 = vmatpush.msrb.mxu1 %v362_v62  ;;  %v6409_v62 = vld [vmem:[%s8648_s5 + $0x2] ss:$0 sm:$0xff] }
  0x16   :  { %5407 = vmatpush.msra.mxu2 %v360_v0  ;;  %446 = vmatpush.msrb.mxu3 %v432_v8 }
  0x17   :  { %185 = vmatpush.msra.mxu0 %v164_v23  ;;  %377 = vmatpush.msrb.mxu1 %v361_v63 }
  0x18   :  { %5408 = vmatpush.msra.mxu2 %v359_v1  ;;  %447 = vmatpush.msrb.mxu3 %v431_v9 }
  0x19   :  { %186 = vmatpush.msra.mxu0 %v163_v24  ;;  %378 = vmatpush.msrb.mxu1 %v360_v0 }
  0x1a   :  { %94 = vperm.xlu1 %5419, %v55_v18   ;;  %91 = vperm.xlu0 %5418, %v54_v19  }
  0x1b   :  { %187 = vmatpush.msra.mxu0 %v162_v27  ;;  %379 = vmatpush.msrb.mxu1 %v359_v1 }
  0x1c   :  { %97 = vperm.xlu2 %5420, %v56_v21   ;;  %448 = vmatpush.msrb.mxu3 %v430_v10 }
  0x1d   :  { %188 = vmatpush.msra.mxu0 %v161_v29 }
  0x1e   :  { %449 = vmatpush.msrb.mxu3 %v429_v12 }
  0x1f   :  { %189 = vmatpush.msra.mxu0 %v160_v30 }
  0x21   :  { %190 = vmatpush.msra.mxu0 %v159_v32 }
  0x22   :  { %103 = vperm.xlu1 %5419, %v58_v25   ;;  %100 = vperm.xlu0 %5418, %v57_v26  }
  0x23   :  { %306 = vmatpush.msrb.mxu0 %v243_v48 }
  0x24   :  { %106 = vperm.xlu2 %5420, %v59_v28  }
  0x25   :  { %307 = vmatpush.msrb.mxu0 %v242_v49 }
  0x27   :  { %308 = vmatpush.msrb.mxu0 %v241_v51 }
  0x29   :  { %309 = vmatpush.msrb.mxu0 %v240_v52 }
  0x2a   :  { %109 = vperm.xlu0 %5418, %v60_v31  }
  0x5e   :  { %v77_v40 = vpop.permute.xlu2 %76 }
  0x5f   :  { %vm115_vm4 = vcmp.eq.s32.totalorder %v6083_v34, %v77_v40 }
  0x66   :  { %v80_v41 = vpop.permute.xlu2 %79 }
  0x67   :  { %vm116_vm5 = vcmp.eq.s32.totalorder %v6083_v34, %v80_v41 }
  0x6e   :  { %v89_v44 = vpop.permute.xlu2 %88 }
  0x6f   :  { %vm119_vm8 = vcmp.eq.s32.totalorder %v6083_v34, %v89_v44 }
  0x74   :  { %v65_v35 = vpop.permute.xlu0 %64  ;;  %v71_v38 = vpop.permute.xlu1 %70 }
  0x75   :  { %vm111_vm0 = vcmp.eq.s32.totalorder %v6083_v34, %v65_v35  ;;  %vm113_vm2 = vcmp.eq.s32.totalorder %v6083_v34, %v71_v38 }
  0x76   :  { %5121 = vmatmul.msk.f32.vlgmr.msra.gmra.mxu0 %vm111_vm0, %v5924_v36  ;;  %v98_v47 = vpop.permute.xlu2 %97  ;;  %vm245_vm0 = vcmask 261120  }
  0x77   :  { %vm122_vm11 = vcmp.eq.s32.totalorder %v6083_v34, %v98_v47 }
  0x7c   :  { %v68_v37 = vpop.permute.xlu0 %67  ;;  %v74_v39 = vpop.permute.xlu1 %73 }
  0x7d   :  { %vm112_vm1 = vcmp.eq.s32.totalorder %v6083_v34, %v68_v37  ;;  %vm114_vm3 = vcmp.eq.s32.totalorder %v6083_v34, %v74_v39 }
  0x7e   :  { %5122 = vmatmul.msk.f32.gmra.mxu0 %vm112_vm1, %v5924_v36  ;;  %v107_v54 = vpop.permute.xlu2 %106  ;;  %vm499_vm1 = vcmask 64512  }
  0x7f   :  { %vm125_vm14 = vcmp.eq.s32.totalorder %v6083_v34, %v107_v54 }
  0x84   :  { %v83_v42 = vpop.permute.xlu0 %82  ;;  %v86_v43 = vpop.permute.xlu1 %85 }
  0x85   :  { %vm117_vm6 = vcmp.eq.s32.totalorder %v6083_v34, %v83_v42  ;;  %vm118_vm7 = vcmp.eq.s32.totalorder %v6083_v34, %v86_v43 }
  0x86   :  { %5123 = vmatmul.msk.f32.gmra.mxu0 %vm113_vm2, %v5924_v36  ;;  %vm796_vm2 = vcmask 130048  }
  0x8c   :  { %v92_v45 = vpop.permute.xlu0 %91  ;;  %v95_v46 = vpop.permute.xlu1 %94 }
  0x8d   :  { %vm120_vm9 = vcmp.eq.s32.totalorder %v6083_v34, %v92_v45  ;;  %vm121_vm10 = vcmp.eq.s32.totalorder %v6083_v34, %v95_v46 }
  0x8e   :  { %5124 = vmatmul.msk.f32.gmra.mxu0 %vm114_vm3, %v5924_v36  ;;  %vm3797_vm3 = vcmask 195584  }
  0x94   :  { %v101_v50 = vpop.permute.xlu0 %100  ;;  %v104_v53 = vpop.permute.xlu1 %103 }
  0x95   :  { %vm123_vm12 = vcmp.eq.s32.totalorder %v6083_v34, %v101_v50  ;;  %vm124_vm13 = vcmp.eq.s32.totalorder %v6083_v34, %v104_v53 }
  0x96   :  { %5125 = vmatmul.msk.f32.gmra.mxu0 %vm115_vm4, %v5924_v36 }
  0x9c   :  { %v110_v55 = vpop.permute.xlu0 %109 }
  0x9d   :  { %vm126_vm15 = vcmp.eq.s32.totalorder %v6083_v34, %v110_v55  ;;  %v6317_v34 = vld [vmem:[%s8648_s5 + $0x1] ss:$0 sm:$0xff] }
  0x9e   :  { %5126 = vmatmul.msk.f32.gmra.mxu0 %vm116_vm5, %v5924_v36 }
  0xa6   :  { %5127 = vmatmul.msk.f32.gmra.mxu0 %vm117_vm6, %v5924_v36 }
  0xae   :  { %5128 = vmatmul.msk.f32.gmra.mxu0 %vm118_vm7, %v5924_v36 }
  0xb6   :  { %5129 = vmatmul.msk.f32.gmra.mxu0 %vm119_vm8, %v5924_v36 }
  0xbe   :  { %5130 = vmatmul.msk.f32.gmra.mxu0 %vm120_vm9, %v5924_v36 }
  0xc6   :  { %5131 = vmatmul.msk.f32.gmra.mxu0 %vm121_vm10, %v5924_v36 }
  0xce   :  { %5132 = vmatmul.msk.f32.gmra.mxu0 %vm122_vm11, %v5924_v36 }
  0xd6   :  { %5133 = vmatmul.msk.f32.gmra.mxu0 %vm123_vm12, %v5924_v36 }
  0xde   :  { %5134 = vmatmul.msk.f32.gmra.mxu0 %vm124_vm13, %v5924_v36 }
  0xe6   :  { %5135 = vmatmul.msk.f32.gmra.mxu0 %vm125_vm14, %v5924_v36 }
  0xee   :  { %5136 = vmatmul.msk.f32.gmra.mxu0 %vm126_vm15, %v5924_v36 }
  0xf3   :  { %v6129_v56 = vpop.f32.mrf.mxu0 }
  0xf6   :  { %5137 = vmatmul.msk.f32.vlgmr.msrb.gmra.mxu0 %vm245_vm0, %v6129_v56 }
  0xfb   :  { %v6133_v57 = vpop.f32.mrf.mxu0 }
  0xfe   :  { %5138 = vmatmul.msk.f32.gmra.mxu0 %vm245_vm0, %v6133_v57 }
 0x103   :  { %v6137_v58 = vpop.f32.mrf.mxu0 }
 0x104   :  { %5139 = vmatmul.msk.f32.vlgmr.msra.gmra.mxu1 %vm245_vm0, %v6137_v58 }
 0x10b   :  { %v6141_v59 = vpop.f32.mrf.mxu0 }
 0x10c   :  { %5140 = vmatmul.msk.f32.gmra.mxu1 %vm245_vm0, %v6141_v59 }
 0x113   :  { %v6145_v60 = vpop.f32.mrf.mxu0 }
 0x114   :  { %5141 = vmatmul.msk.f32.gmra.mxu1 %vm245_vm0, %v6145_v60 }
 0x11b   :  { %v6149_v61 = vpop.f32.mrf.mxu0 }
 0x11c   :  { %5142 = vmatmul.msk.f32.gmra.mxu1 %vm245_vm0, %v6149_v61 }
 0x123   :  { %v6165_v2 = vpop.f32.mrf.mxu0 }
 0x124   :  { %5143 = vmatmul.msk.f32.gmra.mxu1 %vm245_vm0, %v6165_v2 }
 0x12b   :  { %v6169_v3 = vpop.f32.mrf.mxu0 }
 0x12c   :  { %5144 = vmatmul.msk.f32.gmra.mxu1 %vm245_vm0, %v6169_v3 }
 0x133   :  { %v6173_v4 = vpop.f32.mrf.mxu0 }
 0x134   :  { %5145 = vmatmul.msk.f32.gmra.mxu1 %vm245_vm0, %v6173_v4 }
 0x13b   :  { %v6177_v5 = vpop.f32.mrf.mxu0 }
 0x13c   :  { %5146 = vmatmul.msk.f32.gmra.mxu1 %vm245_vm0, %v6177_v5 }
 0x143   :  { %v6181_v6 = vpop.f32.mrf.mxu0 }
 0x144   :  { %5147 = vmatmul.msk.f32.gmra.mxu1 %vm245_vm0, %v6181_v6  ;;  %5163 = vmatmul.msk.f32.vlgmr.msra.gmra.mxu2 %vm245_vm0, %v6181_v6 }
 0x14b   :  { %v6187_v7 = vpop.f32.mrf.mxu0 }
 0x14c   :  { %5148 = vmatmul.msk.f32.gmra.mxu1 %vm245_vm0, %v6187_v7  ;;  %5164 = vmatmul.msk.f32.gmra.mxu2 %vm245_vm0, %v6187_v7 }
 0x153   :  { %v6202_v11 = vpop.f32.mrf.mxu0 }
 0x154   :  { %5149 = vmatmul.msk.f32.vlgmr.msra.gmra.mxu3 %vm245_vm0, %v6202_v11  ;;  %5153 = vmatmul.msk.f32.vlgmr.msrb.gmra.mxu1 %vm245_vm0, %v6129_v56 }
 0x155   :  { %5165 = vmatmul.msk.f32.gmra.mxu2 %vm245_vm0, %v6202_v11 }
 0x15b   :  { %v6213_v13 = vpop.f32.mrf.mxu0 }
 0x15c   :  { %5150 = vmatmul.msk.f32.gmra.mxu3 %vm245_vm0, %v6213_v13  ;;  %5154 = vmatmul.msk.f32.gmra.mxu1 %vm245_vm0, %v6133_v57 }
 0x15d   :  { %5166 = vmatmul.msk.f32.gmra.mxu2 %vm245_vm0, %v6213_v13 }
 0x163   :  { %v6221_v14 = vpop.f32.mrf.mxu0 }
 0x164   :  { %5151 = vmatmul.msk.f32.gmra.mxu3 %vm245_vm0, %v6221_v14  ;;  %5155 = vmatmul.msk.f32.gmra.mxu1 %vm245_vm0, %v6137_v58 }
 0x165   :  { %5167 = vmatmul.msk.f32.gmra.mxu2 %vm245_vm0, %v6221_v14 }
 0x16b   :  { %v6229_v15 = vpop.f32.mrf.mxu0 }
 0x16c   :  { %5152 = vmatmul.msk.f32.gmra.mxu3 %vm245_vm0, %v6229_v15  ;;  %5156 = vmatmul.msk.f32.gmra.mxu1 %vm245_vm0, %v6141_v59 }
 0x16d   :  { %5168 = vmatmul.msk.f32.gmra.mxu2 %vm245_vm0, %v6229_v15 }
 0x173   :  { %v311_v17 = vpop.f32.mrf.mxu0 }
 0x174   :  { %v6243_v18 = vadd.f32 %v6240_v16, %v311_v17  ;;  %5157 = vmatmul.msk.f32.gmra.mxu1 %vm245_vm0, %v6145_v60  ;;  %5169 = vmatmul.msk.f32.vlgmr.msrb.gmra.mxu3 %vm245_vm0, %v6129_v56 }
 0x176   :  { %1205 = vrot.lane.b32.xlu1 %v6243_v18, %s5925_s1 }
 0x17b   :  { %v314_v19 = vpop.f32.mrf.mxu0 }
 0x17c   :  { %v6252_v20 = vadd.f32 %v6240_v16, %v314_v19  ;;  %5158 = vmatmul.msk.f32.gmra.mxu1 %vm245_vm0, %v6149_v61  ;;  %5170 = vmatmul.msk.f32.gmra.mxu3 %vm245_vm0, %v6133_v57 }
 0x17e   :  { %1207 = vrot.lane.b32.xlu2 %v6252_v20, %s5925_s1 }
 0x181   :  { %v317_v21 = vpop.f32.mrf.mxu1 }
 0x182   :  { %v6261_v22 = vadd.f32 %v6240_v16, %v317_v21 }
 0x184   :  { %8694 = vst [vmem:[#allocation2_spill] sm:$0xff] %v6261_v22  ;;  %5159 = vmatmul.msk.f32.gmra.mxu1 %vm245_vm0, %v6165_v2  ;;  %5171 = vmatmul.msk.f32.gmra.mxu3 %vm245_vm0, %v6137_v58 }
 0x185   :  { %1244 = vrot.lane.b32.xlu1 %v6261_v22, %s5925_s1 }
 0x189   :  { %v320_v23 = vpop.f32.mrf.mxu1 }
 0x18a   :  { %v6270_v24 = vadd.f32 %v6240_v16, %v320_v23 }
 0x18c   :  { %8695 = vst [vmem:[#allocation3_spill] sm:$0xff] %v6270_v24  ;;  %1246 = vrot.lane.b32.xlu0 %v6270_v24, %s5925_s1  ;;  %5160 = vmatmul.msk.f32.gmra.mxu1 %vm245_vm0, %v6169_v3 }
 0x18d   :  { %5172 = vmatmul.msk.f32.gmra.mxu3 %vm245_vm0, %v6141_v59 }
 0x191   :  { %v6278_v25 = vpop.f32.mrf.mxu1 }
 0x194   :  { %5161 = vmatmul.msk.f32.gmra.mxu1 %vm245_vm0, %v6173_v4 }
 0x195   :  { %5173 = vmatmul.msk.f32.gmra.mxu3 %vm245_vm0, %v6145_v60 }
 0x199   :  { %v6284_v26 = vpop.f32.mrf.mxu1 }
 0x19a   :  { %v6434_v8 = vadd.f32 %v6240_v16, %v6284_v26 }
 0x19c   :  { %5162 = vmatmul.msk.f32.gmra.mxu1 %vm245_vm0, %v6177_v5 }
 0x19d   :  { %5174 = vmatmul.msk.f32.gmra.mxu3 %vm245_vm0, %v6149_v61 }
 0x1a1   :  { %v6290_v27 = vpop.f32.mrf.mxu1 }
 0x1a5   :  { %5175 = vmatmul.msk.f32.gmra.mxu3 %vm245_vm0, %v6165_v2 }
 0x1a9   :  { %v6294_v28 = vpop.f32.mrf.mxu1 }
 0x1ad   :  { %5176 = vmatmul.msk.f32.gmra.mxu3 %vm245_vm0, %v6169_v3  ;;  %v6422_v3 = vadd.f32 %v6240_v16, %v6278_v25 }
 0x1b1   :  { %v335_v29 = vpop.f32.mrf.mxu1 }
 0x1b2   :  { %v6299_v30 = vadd.f32 %v6240_v16, %v335_v29 }
 0x1b4   :  { %8696 = vst [vmem:[#allocation4_spill] sm:$0xff] %v6299_v30  ;;  %1361 = vrot.lane.b32.xlu0 %v6299_v30, %s5925_s1 }
 0x1b5   :  { %5177 = vmatmul.msk.f32.gmra.mxu3 %vm245_vm0, %v6173_v4 }
 0x1b9   :  { %v338_v31 = vpop.f32.mrf.mxu1 }
 0x1ba   :  { %v6306_v32 = vadd.f32 %v6240_v16, %v338_v31  ;;  %v6487_v31 = vadd.f32 %v6240_v16, %v6294_v28 }
 0x1bc   :  { %8697 = vst [vmem:[#allocation5_spill] sm:$0xff] %v6306_v32  ;;  %1363 = vrot.lane.b32.xlu0 %v6306_v32, %s5925_s1 }
 0x1bd   :  { %5178 = vmatmul.msk.f32.gmra.mxu3 %vm245_vm0, %v6177_v5 }
 0x1c1   :  { %v6312_v33 = vpop.f32.mrf.mxu1 }
 0x1c2   :  { %v6465_v23 = vadd.f32 %v6240_v16, %v6312_v33 }
 0x1c4   :  { %8708 = vst [vmem:[#allocation16_spill] sm:$0xff] %v6465_v23 }
 0x1c5   :  { %5179 = vmatmul.msk.f32.gmra.mxu3 %vm245_vm0, %v6181_v6 }
 0x1c7   :  { %v411_v35 = vpop.f32.mrf.mxu2 }
 0x1c8   :  { %v6322_v36 = vadd.f32 %v6317_v34, %v411_v35 }
 0x1c9   :  { %v6324_v37 = vpop.f32.mrf.mxu1 }
 0x1ca   :  { %8698 = vst [vmem:[#allocation6_spill] sm:$0xff] %v6322_v36  ;;  %1404 = vrot.lane.b32.xlu0 %v6322_v36, %s5925_s1  ;;  %v6491_v35 = vadd.f32 %v6240_v16, %v6324_v37 }
 0x1cc   :  { %8710 = vst [vmem:[#allocation18_spill] sm:$0xff] %v6491_v35 }
 0x1cd   :  { %5180 = vmatmul.msk.f32.gmra.mxu3 %vm245_vm0, %v6187_v7 }
 0x1cf   :  { %v414_v38 = vpop.f32.mrf.mxu2 }
 0x1d0   :  { %v6331_v39 = vadd.f32 %v6317_v34, %v414_v38 }
 0x1d1   :  { %v381_v40 = vpop.f32.mrf.mxu1 }
 0x1d2   :  { %8699 = vst [vmem:[#allocation7_spill] sm:$0xff] %v6331_v39  ;;  %1406 = vrot.lane.b32.xlu2 %v6331_v39, %s5925_s1  ;;  %v6338_v42 = vadd.f32 %v6317_v34, %v381_v40 }
 0x1d4   :  { %8700 = vst [vmem:[#allocation8_spill] sm:$0xff] %v6338_v42 }
 0x1d5   :  { %5181 = vmatmul.msk.f32.gmra.mxu3 %vm245_vm0, %v6202_v11 }
 0x1d7   :  { %v347_v41 = vpop.f32.mrf.mxu3 }
 0x1d8   :  { %v417_v43 = vpop.f32.mrf.mxu2  ;;  %v6375_v53 = vadd.f32 %v6240_v16, %v347_v41 }
 0x1d9   :  { %v384_v44 = vpop.f32.mrf.mxu1  ;;  %v6366_v51 = vadd.f32 %v6317_v34, %v417_v43 }
 0x1da   :  { %v6341_v45 = vadd.f32 %v6317_v34, %v384_v44  ;;  %1209 = vrot.lane.b32.xlu2 %v6338_v42, %s5925_s1 }
 0x1dc   :  { %8701 = vst [vmem:[#allocation9_spill] sm:$0xff] %v6341_v45  ;;  %1211 = vrot.lane.b32.xlu0 %v6341_v45, %s5925_s1  ;;  %5185 = vmatpush.xpose.msk.msra.mxu1 %vm499_vm1, %v6341_v45 }
 0x1dd   :  { %5182 = vmatmul.msk.f32.gmra.mxu3 %vm245_vm0, %v6213_v13 }
 0x1df   :  { %v350_v46 = vpop.f32.mrf.mxu3 }
 0x1e0   :  { %v420_v47 = vpop.f32.mrf.mxu2  ;;  %5186 = vmatpush.xpose.msk.msra.mxu1 %vm499_vm1, %v6338_v42  ;;  %v6393_v57 = vadd.f32 %v6240_v16, %v350_v46 }
 0x1e1   :  { %v6354_v48 = vadd.f32 %v6317_v34, %v420_v47  ;;  %v387_v49 = vpop.f32.mrf.mxu1 }
 0x1e2   :  { %v6357_v50 = vadd.f32 %v6317_v34, %v387_v49 }
 0x1e3   :  { %5209 = vmatpush.xpose.msk.msra.mxu0 %vm499_vm1, %v6354_v48  ;;  %5187 = vmatmul.msk.f32.vlgmr.msra.gmra.mxu1 %vm499_vm1, %v6243_v18 }
 0x1e4   :  { %1248 = vrot.lane.b32.xlu2 %v6357_v50, %s5925_s1 }
 0x1e5   :  { %5183 = vmatmul.msk.f32.gmra.mxu3 %vm245_vm0, %v6221_v14 }
 0x1e7   :  { %5210 = vmatpush.xpose.msk.msra.mxu0 %vm499_vm1, %v6366_v51  ;;  %v6372_v52 = vpop.f32.mrf.mxu3 }
 0x1e8   :  { %v423_v5 = vpop.f32.mrf.mxu2  ;;  %v6510_v40 = vadd.f32 %v6240_v16, %v6372_v52 }
 0x1e9   :  { %v390_v54 = vpop.f32.mrf.mxu1  ;;  %v6471_v26 = vadd.f32 %v6317_v34, %v423_v5 }
 0x1ea   :  { %v6378_v55 = vadd.f32 %v6317_v34, %v390_v54  ;;  %5211 = vmatmul.msk.f32.vlgmr.msra.gmra.mxu0 %vm499_vm1, %v6375_v53 }
 0x1eb   :  { %5188 = vmatmul.msk.f32.gmra.mxu1 %vm499_vm1, %v6252_v20 }
 0x1ec   :  { %8702 = vst [vmem:[#allocation10_spill] sm:$0xff] %v6378_v55  ;;  %5189 = vmatpush.xpose.msk.msrb.mxu2 %vm499_vm1, %v6378_v55  ;;  %1250 = vrot.lane.b32.xlu2 %v6378_v55, %s5925_s1 }
 0x1ed   :  { %5184 = vmatmul.msk.f32.gmra.mxu3 %vm245_vm0, %v6229_v15  ;;  %v6453_v15 = vadd.f32 %v6240_v16, %v6290_v27 }
 0x1ef   :  { %v6390_v56 = vpop.f32.mrf.mxu3 }
 0x1f0   :  { %5190 = vmatpush.xpose.msk.msrb.mxu2 %vm499_vm1, %v6357_v50  ;;  %v426_v11 = vpop.f32.mrf.mxu2  ;;  %v6520_v44 = vadd.f32 %v6240_v16, %v6390_v56 }
 0x1f1   :  { %v393_v58 = vpop.f32.mrf.mxu1  ;;  %v6447_v13 = vadd.f32 %v6317_v34, %v426_v11 }
 0x1f2   :  { %5212 = vmatmul.msk.f32.gmra.mxu0 %vm499_vm1, %v6393_v57  ;;  %v6414_v63 = vadd.f32 %v6317_v34, %v393_v58 }
 0x1f3   :  { %5191 = vmatmul.msk.f32.vlgmr.msrb.gmra.mxu2 %vm499_vm1, %v6261_v22 }
 0x1f4   :  { %8704 = vst [vmem:[#allocation12_spill] sm:$0xff] %v6414_v63 }
 0x1f7   :  { %v451_v59 = vpop.f32.mrf.mxu3 }
 0x1f8   :  { %v452_v1 = vadd.f32 %v6409_v62, %v451_v59 }
 0x1f9   :  { %v396_v60 = vpop.f32.mrf.mxu1 }
 0x1fa   :  { %v6402_v61 = vadd.f32 %v6317_v34, %v396_v60 }
 0x1fb   :  { %5192 = vmatmul.msk.f32.gmra.mxu2 %vm499_vm1, %v6270_v24 }
 0x1fc   :  { %8703 = vst [vmem:[#allocation11_spill] sm:$0xff] %v6402_v61  ;;  %5193 = vmatpush.xpose.msk.msra.mxu3 %vm499_vm1, %v6402_v61 }
 0x1ff   :  { %v454_v0 = vpop.f32.mrf.mxu3 }
 0x200   :  { %v455_v2 = vadd.f32 %v6409_v62, %v454_v0  ;;  %5194 = vmatpush.xpose.msk.msra.mxu3 %vm499_vm1, %v6414_v63 }
 0x201   :  { %v399_v4 = vpop.f32.mrf.mxu1 }
 0x202   :  { %v6426_v6 = vpack.i.bf16 %v452_v1, %v455_v2  ;;  %v6444_v12 = vadd.f32 %v6317_v34, %v399_v4 }
 0x203   :  { %5195 = vmatmul.msk.f32.vlgmr.msra.gmra.mxu3 %vm499_vm1, %v6422_v3 }
 0x204   :  { %5205 = vmatpush.xpose.msk.msrb.mxu3 %vm499_vm1, %v6331_v39  ;;  %8705 = vst [vmem:[#allocation13_spill] sm:$0xff] %v6426_v6 }
 0x207   :  { %v457_v7 = vpop.f32.mrf.mxu3 }
 0x208   :  { %5206 = vmatpush.xpose.msk.msrb.mxu3 %vm499_vm1, %v6322_v36  ;;  %v6456_v17 = vadd.f32 %v6409_v62, %v457_v7 }
 0x209   :  { %v402_v9 = vpop.f32.mrf.mxu1 }
 0x20a   :  { %v6437_v10 = vadd.f32 %v6317_v34, %v402_v9  ;;  %8706 = vst [vmem:[#allocation14_spill] sm:$0xff] %v6456_v17 }
 0x20b   :  { %5196 = vmatmul.msk.f32.gmra.mxu3 %vm499_vm1, %v6434_v8 }
 0x20c   :  { %5197 = vmatpush.xpose.msk.msrb.mxu1 %vm499_vm1, %v6437_v10 }
 0x210   :  { %v460_v14 = vpop.f32.mrf.mxu3  ;;  %5198 = vmatpush.xpose.msk.msrb.mxu1 %vm499_vm1, %v6444_v12 }
 0x211   :  { %v6459_v19 = vadd.f32 %v6409_v62, %v460_v14  ;;  %v405_v21 = vpop.f32.mrf.mxu1 }
 0x212   :  { %v6468_v25 = vadd.f32 %v6317_v34, %v405_v21 }
 0x213   :  { %8707 = vst [vmem:[#allocation15_spill] sm:$0xff] %v6459_v19  ;;  %1022 = vmatpush.msra.mxu3 %v6459_v19  ;;  %5199 = vmatmul.msk.f32.vlgmr.msrb.gmra.mxu1 %vm499_vm1, %v6453_v15 }
 0x214   :  { %5213 = vmatpush.xpose.msk.msra.mxu1 %vm499_vm1, %v6447_v13  ;;  %8709 = vst [vmem:[#allocation17_spill] sm:$0xff] %v6468_v25  ;;  %5207 = vmatmul.msk.f32.vlgmr.msrb.gmra.mxu3 %vm499_vm1, %v6465_v23 }
 0x215   :  { %1365 = vrot.lane.b32.xlu1 %v6468_v25, %s5925_s1  ;;  %1023 = vmatpush.msra.mxu3 %v6456_v17 }
 0x218   :  { %5214 = vmatpush.xpose.msk.msra.mxu1 %vm499_vm1, %v6471_v26  ;;  %v463_v29 = vpop.f32.mrf.mxu3 }
 0x219   :  { %v408_v33 = vpop.f32.mrf.mxu1  ;;  %v464_v37 = vadd.f32 %v6409_v62, %v463_v29 }
 0x21a   :  { %v6494_v38 = vadd.f32 %v6317_v34, %v408_v33 }
 0x21b   :  { %5200 = vmatmul.msk.f32.gmra.mxu1 %vm499_vm1, %v6487_v31 }
 0x21c   :  { %8711 = vst [vmem:[#allocation19_spill] sm:$0xff] %v6494_v38  ;;  %5208 = vmatmul.msk.f32.gmra.mxu3 %vm499_vm1, %v6491_v35  ;;  %5201 = vmatpush.xpose.msk.msra.mxu2 %vm499_vm1, %v6494_v38 }
 0x21d   :  { %1367 = vrot.lane.b32.xlu1 %v6494_v38, %s5925_s1 }
 0x220   :  { %v466_v28 = vpop.f32.mrf.mxu3  ;;  %5202 = vmatpush.xpose.msk.msra.mxu2 %vm499_vm1, %v6468_v25 }
 0x221   :  { %v467_v34 = vadd.f32 %v6409_v62, %v466_v28 }
 0x223   :  { %1051 = vmatpush.msrb.mxu0 %v467_v34  ;;  %5203 = vmatmul.msk.f32.vlgmr.msra.gmra.mxu2 %vm499_vm1, %v6299_v30  ;;  %v6514_v41 = vpack.i.bf16 %v464_v37, %v467_v34 }
 0x224   :  { %993 = vmatpush.msrb.mxu2 %v455_v2  ;;  %5215 = vmatmul.msk.f32.vlgmr.msra.gmra.mxu1 %vm499_vm1, %v6510_v40 }
 0x225   :  { %1052 = vmatpush.msrb.mxu0 %v464_v37 }
 0x226   :  { %994 = vmatpush.msrb.mxu2 %v452_v1 }
 0x228   :  { %v469_v43 = vpop.f32.mrf.mxu3 }
 0x229   :  { %v6527_v47 = vadd.f32 %v6409_v62, %v469_v43 }
 0x22b   :  { %5204 = vmatmul.msk.f32.gmra.mxu2 %vm499_vm1, %v6306_v32  ;;  %8712 = vst [vmem:[#allocation20_spill] sm:$0xff] %v6527_v47 }
 0x22c   :  { %5216 = vmatmul.msk.f32.gmra.mxu1 %vm499_vm1, %v6520_v44 }
 0x230   :  { %v472_v46 = vpop.f32.mrf.mxu3 }
 0x231   :  { %v6530_v49 = vadd.f32 %v6409_v62, %v472_v46 }
 0x233   :  { %8713 = vst [vmem:[#allocation21_spill] sm:$0xff] %v6530_v49  ;;  %1080 = vmatpush.msrb.mxu1 %v6530_v49 }
 0x235   :  { %1081 = vmatpush.msrb.mxu1 %v6527_v47 }
 0x238   :  { %v475_v16 = vpop.f32.mrf.mxu3 }
 0x239   :  { %v6537_v54 = vadd.f32 %v6409_v62, %v475_v16 }
 0x23b   :  { %8714 = vst [vmem:[#allocation22_spill] sm:$0xff] %v6537_v54  ;;  %v6541_v56 = vpack.i.bf16 %v6537_v54, %v6456_v17 }
 0x240   :  { %v478_v58 = vpop.f32.mrf.mxu3 }
 0x241   :  { %v6544_v59 = vadd.f32 %v6409_v62, %v478_v58 }
 0x243   :  { %8715 = vst [vmem:[#allocation23_spill] sm:$0xff] %v6544_v59  ;;  %1109 = vmatpush.msra.mxu2 %v6544_v59  ;;  %v6549_v60 = vpack.i.bf16 %v6544_v59, %v6459_v19  ;;  %v6644_v19 = vpop.permute.xlu2 %1207 }
 0x244   :  { %8722 = vst [vmem:[#allocation30_spill] sm:$0xff] %v6644_v19 }
 0x245   :  { %1110 = vmatpush.msra.mxu2 %v6537_v54 }
 0x248   :  { %v481_v1 = vpop.f32.mrf.mxu3 }
 0x249   :  { %v482_v4 = vadd.f32 %v6409_v62, %v481_v1 }
 0x24b   :  { %v6650_v17 = vpop.permute.xlu2 %1406 }
 0x250   :  { %v484_v2 = vpop.f32.mrf.mxu3 }
 0x251   :  { %v485_v5 = vadd.f32 %v6409_v62, %v484_v2 }
 0x253   :  { %1138 = vmatpush.msrb.mxu3 %v485_v5  ;;  %v6556_v7 = vpack.i.bf16 %v482_v4, %v485_v5 }
 0x255   :  { %8716 = vst [vmem:[#allocation24_spill] sm:$0xff] %v6556_v7  ;;  %1139 = vmatpush.msrb.mxu3 %v482_v4 }
 0x258   :  { %v487_v9 = vpop.f32.mrf.mxu3 }
 0x259   :  { %v6559_v11 = vadd.f32 %v6409_v62, %v487_v9 }
 0x25b   :  { %8717 = vst [vmem:[#allocation25_spill] sm:$0xff] %v6559_v11  ;;  %v6563_v14 = vpack.i.bf16 %v6559_v11, %v6527_v47 }
 0x25d   :  { %8718 = vst [vmem:[#allocation26_spill] sm:$0xff] %v6563_v14 }
 0x260   :  { %v490_v21 = vpop.f32.mrf.mxu3  ;;  %v529_v29 = vpop.f32.mrf.mxu1 }
 0x261   :  { %v6566_v33 = vadd.f32 %v6409_v62, %v490_v21  ;;  %v6568_v28 = vmul.f32 0.35355338, %v529_v29 }
 0x263   :  { %8719 = vst [vmem:[#allocation27_spill] sm:$0xff] %v6566_v33  ;;  %1167 = vmatpush.msra.mxu0 %v6566_v33  ;;  %v797_v37 = vsel %vm796_vm2, %v6568_v28, -inf  ;;  %v6575_v34 = vpack.i.bf16 %v6566_v33, %v6530_v49 }
 0x264   :  { %798 = vmax.xlane.f32.xlu1 %v797_v37 }
 0x265   :  { %8720 = vst [vmem:[#allocation28_spill] sm:$0xff] %v6575_v34  ;;  %1168 = vmatpush.msra.mxu0 %v6559_v11 }
 0x267   :  { %v739_v46 = vpop.f32.mrf.mxu0 }
 0x268   :  { %v6580_v16 = vmul.f32 0.35355338, %v739_v46  ;;  %v493_v58 = vpop.f32.mrf.mxu3  ;;  %v532_v1 = vpop.f32.mrf.mxu1 }
 0x269   :  { %v6582_v2 = vmul.f32 0.35355338, %v532_v1  ;;  %v494_v37 = vadd.f32 %v6409_v62, %v493_v58 }
 0x26a   :  { %v833_v4 = vsel %vm796_vm2, %v6580_v16, -inf }
 0x26b   :  { %834 = vmax.xlane.f32.xlu0 %v833_v4  ;;  %v800_v5 = vsel %vm796_vm2, %v6582_v2, -inf }
 0x26c   :  { %801 = vmax.xlane.f32.xlu2 %v800_v5 }
 0x26f   :  { %v742_v9 = vpop.f32.mrf.mxu0 }
 0x270   :  { %v6588_v21 = vmul.f32 0.35355338, %v742_v9  ;;  %v496_v29 = vpop.f32.mrf.mxu3 }
 0x271   :  { %v497_v46 = vadd.f32 %v6409_v62, %v496_v29 }
 0x272   :  { %v836_v1 = vsel %vm796_vm2, %v6588_v21, -inf }
 0x273   :  { %1196 = vmatpush.msra.mxu1 %v497_v46  ;;  %837 = vmax.xlane.f32.xlu1 %v836_v1  ;;  %v6594_v43 = vpack.i.bf16 %v494_v37, %v497_v46 }
 0x275   :  { %8721 = vst [vmem:[#allocation29_spill] sm:$0xff] %v6594_v43  ;;  %1197 = vmatpush.msra.mxu1 %v494_v37 }
 0x276   :  { %v564_v4 = vpop.f32.mrf.mxu2 }
 0x277   :  { %v6596_v0 = vmul.f32 0.35355338, %v564_v4 }
 0x279   :  { %v803_v5 = vsel %vm796_vm2, %v6596_v0, -inf }
 0x27a   :  { %804 = vmax.xlane.f32.xlu0 %v803_v5 }
 0x27e   :  { %v567_v9 = vpop.f32.mrf.mxu2 }
 0x27f   :  { %v6600_v52 = vmul.f32 0.35355338, %v567_v9 }
 0x281   :  { %v806_v62 = vsel %vm796_vm2, %v6600_v52, -inf }
 0x282   :  { %807 = vmax.xlane.f32.xlu1 %v806_v62 }
 0x286   :  { %v599_v58 = vpop.f32.mrf.mxu3 }
 0x287   :  { %v6604_v29 = vmul.f32 0.35355338, %v599_v58 }
 0x289   :  { %v809_v37 = vsel %vm796_vm2, %v6604_v29, -inf }
 0x28a   :  { %810 = vmax.xlane.f32.xlu0 %v809_v37 }
 0x28e   :  { %v602_v46 = vpop.f32.mrf.mxu3 }
 0x28f   :  { %v6608_v1 = vmul.f32 0.35355338, %v602_v46 }
 0x290   :  { %v634_v4 = vpop.f32.mrf.mxu1 }
 0x291   :  { %v812_v5 = vsel %vm796_vm2, %v6608_v1, -inf  ;;  %v6612_v9 = vmul.f32 0.35355338, %v634_v4 }
 0x292   :  { %813 = vmax.xlane.f32.xlu2 %v812_v5 }
 0x293   :  { %v815_v58 = vsel %vm796_vm2, %v6612_v9, -inf }
 0x297   :  { %v704_v27 = vpop.f32.mrf.mxu3 }
 0x298   :  { %v6614_v33 = vmul.f32 0.35355338, %v704_v27  ;;  %v637_v62 = vpop.f32.mrf.mxu1 }
 0x299   :  { %v6620_v46 = vmul.f32 0.35355338, %v637_v62 }
 0x29a   :  { %v827_v37 = vsel %vm796_vm2, %v6614_v33, -inf  ;;  %816 = vmax.xlane.f32.xlu2 %v815_v58 }
 0x29b   :  { %828 = vmax.xlane.f32.xlu0 %v827_v37  ;;  %v818_v27 = vsel %vm796_vm2, %v6620_v46, -inf }
 0x29f   :  { %v707_v11 = vpop.f32.mrf.mxu3 }
 0x2a0   :  { %v6622_v59 = vmul.f32 0.35355338, %v707_v11 }
 0x2a1   :  { %v774_v5 = vpop.f32.mrf.mxu1 }
 0x2a2   :  { %v830_v4 = vsel %vm796_vm2, %v6622_v59, -inf  ;;  %v6628_v54 = vmul.f32 0.35355338, %v774_v5 }
 0x2a3   :  { %831 = vmax.xlane.f32.xlu1 %v830_v4  ;;  %819 = vmax.xlane.f32.xlu0 %v818_v27 }
 0x2a4   :  { %v839_v37 = vsel %vm796_vm2, %v6628_v54, -inf }
 0x2a6   :  { %v669_v49 = vpop.f32.mrf.mxu2 }
 0x2a7   :  { %v6630_v47 = vmul.f32 0.35355338, %v669_v49 }
 0x2a9   :  { %v777_v58 = vpop.f32.mrf.mxu1  ;;  %v821_v62 = vsel %vm796_vm2, %v6630_v47, -inf }
 0x2aa   :  { %v6634_v11 = vmul.f32 0.35355338, %v777_v58  ;;  %822 = vmax.xlane.f32.xlu2 %v821_v62  ;;  %v6646_v58 = vpop.permute.xlu0 %1246  ;;  %v6648_v62 = vpop.permute.xlu1 %1205 }
 0x2ab   :  { %840 = vmax.xlane.f32.xlu1 %v839_v37  ;;  %8723 = vst [vmem:[#allocation31_spill] sm:$0xff] %v6648_v62 }
 0x2ac   :  { %v842_v4 = vsel %vm796_vm2, %v6634_v11, -inf }
 0x2ad   :  { %843 = vmax.xlane.f32.xlu0 %v842_v4  ;;  %v6656_v4 = vpop.permute.xlu2 %1209 }
 0x2ae   :  { %v672_v5 = vpop.f32.mrf.mxu2 }
 0x2af   :  { %v6640_v27 = vmul.f32 0.35355338, %v672_v5 }
 0x2b1   :  { %v824_v49 = vsel %vm796_vm2, %v6640_v27, -inf }
 0x2b2   :  { %825 = vmax.xlane.f32.xlu2 %v824_v49  ;;  %v6652_v37 = vpop.permute.xlu0 %1361  ;;  %v6654_v43 = vpop.permute.xlu1 %1244 }
 0x2b3   :  { %8724 = vst [vmem:[#allocation32_spill] sm:$0xff] %v6652_v37 }
 0x2b5   :  { %v6662_v14 = vpop.permute.xlu2 %1248 }
 0x2ba   :  { %v6658_v5 = vpop.permute.xlu1 %1365  ;;  %v6660_v32 = vpop.permute.xlu0 %1363 }
 0x2bb   :  { %8725 = vst [vmem:[#allocation33_spill] sm:$0xff] %v6660_v32 }
 0x2bd   :  { %v6670_v39 = vpop.permute.xlu2 %1250 }
 0x2c2   :  { %v6664_v49 = vpop.permute.xlu0 %1404  ;;  %v6666_v34 = vpop.permute.xlu1 %1367 }
 0x2ca   :  { %v6668_v36 = vpop.permute.xlu0 %1211 }
 0x2d7   :  { %v799_v19 = vpop.xlane.xlu1 %798 }
 0x2d8   :  { %v845_v37 = vsub.f32 %v6568_v28, %v799_v19 }
 0x2da   :  { %v861_v62 = vmul.f32 1.442695, %v845_v37 }
 0x2dc   :  { %5551 = vpow2.f32 %v861_v62 }
 0x2de   :  { %v835_v22 = vpop.xlane.xlu0 %834 }
 0x2df   :  { %v857_v38 = vsub.f32 %v6580_v16, %v835_v22  ;;  %v802_v7 = vpop.xlane.xlu2 %801 }
 0x2e0   :  { %v846_v24 = vsub.f32 %v6582_v2, %v802_v7 }
 0x2e1   :  { %v885_v32 = vmul.f32 1.442695, %v857_v38 }
 0x2e2   :  { %v6675_v45 = vpop.eup %5551  ;;  %v863_v30 = vmul.f32 1.442695, %v846_v24 }
 0x2e3   :  { %5553 = vpow2.f32 %v885_v32  ;;  %v893_v42 = vsel %vm796_vm2, %v6675_v45, 0.0 }
 0x2e4   :  { %894 = vadd.xlane.f32.xlu2 %v893_v42  ;;  %5555 = vpow2.f32 %v863_v30 }
 0x2e6   :  { %v6683_v22 = vpop.xlane.xlu1 %837 }
 0x2e9   :  { %v6679_v6 = vpop.eup %5553 }
 0x2ea   :  { %v929_v19 = vsel %vm796_vm2, %v6679_v6, 0.0  ;;  %v6686_v28 = vpop.eup %5555 }
 0x2eb   :  { %930 = vadd.xlane.f32.xlu1 %v929_v19  ;;  %v896_v42 = vsel %vm796_vm2, %v6686_v28, 0.0 }
 0x2ed   :  { %v805_v38 = vpop.xlane.xlu0 %804 }
 0x2ee   :  { %v847_v7 = vsub.f32 %v6596_v0, %v805_v38 }
 0x2f0   :  { %v865_v32 = vmul.f32 1.442695, %v847_v7 }
 0x2f2   :  { %5557 = vpow2.f32 %v865_v32 }
 0x2f3   :  { %897 = vadd.xlane.f32.xlu1 %v896_v42 }
 0x2f5   :  { %v808_v24 = vpop.xlane.xlu1 %807 }
 0x2f6   :  { %v848_v30 = vsub.f32 %v6600_v52, %v808_v24 }
 0x2f8   :  { %v6691_v16 = vpop.eup %5557  ;;  %v867_v2 = vmul.f32 1.442695, %v848_v30 }
 0x2f9   :  { %v899_v62 = vsel %vm796_vm2, %v6691_v16, 0.0 }
 0x2fa   :  { %5559 = vpow2.f32 %v867_v2  ;;  %900 = vadd.xlane.f32.xlu0 %v899_v62 }
 0x2fd   :  { %v811_v0 = vpop.xlane.xlu0 %810 }
 0x2fe   :  { %v849_v37 = vsub.f32 %v6604_v29, %v811_v0 }
 0x300   :  { %v6696_v19 = vpop.eup %5559  ;;  %v869_v38 = vmul.f32 1.442695, %v849_v37 }
 0x301   :  { %v902_v7 = vsel %vm796_vm2, %v6696_v19, 0.0 }
 0x302   :  { %5561 = vpow2.f32 %v869_v38  ;;  %903 = vadd.xlane.f32.xlu1 %v902_v7 }
 0x305   :  { %v814_v52 = vpop.xlane.xlu2 %813 }
 0x306   :  { %v850_v32 = vsub.f32 %v6608_v1, %v814_v52 }
 0x308   :  { %v6701_v42 = vpop.eup %5561  ;;  %v871_v24 = vmul.f32 1.442695, %v850_v32 }
 0x309   :  { %v905_v30 = vsel %vm796_vm2, %v6701_v42, 0.0 }
 0x30a   :  { %5563 = vpow2.f32 %v871_v24  ;;  %906 = vadd.xlane.f32.xlu2 %v905_v30 }
 0x30d   :  { %v817_v29 = vpop.xlane.xlu2 %816 }
 0x30e   :  { %v851_v2 = vsub.f32 %v6612_v9, %v817_v29  ;;  %v829_v62 = vpop.xlane.xlu0 %828 }
 0x30f   :  { %v855_v0 = vsub.f32 %v6614_v33, %v829_v62 }
 0x310   :  { %v6707_v37 = vpop.eup %5563  ;;  %v873_v38 = vmul.f32 1.442695, %v851_v2 }
 0x311   :  { %v881_v7 = vmul.f32 1.442695, %v855_v0  ;;  %v908_v1 = vsel %vm796_vm2, %v6707_v37, 0.0 }
 0x312   :  { %5565 = vpow2.f32 %v873_v38  ;;  %909 = vadd.xlane.f32.xlu1 %v908_v1 }
 0x313   :  { %5567 = vpow2.f32 %v881_v7 }
 0x316   :  { %v832_v52 = vpop.xlane.xlu1 %831  ;;  %v820_v32 = vpop.xlane.xlu0 %819 }
 0x317   :  { %v856_v24 = vsub.f32 %v6622_v59, %v832_v52  ;;  %v852_v30 = vsub.f32 %v6620_v46, %v820_v32 }
 0x318   :  { %v6713_v9 = vpop.eup %5565 }
 0x319   :  { %v6715_v29 = vpop.eup %5567  ;;  %v883_v33 = vmul.f32 1.442695, %v856_v24  ;;  %v875_v62 = vmul.f32 1.442695, %v852_v30  ;;  %v911_v2 = vsel %vm796_vm2, %v6713_v9, 0.0 }
 0x31a   :  { %912 = vadd.xlane.f32.xlu0 %v911_v2  ;;  %v923_v0 = vsel %vm796_vm2, %v6715_v29, 0.0 }
 0x31b   :  { %5569 = vpow2.f32 %v883_v33  ;;  %924 = vadd.xlane.f32.xlu2 %v923_v0 }
 0x31c   :  { %5571 = vpow2.f32 %v875_v62 }
 0x31d   :  { %v823_v38 = vpop.xlane.xlu2 %822 }
 0x31e   :  { %v853_v59 = vsub.f32 %v6630_v47, %v823_v38  ;;  %v841_v46 = vpop.xlane.xlu1 %840 }
 0x31f   :  { %v859_v7 = vsub.f32 %v6628_v54, %v841_v46 }
 0x320   :  { %v877_v1 = vmul.f32 1.442695, %v853_v59  ;;  %v844_v0 = vpop.xlane.xlu0 %843 }
 0x321   :  { %v6723_v52 = vpop.eup %5569  ;;  %v889_v32 = vmul.f32 1.442695, %v859_v7  ;;  %v860_v38 = vsub.f32 %v6634_v11, %v844_v0 }
 0x322   :  { %v6725_v24 = vpop.eup %5571  ;;  %5573 = vpow2.f32 %v877_v1  ;;  %v926_v30 = vsel %vm796_vm2, %v6723_v52, 0.0 }
 0x323   :  { %5575 = vpow2.f32 %v889_v32  ;;  %927 = vadd.xlane.f32.xlu1 %v926_v30  ;;  %v914_v33 = vsel %vm796_vm2, %v6725_v24, 0.0  ;;  %v891_v46 = vmul.f32 1.442695, %v860_v38  ;;  %v858_v30 = vsub.f32 %v6588_v21, %v6683_v22 }
 0x324   :  { %915 = vadd.xlane.f32.xlu2 %v914_v33 }
 0x325   :  { %v826_v59 = vpop.xlane.xlu2 %825  ;;  %5577 = vpow2.f32 %v891_v46  ;;  %v887_v0 = vmul.f32 1.442695, %v858_v30 }
 0x326   :  { %v854_v1 = vsub.f32 %v6640_v27, %v826_v59 }
 0x328   :  { %v6731_v47 = vpop.eup %5573 }
 0x329   :  { %v6733_v62 = vpop.eup %5575  ;;  %v917_v54 = vsel %vm796_vm2, %v6731_v47, 0.0 }
 0x32a   :  { %v935_v2 = vsel %vm796_vm2, %v6733_v62, 0.0 }
 0x32b   :  { %918 = vadd.xlane.f32.xlu1 %v917_v54  ;;  %v6749_v32 = vpop.eup %5577 }
 0x32c   :  { %936 = vadd.xlane.f32.xlu2 %v935_v2  ;;  %v879_v2 = vmul.f32 1.442695, %v854_v1  ;;  %v938_v11 = vsel %vm796_vm2, %v6749_v32, 0.0 }
 0x32e   :  { %1402 = vrot.lane.b32.xlu0 %v6491_v35, %s5925_s1 }
 0x336   :  { %1289 = vrot.lane.b32.xlu0 %v6402_v61, %s5925_s1 }
 0x344   :  { %1287 = vrot.lane.b32.xlu2 %v6414_v63, %s5925_s1  ;;  %1400 = vrot.lane.b32.xlu1 %v6465_v23, %s5925_s1 }
 0x357   :  { %v895_v7 = vpop.xlane.xlu2 %894 }
 0x358   :  { %5579 = vrcp.f32 %v895_v7 }
 0x359   :  { %5581 = vpow2.f32 %v879_v2 }
 0x35a   :  { %5583 = vpow2.f32 %v887_v0 }
 0x35e   :  { %v5580_v33 = vpop.eup %5579  ;;  %v931_v54 = vpop.xlane.xlu1 %930 }
 0x35f   :  { %v957_v61 = vmul.f32 %v5580_v33, %v6675_v45  ;;  %v6761_v27 = vpop.eup %5581 }
 0x360   :  { %939 = vadd.xlane.f32.xlu0 %v938_v11  ;;  %v6763_v45 = vpop.eup %5583  ;;  %v920_v22 = vsel %vm796_vm2, %v6761_v27, 0.0 }
 0x361   :  { %5217 = vmatmul.msk.f32.vlgmr.msrb.gmra.mxu2 %vm796_vm2, %v957_v61  ;;  %v932_v61 = vsel %vm796_vm2, %v6763_v45, 0.0 }
 0x362   :  { %5233 = vmatpush.xpose.msk.msrb.mxu2 %vm499_vm1, %v6668_v36 }
 0x366   :  { %5234 = vmatpush.xpose.msk.msrb.mxu2 %vm499_vm1, %v6656_v4  ;;  %v898_v21 = vpop.xlane.xlu1 %897 }
 0x367   :  { %5585 = vrcp.f32 %v898_v21 }
 0x36d   :  { %v5586_v38 = vpop.eup %5585  ;;  %921 = vadd.xlane.f32.xlu2 %v920_v22  ;;  %v901_v36 = vpop.xlane.xlu0 %900 }
 0x36e   :  { %933 = vadd.xlane.f32.xlu1 %v932_v61  ;;  %5587 = vrcp.f32 %v901_v36  ;;  %v958_v59 = vmul.f32 %v5586_v38, %v6686_v28 }
 0x370   :  { %5218 = vmatmul.msk.f32.gmra.mxu2 %vm796_vm2, %v958_v59 }
 0x374   :  { %v5588_v4 = vpop.eup %5587  ;;  %1439 = vrot.lane.b32.xlu0 %v6375_v53, %s5925_s1 }
 0x375   :  { %v959_v46 = vmul.f32 %v5588_v4, %v6691_v16  ;;  %v904_v7 = vpop.xlane.xlu1 %903 }
 0x376   :  { %5589 = vrcp.f32 %v904_v7 }
 0x377   :  { %5219 = vmatmul.msk.f32.vlgmr.msra.gmra.mxu3 %vm796_vm2, %v959_v46 }
 0x378   :  { %5237 = vmatpush.xpose.msk.msra.mxu3 %vm499_vm1, %v6670_v39 }
 0x37c   :  { %v5590_v1 = vpop.eup %5589  ;;  %5238 = vmatpush.xpose.msk.msra.mxu3 %vm499_vm1, %v6662_v14  ;;  %1478 = vrot.lane.b32.xlu0 %v6510_v40, %s5925_s1 }
 0x37d   :  { %v907_v28 = vpop.xlane.xlu2 %906  ;;  %v960_v30 = vmul.f32 %v5590_v1, %v6696_v19  ;;  %v8730_v1 = vld [vmem:[#allocation3_spill] sm:$0xff] }
 0x37e   :  { %5591 = vrcp.f32 %v907_v28  ;;  %v8731_v28 = vld [vmem:[#allocation24_spill] sm:$0xff] }
 0x37f   :  { %5220 = vmatmul.msk.f32.gmra.mxu3 %vm796_vm2, %v960_v30  ;;  %v8732_v30 = vld [vmem:[#allocation19_spill] sm:$0xff] }
 0x384   :  { %v5592_v16 = vpop.eup %5591  ;;  %5432 = vrot.lane.b32.xlu0 %v6541_v56, %s5925_s1 }
 0x385   :  { %v961_v33 = vmul.f32 %v5592_v16, %v6701_v42  ;;  %1285 = vrot.lane.b32.xlu2 %v6434_v8, %s5925_s1  ;;  %v910_v39 = vpop.xlane.xlu1 %909 }
 0x386   :  { %5593 = vrcp.f32 %v910_v39 }
 0x387   :  { %1283 = vrot.lane.b32.xlu1 %v6422_v3, %s5925_s1  ;;  %5221 = vmatmul.msk.f32.vlgmr.msrb.gmra.mxu0 %vm796_vm2, %v961_v33  ;;  %5595 = vrcp.f32 %v931_v54  ;;  %v8733_v33 = vld [vmem:[#allocation2_spill] sm:$0xff] }
 0x38c   :  { %v5594_v14 = vpop.eup %5593  ;;  %2005 = vrot.lane.b32.xlu0 %v6243_v18, %s5926_s21 }
 0x38d   :  { %1328 = vrot.lane.b32.xlu2 %v6437_v10, %s5925_s1  ;;  %v913_v19 = vpop.xlane.xlu0 %912  ;;  %v962_v42 = vmul.f32 %v5594_v14, %v6707_v37  ;;  %v5596_v11 = vpop.eup %5595 }
 0x38e   :  { %v925_v2 = vpop.xlane.xlu2 %924  ;;  %5597 = vrcp.f32 %v913_v19  ;;  %v969_v37 = vmul.f32 %v5596_v11, %v6679_v6 }
 0x38f   :  { %5599 = vrcp.f32 %v925_v2  ;;  %1445 = vrot.lane.b32.xlu1 %v6354_v48, %s5925_s1  ;;  %5222 = vmatmul.msk.f32.gmra.mxu0 %vm796_vm2, %v962_v42 }
 0x394   :  { %v5598_v0 = vpop.eup %5597  ;;  %2007 = vrot.lane.b32.xlu0 %v6252_v20, %s5926_s21 }
 0x395   :  { %v5600_v54 = vpop.eup %5599  ;;  %v963_v21 = vmul.f32 %v5598_v0, %v6713_v9  ;;  %1326 = vrot.lane.b32.xlu2 %v6444_v12, %s5925_s1 }
 0x396   :  { %v967_v22 = vmul.f32 %v5600_v54, %v6715_v29  ;;  %v928_v38 = vpop.xlane.xlu1 %927 }
 0x397   :  { %5601 = vrcp.f32 %v928_v38  ;;  %v916_v61 = vpop.xlane.xlu2 %915  ;;  %1443 = vrot.lane.b32.xlu1 %v6366_v51, %s5925_s1  ;;  %5223 = vmatmul.msk.f32.vlgmr.msrb.gmra.mxu1 %vm796_vm2, %v963_v21  ;;  %v8734_v38 = vld [vmem:[#allocation31_spill] sm:$0xff] }
 0x398   :  { %5603 = vrcp.f32 %v916_v61  ;;  %5227 = vmatmul.msk.f32.vlgmr.msrb.gmra.mxu3 %vm796_vm2, %v967_v22  ;;  %5229 = vmatmul.msk.f32.vlgmr.msra.gmra.mxu0 %vm796_vm2, %v969_v37 }
 0x399   :  { %5253 = vmatpush.xpose.msk.msrb.mxu3 %vm499_vm1, %v6650_v17 }
 0x39c   :  { %2050 = vrot.lane.b32.xlu0 %v6378_v55, %s5926_s21 }
 0x39d   :  { %v5602_v6 = vpop.eup %5601  ;;  %1322 = vrot.lane.b32.xlu2 %v6453_v15, %s5925_s1  ;;  %5254 = vmatpush.xpose.msk.msrb.mxu3 %vm499_vm1, %v6664_v49 }
 0x39e   :  { %v5604_v9 = vpop.eup %5603  ;;  %v919_v29 = vpop.xlane.xlu1 %918  ;;  %v968_v36 = vmul.f32 %v5602_v6, %v6723_v52 }
 0x39f   :  { %5605 = vrcp.f32 %v919_v29  ;;  %v937_v59 = vpop.xlane.xlu2 %936  ;;  %1324 = vrot.lane.b32.xlu1 %v6487_v31, %s5925_s1  ;;  %v964_v17 = vmul.f32 %v5604_v9, %v6725_v24  ;;  %v8735_v29 = vld [vmem:[#allocation30_spill] sm:$0xff] }
 0x3a0   :  { %5607 = vrcp.f32 %v937_v59  ;;  %5228 = vmatmul.msk.f32.gmra.mxu3 %vm796_vm2, %v968_v36  ;;  %v1403_v4 = vpop.permute.xlu0 %1402  ;;  %v8737_v59 = vld [vmem:[#allocation32_spill] sm:$0xff] }
 0x3a1   :  { %5224 = vmatmul.msk.f32.gmra.mxu1 %vm796_vm2, %v964_v17 }
 0x3a4   :  { %2048 = vrot.lane.b32.xlu0 %v6357_v50, %s5926_s21 }
 0x3a5   :  { %v5606_v49 = vpop.eup %5605  ;;  %1441 = vrot.lane.b32.xlu2 %v6393_v57, %s5925_s1 }
 0x3a6   :  { %v5608_v52 = vpop.eup %5607  ;;  %v965_v46 = vmul.f32 %v5606_v49, %v6731_v47 }
 0x3a7   :  { %v971_v7 = vmul.f32 %v5608_v52, %v6733_v62  ;;  %1484 = vrot.lane.b32.xlu1 %v6447_v13, %s5925_s1  ;;  %v1288_v47 = vpop.permute.xlu2 %1287  ;;  %v8728_v62 = vld [vmem:[#allocation8_spill] sm:$0xff]  ;;  %v8739_v52 = vld [vmem:[#allocation33_spill] sm:$0xff] }
 0x3a8   :  { %5225 = vmatmul.msk.f32.vlgmr.msra.gmra.mxu2 %vm796_vm2, %v965_v46  ;;  %5239 = vmatmul.msk.f32.vlgmr.msra.gmra.mxu3 %vm499_vm1, %v6654_v43  ;;  %v1290_v24 = vpop.permute.xlu0 %1289  ;;  %v8726_v43 = vld [vmem:[#allocation13_spill] sm:$0xff] }
 0x3a9   :  { %5231 = vmatmul.msk.f32.vlgmr.msra.gmra.mxu1 %vm796_vm2, %v971_v7  ;;  %5249 = vmatpush.xpose.msk.msra.mxu2 %vm499_vm1, %v6666_v34 }
 0x3aa   :  { %5241 = vmatpush.xpose.msk.msrb.mxu0 %vm499_vm1, %v1290_v24 }
 0x3ac   :  { %2165 = vrot.lane.b32.xlu0 %v6468_v25, %s5926_s21 }
 0x3ad   :  { %5250 = vmatpush.xpose.msk.msra.mxu2 %vm499_vm1, %v6658_v5  ;;  %1482 = vrot.lane.b32.xlu2 %v6471_v26, %s5925_s1  ;;  %v8727_v5 = vld [vmem:[#allocation4_spill] sm:$0xff] }
 0x3ae   :  { %5242 = vmatpush.xpose.msk.msrb.mxu0 %vm499_vm1, %v1288_v47 }
 0x3af   :  { %1480 = vrot.lane.b32.xlu1 %v6520_v44, %s5925_s1 }
 0x3b0   :  { %5240 = vmatmul.msk.f32.gmra.mxu3 %vm499_vm1, %v6646_v58  ;;  %v8729_v58 = vld [vmem:[#allocation9_spill] sm:$0xff] }
 0x3b4   :  { %5442 = vrot.lane.b32.xlu0 %v6514_v41, %s5925_s1 }
 0x3b5   :  { %5427 = vrot.lane.b32.xlu2 %v6549_v60, %s5925_s1 }
 0x3b6   :  { %v1401_v34 = vpop.permute.xlu1 %1400 }
 0x3b7   :  { %5422 = vrot.lane.b32.xlu1 %v8726_v43, %s5925_s1 }
 0x3b8   :  { %5255 = vmatmul.msk.f32.vlgmr.msrb.gmra.mxu3 %vm499_vm1, %v1401_v34 }
 0x3bc   :  { %2161 = vrot.lane.b32.xlu0 %v8727_v5, %s5926_s21 }
 0x3bd   :  { %2009 = vrot.lane.b32.xlu2 %v8728_v62, %s5926_s21 }
 0x3bf   :  { %2011 = vrot.lane.b32.xlu1 %v8729_v58, %s5926_s21 }
 0x3c0   :  { %5256 = vmatmul.msk.f32.gmra.mxu3 %vm499_vm1, %v1403_v4 }
 0x3c4   :  { %2046 = vrot.lane.b32.xlu0 %v8730_v1, %s5926_s21 }
 0x3c7   :  { %5437 = vrot.lane.b32.xlu1 %v8731_v28, %s5925_s1 }
 0x3cf   :  { %2167 = vrot.lane.b32.xlu1 %v8732_v30, %s5926_s21 }
 0x3d3   :  { %v940_v16 = vpop.xlane.xlu0 %939 }
 0x3d4   :  { %5609 = vrcp.f32 %v940_v16 }
 0x3d7   :  { %2044 = vrot.lane.b32.xlu1 %v8733_v33, %s5926_s21 }
 0x3da   :  { %v5610_v39 = vpop.eup %5609 }
 0x3db   :  { %v972_v14 = vmul.f32 %v5610_v39, %v6749_v32 }
 0x3dd   :  { %5232 = vmatmul.msk.f32.gmra.mxu1 %vm796_vm2, %v972_v14 }
 0x3e0   :  { %v922_v19 = vpop.xlane.xlu2 %921 }
 0x3e1   :  { %5611 = vrcp.f32 %v922_v19  ;;  %v934_v42 = vpop.xlane.xlu1 %933 }
 0x3e2   :  { %5613 = vrcp.f32 %v934_v42 }
 0x3e6   :  { %v1440_v2 = vpop.permute.xlu0 %1439 }
 0x3e7   :  { %v5612_v11 = vpop.eup %5611 }
 0x3e8   :  { %v5614_v0 = vpop.eup %5613  ;;  %v1286_v54 = vpop.permute.xlu2 %1285  ;;  %v966_v21 = vmul.f32 %v5612_v11, %v6761_v27 }
 0x3e9   :  { %v970_v37 = vmul.f32 %v5614_v0, %v6763_v45 }
 0x3ea   :  { %5226 = vmatmul.msk.f32.gmra.mxu2 %vm796_vm2, %v966_v21 }
 0x3eb   :  { %5230 = vmatmul.msk.f32.gmra.mxu0 %vm796_vm2, %v970_v37 }
 0x3ee   :  { %v1479_v22 = vpop.permute.xlu0 %1478 }
 0x3f0   :  { %v1329_v32 = vpop.permute.xlu2 %1328 }
 0x3f1   :  { %5245 = vmatpush.xpose.msk.msrb.mxu1 %vm499_vm1, %v1329_v32 }
 0x3f2   :  { %5235 = vmatmul.msk.f32.vlgmr.msrb.gmra.mxu2 %vm499_vm1, %v8734_v38 }
 0x3f6   :  { %v5433_v61 = vpop.permute.xlu0 %5432 }
 0x3f7   :  { %v5434_v14 = vunpack.i.l.bf16 %v5433_v61  ;;  %v5435_v38 = vunpack.i.h.bf16 %v5433_v61 }
 0x3f8   :  { %v1327_v6 = vpop.permute.xlu2 %1326 }
 0x3f9   :  { %5246 = vmatpush.xpose.msk.msrb.mxu1 %vm499_vm1, %v1327_v6  ;;  %v1284_v9 = vpop.permute.xlu1 %1283 }
 0x3fa   :  { %5236 = vmatmul.msk.f32.gmra.mxu2 %vm499_vm1, %v8735_v29  ;;  %5243 = vmatmul.msk.f32.vlgmr.msrb.gmra.mxu0 %vm499_vm1, %v1284_v9 }
 0x3fe   :  { %v6886_v27 = vpop.permute.xlu0 %2005 }
 0x3ff   :  { %8736 = vst [vmem:[#allocation13_spill] sm:$0xff] %v6886_v27 }
 0x400   :  { %v1323_v45 = vpop.permute.xlu2 %1322 }
 0x401   :  { %5247 = vmatmul.msk.f32.vlgmr.msrb.gmra.mxu1 %vm499_vm1, %v1323_v45  ;;  %v1446_v36 = vpop.permute.xlu1 %1445 }
 0x402   :  { %5251 = vmatmul.msk.f32.vlgmr.msra.gmra.mxu2 %vm499_vm1, %v8737_v59  ;;  %5244 = vmatmul.msk.f32.gmra.mxu0 %vm499_vm1, %v1286_v54  ;;  %v6917_v59 = vpop.f32.mrf.mxu2 }
 0x403   :  { %5257 = vmatpush.xpose.msk.msra.mxu0 %vm499_vm1, %v1446_v36  ;;  %v6915_v36 = vpop.f32.mrf.mxu3  ;;  %8742 = vst [vmem:[#allocation24_spill] sm:$0xff] %v6917_v59 }
 0x404   :  { %v6913_v45 = vpop.f32.mrf.mxu0  ;;  %8741 = vst [vmem:[#allocation3_spill] sm:$0xff] %v6915_v36 }
 0x405   :  { %8740 = vst [vmem:[#allocation9_spill] sm:$0xff] %v6913_v45 }
 0x406   :  { %v6893_v17 = vpop.permute.xlu0 %2007 }
 0x407   :  { %8738 = vst [vmem:[#allocation8_spill] sm:$0xff] %v6893_v17 }
 0x408   :  { %v1442_v4 = vpop.permute.xlu2 %1441 }
 0x409   :  { %v1444_v49 = vpop.permute.xlu1 %1443 }
 0x40a   :  { %5252 = vmatmul.msk.f32.gmra.mxu2 %vm499_vm1, %v8739_v52  ;;  %5258 = vmatpush.xpose.msk.msra.mxu0 %vm499_vm1, %v1444_v49  ;;  %v6921_v49 = vpop.f32.mrf.mxu2 }
 0x40b   :  { %8744 = vst [vmem:[#allocation30_spill] sm:$0xff] %v6921_v49  ;;  %v6923_v61 = vpop.f32.mrf.mxu3 }
 0x40c   :  { %8745 = vst [vmem:[#allocation32_spill] sm:$0xff] %v6923_v61 }
 0x40d   :  { %5259 = vmatmul.msk.f32.vlgmr.msra.gmra.mxu0 %vm499_vm1, %v1440_v2 }
 0x40e   :  { %v6899_v46 = vpop.permute.xlu0 %2050 }
 0x410   :  { %v1483_v7 = vpop.permute.xlu2 %1482 }
 0x411   :  { %v1325_v24 = vpop.permute.xlu1 %1324 }
 0x412   :  { %5248 = vmatmul.msk.f32.gmra.mxu1 %vm499_vm1, %v1325_v24 }
 0x414   :  { %v6925_v52 = vpop.f32.mrf.mxu1 }
 0x415   :  { %5260 = vmatmul.msk.f32.gmra.mxu0 %vm499_vm1, %v1442_v4  ;;  %v6919_v4 = vpop.f32.mrf.mxu0  ;;  %8746 = vst [vmem:[#allocation33_spill] sm:$0xff] %v6925_v52 }
 0x416   :  { %v6903_v47 = vpop.permute.xlu0 %2048  ;;  %8743 = vst [vmem:[#allocation31_spill] sm:$0xff] %v6919_v4 }
 0x418   :  { %v5428_v34 = vpop.permute.xlu2 %5427 }
 0x419   :  { %v5429_v16 = vunpack.i.l.bf16 %v5428_v34  ;;  %v1485_v39 = vpop.permute.xlu1 %1484  ;;  %v5430_v32 = vunpack.i.h.bf16 %v5428_v34 }
 0x41a   :  { %5261 = vmatpush.xpose.msk.msra.mxu1 %vm499_vm1, %v1485_v39 }
 0x41b   :  { %1774 = vmatpush.msra.mxu3 %v5429_v16  ;;  %v6931_v34 = vpop.f32.mrf.mxu3 }
 0x41c   :  { %8749 = vst [vmem:[#allocation36_spill] sm:$0xff] %v6931_v34 }
 0x41d   :  { %1775 = vmatpush.msra.mxu3 %v5434_v14  ;;  %v6929_v24 = vpop.f32.mrf.mxu0 }
 0x41e   :  { %5262 = vmatpush.xpose.msk.msra.mxu1 %vm499_vm1, %v1483_v7  ;;  %v6907_v19 = vpop.permute.xlu0 %2165  ;;  %8748 = vst [vmem:[#allocation35_spill] sm:$0xff] %v6929_v24  ;;  %v6933_v16 = vpop.f32.mrf.mxu1 }
 0x41f   :  { %8750 = vst [vmem:[#allocation37_spill] sm:$0xff] %v6933_v16 }
 0x420   :  { %v7022_v17 = vpop.permute.xlu2 %2009 }
 0x421   :  { %v1481_v42 = vpop.permute.xlu1 %1480  ;;  %5263 = vmatmul.msk.f32.vlgmr.msra.gmra.mxu1 %vm499_vm1, %v1479_v22 }
 0x426   :  { %v5443_v2 = vpop.permute.xlu0 %5442 }
 0x427   :  { %v5444_v11 = vunpack.i.l.bf16 %v5443_v2  ;;  %v5445_v0 = vunpack.i.h.bf16 %v5443_v2  ;;  %v6941_v2 = vpop.f32.mrf.mxu1 }
 0x428   :  { %8754 = vst [vmem:[#allocation41_spill] sm:$0xff] %v6941_v2 }
 0x429   :  { %v5423_v54 = vpop.permute.xlu1 %5422  ;;  %5264 = vmatmul.msk.f32.gmra.mxu1 %vm499_vm1, %v1481_v42  ;;  %1811 = vmatpush.msrb.mxu0 %v5444_v11  ;;  %v6939_v42 = vpop.f32.mrf.mxu3 }
 0x42a   :  { %v5424_v21 = vunpack.i.l.bf16 %v5423_v54  ;;  %v5425_v37 = vunpack.i.h.bf16 %v5423_v54  ;;  %8753 = vst [vmem:[#allocation40_spill] sm:$0xff] %v6939_v42 }
 0x42b   :  { %1812 = vmatpush.msrb.mxu0 %v5445_v0  ;;  %v6927_v7 = vpop.f32.mrf.mxu2 }
 0x42c   :  { %1737 = vmatpush.msrb.mxu2 %v5424_v21  ;;  %8747 = vst [vmem:[#allocation34_spill] sm:$0xff] %v6927_v7 }
 0x42e   :  { %1738 = vmatpush.msrb.mxu2 %v5425_v37 }
 0x430   :  { %1885 = vmatpush.msra.mxu2 %v5430_v32 }
 0x431   :  { %v6911_v6 = vpop.permute.xlu1 %2011  ;;  %v1277_v37 = vpop.f32.mrf.mxu3 }
 0x432   :  { %1886 = vmatpush.msra.mxu2 %v5435_v38  ;;  %v6949_v38 = vmul.f32 0.35355338, %v1277_v37 }
 0x434   :  { %v1539_v2 = vsel %vm796_vm2, %v6949_v38, -inf }
 0x439   :  { %v5438_v9 = vpop.permute.xlu1 %5437  ;;  %v1280_v37 = vpop.f32.mrf.mxu3 }
 0x43a   :  { %v5439_v22 = vunpack.i.l.bf16 %v5438_v9  ;;  %v5440_v29 = vunpack.i.h.bf16 %v5438_v9  ;;  %v6965_v45 = vmul.f32 0.35355338, %v1280_v37 }
 0x43c   :  { %1922 = vmatpush.msrb.mxu3 %v5439_v22 }
 0x43e   :  { %1923 = vmatpush.msrb.mxu3 %v5440_v29 }
 0x45a   :  { %v6947_v32 = vpop.f32.mrf.mxu1 }
 0x45b   :  { %8755 = vst [vmem:[#allocation42_spill] sm:$0xff] %v6947_v32 }
 0x468   :  { %v6937_v14 = vpop.f32.mrf.mxu0 }
 0x469   :  { %8752 = vst [vmem:[#allocation39_spill] sm:$0xff] %v6937_v14  ;;  %v1433_v14 = vpop.f32.mrf.mxu3 }
 0x46d   :  { %v6935_v39 = vpop.f32.mrf.mxu2 }
 0x46e   :  { %8751 = vst [vmem:[#allocation38_spill] sm:$0xff] %v6935_v39 }
 0x475   :  { %v1238_v0 = vpop.f32.mrf.mxu2 }
 0x476   :  { %v6967_v34 = vmul.f32 0.35355338, %v1238_v0 }
 0x477   :  { %v1316_v11 = vpop.f32.mrf.mxu0 }
 0x478   :  { %v6943_v54 = vmul.f32 0.35355338, %v1316_v11 }
 0x47a   :  { %v1545_v21 = vsel %vm796_vm2, %v6943_v54, -inf }
 0x47b   :  { %1546 = vmax.xlane.f32.xlu1 %v1545_v21 }
 0x47d   :  { %v1241_v29 = vpop.f32.mrf.mxu2 }
 0x47e   :  { %v1355_v39 = vpop.f32.mrf.mxu1  ;;  %v6989_v61 = vmul.f32 0.35355338, %v1241_v29 }
 0x47f   :  { %v1319_v9 = vpop.f32.mrf.mxu0  ;;  %v6957_v7 = vmul.f32 0.35355338, %v1355_v39  ;;  %v1542_v39 = vsel %vm796_vm2, %v6965_v45, -inf }
 0x480   :  { %v6951_v22 = vmul.f32 0.35355338, %v1319_v9 }
 0x481   :  { %v1551_v21 = vsel %vm796_vm2, %v6957_v7, -inf }
 0x482   :  { %v1548_v11 = vsel %vm796_vm2, %v6951_v22, -inf }
 0x483   :  { %1540 = vmax.xlane.f32.xlu1 %v1539_v2  ;;  %1549 = vmax.xlane.f32.xlu0 %v1548_v11 }
 0x485   :  { %v1394_v9 = vpop.f32.mrf.mxu2 }
 0x48a   :  { %v1472_v4 = vpop.f32.mrf.mxu0 }
 0x48b   :  { %v6961_v32 = vmul.f32 0.35355338, %v1472_v4  ;;  %1552 = vmax.xlane.f32.xlu0 %v1551_v21  ;;  %v1533_v4 = vsel %vm796_vm2, %v6967_v34, -inf }
 0x48d   :  { %v1569_v24 = vsel %vm796_vm2, %v6961_v32, -inf  ;;  %v1397_v37 = vpop.f32.mrf.mxu2 }
 0x48e   :  { %1570 = vmax.xlane.f32.xlu2 %v1569_v24  ;;  %v6979_v24 = vmul.f32 0.35355338, %v1433_v14  ;;  %v6981_v0 = vmul.f32 0.35355338, %v1397_v37  ;;  %v1536_v14 = vsel %vm796_vm2, %v6989_v61, -inf }
 0x48f   :  { %v1358_v11 = vpop.f32.mrf.mxu1 }
 0x490   :  { %v6977_v52 = vmul.f32 0.35355338, %v1358_v11  ;;  %v1560_v42 = vsel %vm796_vm2, %v6981_v0, -inf }
 0x492   :  { %v1475_v2 = vpop.f32.mrf.mxu0 }
 0x493   :  { %v6971_v16 = vmul.f32 0.35355338, %v1475_v2  ;;  %1543 = vmax.xlane.f32.xlu0 %v1542_v39  ;;  %v1554_v2 = vsel %vm796_vm2, %v6977_v52, -inf  ;;  %v1563_v39 = vsel %vm796_vm2, %v6979_v24, -inf }
 0x495   :  { %v1572_v21 = vsel %vm796_vm2, %v6971_v16, -inf }
 0x496   :  { %1534 = vmax.xlane.f32.xlu2 %v1533_v4  ;;  %1573 = vmax.xlane.f32.xlu1 %v1572_v21  ;;  %v1436_v21 = vpop.f32.mrf.mxu3 }
 0x49b   :  { %1555 = vmax.xlane.f32.xlu0 %v1554_v2  ;;  %v6997_v2 = vmul.f32 0.35355338, %v1436_v21  ;;  %v7011_v21 = vpop.permute.xlu0 %2161 }
 0x49c   :  { %8756 = vst [vmem:[#allocation43_spill] sm:$0xff] %v7011_v21 }
 0x49e   :  { %1564 = vmax.xlane.f32.xlu2 %v1563_v39  ;;  %1561 = vmax.xlane.f32.xlu1 %v1560_v42  ;;  %v1511_v11 = vpop.f32.mrf.mxu1  ;;  %v1566_v42 = vsel %vm796_vm2, %v6997_v2, -inf  ;;  %v7005_v39 = vmul.f32 0.35355338, %v1394_v9 }
 0x49f   :  { %v6991_v4 = vmul.f32 0.35355338, %v1511_v11 }
 0x4a0   :  { %v1557_v11 = vsel %vm796_vm2, %v7005_v39, -inf }
 0x4a1   :  { %v1575_v37 = vsel %vm796_vm2, %v6991_v4, -inf }
 0x4a3   :  { %1537 = vmax.xlane.f32.xlu0 %v1536_v14  ;;  %v7009_v14 = vpop.permute.xlu1 %2167 }
 0x4a6   :  { %1576 = vmax.xlane.f32.xlu2 %v1575_v37  ;;  %v1514_v36 = vpop.f32.mrf.mxu1  ;;  %v7015_v37 = vpop.permute.xlu0 %2046 }
 0x4a7   :  { %v6999_v49 = vmul.f32 0.35355338, %v1514_v36 }
 0x4a9   :  { %v1578_v29 = vsel %vm796_vm2, %v6999_v49, -inf }
 0x4ab   :  { %1567 = vmax.xlane.f32.xlu0 %v1566_v42  ;;  %v7013_v36 = vpop.permute.xlu1 %2044 }
 0x4ae   :  { %1579 = vmax.xlane.f32.xlu2 %v1578_v29 }
 0x4b6   :  { %1558 = vmax.xlane.f32.xlu2 %v1557_v11 }
 0x4ee   :  { %v1547_v59 = vpop.xlane.xlu1 %1546 }
 0x4ef   :  { %v1585_v42 = vsub.f32 %v6943_v54, %v1547_v59 }
 0x4f1   :  { %v1605_v5 = vmul.f32 1.442695, %v1585_v42 }
 0x4f3   :  { %5615 = vpow2.f32 %v1605_v5 }
 0x4f6   :  { %v1541_v29 = vpop.xlane.xlu1 %1540  ;;  %v1550_v9 = vpop.xlane.xlu0 %1549 }
 0x4f7   :  { %v1583_v25 = vsub.f32 %v6949_v38, %v1541_v29  ;;  %v1586_v30 = vsub.f32 %v6951_v22, %v1550_v9 }
 0x4f9   :  { %v7020_v11 = vpop.eup %5615  ;;  %v1601_v21 = vmul.f32 1.442695, %v1583_v25  ;;  %v1607_v27 = vmul.f32 1.442695, %v1586_v30 }
 0x4fa   :  { %v1641_v33 = vsel %vm796_vm2, %v7020_v11, 0.0 }
 0x4fb   :  { %5617 = vpow2.f32 %v1601_v21  ;;  %1642 = vadd.xlane.f32.xlu2 %v1641_v33 }
 0x4fc   :  { %5619 = vpow2.f32 %v1607_v27 }
 0x4fe   :  { %v1553_v59 = vpop.xlane.xlu0 %1552 }
 0x4ff   :  { %v1587_v5 = vsub.f32 %v6957_v7, %v1553_v59 }
 0x501   :  { %v7027_v54 = vpop.eup %5617  ;;  %v1609_v38 = vmul.f32 1.442695, %v1587_v5  ;;  %v1571_v42 = vpop.xlane.xlu2 %1570 }
 0x502   :  { %v7029_v22 = vpop.eup %5619  ;;  %v1593_v29 = vsub.f32 %v6961_v32, %v1571_v42  ;;  %v1635_v25 = vsel %vm796_vm2, %v7027_v54, 0.0 }
 0x503   :  { %5621 = vpow2.f32 %v1609_v38  ;;  %1636 = vadd.xlane.f32.xlu0 %v1635_v25  ;;  %v1644_v30 = vsel %vm796_vm2, %v7029_v22, 0.0 }
 0x504   :  { %v1621_v33 = vmul.f32 1.442695, %v1593_v29  ;;  %1645 = vadd.xlane.f32.xlu2 %v1644_v30 }
 0x506   :  { %5623 = vpow2.f32 %v1621_v33  ;;  %v1544_v27 = vpop.xlane.xlu0 %1543 }
 0x507   :  { %v1584_v7 = vsub.f32 %v6965_v45, %v1544_v27 }
 0x509   :  { %v7037_v21 = vpop.eup %5621  ;;  %v1603_v9 = vmul.f32 1.442695, %v1584_v7  ;;  %v1535_v59 = vpop.xlane.xlu2 %1534 }
 0x50a   :  { %v1581_v32 = vsub.f32 %v6967_v34, %v1535_v59  ;;  %v1647_v5 = vsel %vm796_vm2, %v7037_v21, 0.0 }
 0x50b   :  { %5625 = vpow2.f32 %v1603_v9 }
 0x50c   :  { %v7042_v38 = vpop.eup %5623  ;;  %v1597_v42 = vmul.f32 1.442695, %v1581_v32  ;;  %1648 = vadd.xlane.f32.xlu2 %v1647_v5 }
 0x50d   :  { %v1665_v29 = vsel %vm796_vm2, %v7042_v38, 0.0 }
 0x50e   :  { %5627 = vpow2.f32 %v1597_v42  ;;  %1666 = vadd.xlane.f32.xlu1 %v1665_v29  ;;  %v1556_v45 = vpop.xlane.xlu0 %1555 }
 0x511   :  { %v7046_v25 = vpop.eup %5625  ;;  %v1565_v30 = vpop.xlane.xlu2 %1564 }
 0x512   :  { %v1591_v33 = vsub.f32 %v6979_v24, %v1565_v30  ;;  %v1638_v34 = vsel %vm796_vm2, %v7046_v25, 0.0 }
 0x513   :  { %1639 = vadd.xlane.f32.xlu0 %v1638_v34 }
 0x514   :  { %v7051_v27 = vpop.eup %5627  ;;  %v1617_v7 = vmul.f32 1.442695, %v1591_v33 }
 0x515   :  { %v1629_v9 = vsel %vm796_vm2, %v7051_v27, 0.0 }
 0x516   :  { %5629 = vpow2.f32 %v1617_v7  ;;  %1630 = vadd.xlane.f32.xlu2 %v1629_v9  ;;  %v1538_v59 = vpop.xlane.xlu0 %1537 }
 0x517   :  { %v1582_v32 = vsub.f32 %v6989_v61, %v1538_v59 }
 0x519   :  { %v1599_v5 = vmul.f32 1.442695, %v1582_v32  ;;  %v1577_v42 = vpop.xlane.xlu2 %1576 }
 0x51b   :  { %5631 = vpow2.f32 %v1599_v5 }
 0x51c   :  { %v7056_v29 = vpop.eup %5629 }
 0x51d   :  { %v1659_v24 = vsel %vm796_vm2, %v7056_v29, 0.0 }
 0x51e   :  { %1660 = vadd.xlane.f32.xlu0 %v1659_v24  ;;  %v1568_v30 = vpop.xlane.xlu0 %1567 }
 0x51f   :  { %v1592_v33 = vsub.f32 %v6997_v2, %v1568_v30  ;;  %v8757_v2 = vld [vmem:[#allocation7_spill] sm:$0xff] }
 0x521   :  { %v7061_v34 = vpop.eup %5631  ;;  %v1619_v55 = vmul.f32 1.442695, %v1592_v33  ;;  %v1580_v7 = vpop.xlane.xlu2 %1579  ;;  %v8758_v33 = vld [vmem:[#allocation6_spill] sm:$0xff] }
 0x522   :  { %v1632_v9 = vsel %vm796_vm2, %v7061_v34, 0.0 }
 0x523   :  { %5633 = vpow2.f32 %v1619_v55  ;;  %1633 = vadd.xlane.f32.xlu2 %v1632_v9  ;;  %v8760_v9 = vld [vmem:[#allocation26_spill] sm:$0xff] }
 0x529   :  { %v7065_v61 = vpop.eup %5633  ;;  %v1559_v59 = vpop.xlane.xlu2 %1558 }
 0x52a   :  { %v1589_v32 = vsub.f32 %v7005_v39, %v1559_v59  ;;  %v1662_v5 = vsel %vm796_vm2, %v7065_v61, 0.0  ;;  %v8759_v39 = vld [vmem:[#allocation28_spill] sm:$0xff]  ;;  %v8761_v59 = vld [vmem:[#allocation5_spill] sm:$0xff] }
 0x52b   :  { %1663 = vadd.xlane.f32.xlu1 %v1662_v5 }
 0x52c   :  { %v1613_v24 = vmul.f32 1.442695, %v1589_v32  ;;  %v1574_v32 = vpop.xlane.xlu1 %1573 }
 0x52d   :  { %v1594_v5 = vsub.f32 %v6971_v16, %v1574_v32 }
 0x52e   :  { %5635 = vpow2.f32 %v1613_v24 }
 0x52f   :  { %v1623_v24 = vmul.f32 1.442695, %v1594_v5  ;;  %v1596_v5 = vsub.f32 %v6999_v49, %v1580_v7 }
 0x531   :  { %5637 = vpow2.f32 %v1623_v24 }
 0x532   :  { %2206 = vrot.lane.b32.xlu0 %v8757_v2, %s5926_s21 }
 0x534   :  { %v7072_v30 = vpop.eup %5635 }
 0x535   :  { %v1653_v55 = vsel %vm796_vm2, %v7072_v30, 0.0 }
 0x536   :  { %1654 = vadd.xlane.f32.xlu2 %v1653_v55  ;;  %v1588_v55 = vsub.f32 %v6977_v52, %v1556_v45 }
 0x538   :  { %v1611_v2 = vmul.f32 1.442695, %v1588_v55 }
 0x53a   :  { %2204 = vrot.lane.b32.xlu0 %v8758_v33, %s5926_s21  ;;  %5639 = vpow2.f32 %v1611_v2  ;;  %v1627_v2 = vmul.f32 1.442695, %v1596_v5 }
 0x542   :  { %5447 = vrot.lane.b32.xlu0 %v8759_v39, %s5925_s1 }
 0x544   :  { %2200 = vrot.lane.b32.xlu1 %v6465_v23, %s5926_s21  ;;  %v7092_v23 = vpop.eup %5637 }
 0x545   :  { %v1668_v33 = vsel %vm796_vm2, %v7092_v23, 0.0  ;;  %v7097_v32 = vpop.eup %5639 }
 0x546   :  { %v1650_v55 = vsel %vm796_vm2, %v7097_v32, 0.0 }
 0x54c   :  { %5452 = vrot.lane.b32.xlu1 %v8760_v9, %s5925_s1 }
 0x54e   :  { %2163 = vrot.lane.b32.xlu2 %v8761_v59, %s5926_s21 }
 0x554   :  { %2202 = vrot.lane.b32.xlu1 %v6491_v35, %s5926_s21  ;;  %v1595_v35 = vsub.f32 %v6991_v4, %v1577_v42 }
 0x556   :  { %v1625_v16 = vmul.f32 1.442695, %v1595_v35 }
 0x55c   :  { %2087 = vrot.lane.b32.xlu1 %v6414_v63, %s5926_s21 }
 0x56c   :  { %1669 = vadd.xlane.f32.xlu0 %v1668_v33  ;;  %v8762_v33 = vld [vmem:[#allocation11_spill] sm:$0xff] }
 0x56e   :  { %v1643_v59 = vpop.xlane.xlu2 %1642 }
 0x56f   :  { %5641 = vrcp.f32 %v1643_v59 }
 0x570   :  { %5643 = vpow2.f32 %v1625_v16 }
 0x575   :  { %v5642_v24 = vpop.eup %5641 }
 0x576   :  { %v1697_v52 = vmul.f32 %v5642_v24, %v7020_v11  ;;  %v1637_v45 = vpop.xlane.xlu0 %1636  ;;  %v7104_v35 = vpop.eup %5643 }
 0x577   :  { %v1646_v63 = vpop.xlane.xlu2 %1645  ;;  %5645 = vrcp.f32 %v1637_v45  ;;  %1651 = vadd.xlane.f32.xlu2 %v1650_v55  ;;  %v1671_v11 = vsel %vm796_vm2, %v7104_v35, 0.0  ;;  %v7126_v24 = vpop.xlane.xlu1 %1561 }
 0x578   :  { %5647 = vrcp.f32 %v1646_v63  ;;  %5269 = vmatmul.msk.f32.vlgmr.msrb.gmra.mxu0 %vm796_vm2, %v1697_v52 }
 0x579   :  { %5649 = vpow2.f32 %v1627_v2 }
 0x57d   :  { %v5646_v4 = vpop.eup %5645 }
 0x57e   :  { %v5648_v49 = vpop.eup %5647  ;;  %v1695_v42 = vmul.f32 %v5646_v4, %v7027_v54 }
 0x57f   :  { %1672 = vadd.xlane.f32.xlu2 %v1671_v11  ;;  %v1698_v7 = vmul.f32 %v5648_v49, %v7029_v22  ;;  %v7113_v63 = vpop.xlane.xlu2 %1648  ;;  %v7118_v59 = vpop.eup %5649 }
 0x580   :  { %2089 = vrot.lane.b32.xlu0 %v8762_v33, %s5926_s21  ;;  %5267 = vmatmul.msk.f32.vlgmr.msra.gmra.mxu3 %vm796_vm2, %v1695_v42  ;;  %v1674_v54 = vsel %vm796_vm2, %v7118_v59, 0.0 }
 0x581   :  { %5270 = vmatmul.msk.f32.gmra.mxu0 %vm796_vm2, %v1698_v7  ;;  %5285 = vmatpush.xpose.msk.msra.mxu3 %vm499_vm1, %v6899_v46  ;;  %v1667_v55 = vpop.xlane.xlu1 %1666 }
 0x585   :  { %5286 = vmatpush.xpose.msk.msra.mxu3 %vm499_vm1, %v6903_v47 }
 0x586   :  { %1675 = vadd.xlane.f32.xlu1 %v1674_v54  ;;  %v1640_v22 = vpop.xlane.xlu0 %1639 }
 0x587   :  { %5651 = vrcp.f32 %v1640_v22 }
 0x588   :  { %2083 = vrot.lane.b32.xlu0 %v6422_v3, %s5926_s21 }
 0x589   :  { %v1631_v16 = vpop.xlane.xlu2 %1630 }
 0x58a   :  { %5653 = vrcp.f32 %v1631_v16 }
 0x58d   :  { %v5652_v5 = vpop.eup %5651 }
 0x58e   :  { %v1696_v46 = vmul.f32 %v5652_v5, %v7046_v25  ;;  %v8763_v25 = vld [vmem:[#allocation29_spill] sm:$0xff] }
 0x590   :  { %v5654_v52 = vpop.eup %5653  ;;  %2128 = vrot.lane.b32.xlu0 %v6437_v10, %s5926_s21  ;;  %5268 = vmatmul.msk.f32.gmra.mxu3 %vm796_vm2, %v1696_v46 }
 0x591   :  { %v1693_v47 = vmul.f32 %v5654_v52, %v7051_v27  ;;  %v1661_v45 = vpop.xlane.xlu0 %1660 }
 0x592   :  { %5655 = vrcp.f32 %v1661_v45 }
 0x593   :  { %5265 = vmatmul.msk.f32.vlgmr.msrb.gmra.mxu2 %vm796_vm2, %v1693_v47 }
 0x594   :  { %5281 = vmatpush.xpose.msk.msrb.mxu2 %vm499_vm1, %v6911_v6 }
 0x596   :  { %v1634_v2 = vpop.xlane.xlu2 %1633 }
 0x597   :  { %5657 = vrcp.f32 %v1634_v2  ;;  %5457 = vrot.lane.b32.xlu2 %v8763_v25, %s5925_s1 }
 0x598   :  { %v5656_v4 = vpop.eup %5655  ;;  %5282 = vmatpush.xpose.msk.msrb.mxu2 %vm499_vm1, %v7022_v17  ;;  %2126 = vrot.lane.b32.xlu0 %v6444_v12, %s5926_s21 }
 0x599   :  { %v1703_v27 = vmul.f32 %v5656_v4, %v7056_v29 }
 0x59b   :  { %5275 = vmatmul.msk.f32.vlgmr.msrb.gmra.mxu3 %vm796_vm2, %v1703_v27 }
 0x59d   :  { %v5658_v49 = vpop.eup %5657 }
 0x59e   :  { %v1664_v42 = vpop.xlane.xlu1 %1663  ;;  %v1694_v6 = vmul.f32 %v5658_v49, %v7061_v34 }
 0x59f   :  { %5659 = vrcp.f32 %v1664_v42  ;;  %2085 = vrot.lane.b32.xlu2 %v6434_v8, %s5926_s21  ;;  %2241 = vrot.lane.b32.xlu1 %v6393_v57, %s5926_s21 }
 0x5a0   :  { %2122 = vrot.lane.b32.xlu0 %v6453_v15, %s5926_s21  ;;  %5266 = vmatmul.msk.f32.gmra.mxu2 %vm796_vm2, %v1694_v6 }
 0x5a4   :  { %v2207_v17 = vpop.permute.xlu0 %2206 }
 0x5a5   :  { %v5660_v29 = vpop.eup %5659  ;;  %5301 = vmatpush.xpose.msk.msrb.mxu3 %vm499_vm1, %v2207_v17 }
 0x5a6   :  { %v1704_v11 = vmul.f32 %v5660_v29, %v7065_v61 }
 0x5a7   :  { %2245 = vrot.lane.b32.xlu2 %v6354_v48, %s5926_s21  ;;  %5467 = vrot.lane.b32.xlu1 %v6549_v60, %s5926_s21 }
 0x5a8   :  { %2124 = vrot.lane.b32.xlu0 %v6487_v31, %s5926_s21  ;;  %5276 = vmatmul.msk.f32.gmra.mxu3 %vm796_vm2, %v1704_v11  ;;  %v8764_v11 = vld [vmem:[#allocation10_spill] sm:$0xff] }
 0x5a9   :  { %v1655_v34 = vpop.xlane.xlu2 %1654 }
 0x5aa   :  { %5661 = vrcp.f32 %v1655_v34 }
 0x5ab   :  { %5663 = vrcp.f32 %v7113_v63 }
 0x5ac   :  { %v2205_v7 = vpop.permute.xlu0 %2204  ;;  %5665 = vrcp.f32 %v1667_v55 }
 0x5ad   :  { %5302 = vmatpush.xpose.msk.msrb.mxu3 %vm499_vm1, %v2205_v7 }
 0x5af   :  { %2243 = vrot.lane.b32.xlu2 %v6366_v51, %s5926_s21  ;;  %5472 = vrot.lane.b32.xlu1 %v6541_v56, %s5926_s21 }
 0x5b0   :  { %v5662_v61 = vpop.eup %5661  ;;  %2282 = vrot.lane.b32.xlu0 %v6471_v26, %s5926_s21  ;;  %5287 = vmatmul.msk.f32.vlgmr.msra.gmra.mxu3 %vm499_vm1, %v7013_v36 }
 0x5b1   :  { %v1701_v60 = vmul.f32 %v5662_v61, %v7072_v30  ;;  %v5664_v56 = vpop.eup %5663  ;;  %v7211_v52 = vpop.permute.xlu2 %2163 }
 0x5b3   :  { %5273 = vmatmul.msk.f32.vlgmr.msra.gmra.mxu2 %vm796_vm2, %v1701_v60 }
 0x5b4   :  { %5297 = vmatpush.xpose.msk.msra.mxu2 %vm499_vm1, %v7009_v14  ;;  %v5448_v54 = vpop.permute.xlu0 %5447  ;;  %v5666_v14 = vpop.eup %5665 }
 0x5b5   :  { %v5450_v22 = vunpack.i.h.bf16 %v5448_v54  ;;  %v5449_v16 = vunpack.i.l.bf16 %v5448_v54 }
 0x5b6   :  { %v2201_v5 = vpop.permute.xlu1 %2200 }
 0x5b7   :  { %2239 = vrot.lane.b32.xlu2 %v6375_v53, %s5926_s21  ;;  %2791 = vrot.lane.b32.xlu1 %v6252_v20, %s5927_s22  ;;  %v1699_v20 = vmul.f32 %v5664_v56, %v7037_v21  ;;  %v1590_v21 = vsub.f32 %v6981_v0, %v7126_v24 }
 0x5b8   :  { %1848 = vmatpush.msrb.mxu1 %v5449_v16  ;;  %1959 = vmatpush.msra.mxu0 %v5450_v22 }
 0x5b9   :  { %5298 = vmatpush.xpose.msk.msra.mxu2 %vm499_vm1, %v6907_v19  ;;  %2280 = vrot.lane.b32.xlu0 %v6520_v44, %s5926_s21  ;;  %v1705_v19 = vmul.f32 %v5666_v14, %v7042_v38  ;;  %v1615_v38 = vmul.f32 1.442695, %v1590_v21 }
 0x5ba   :  { %5288 = vmatmul.msk.f32.gmra.mxu3 %vm499_vm1, %v7015_v37 }
 0x5bb   :  { %5667 = vpow2.f32 %v1615_v38 }
 0x5be   :  { %v5453_v36 = vpop.permute.xlu1 %5452 }
 0x5bf   :  { %v5455_v30 = vunpack.i.h.bf16 %v5453_v36  ;;  %v5454_v63 = vunpack.i.l.bf16 %v5453_v36  ;;  %2284 = vrot.lane.b32.xlu2 %v6447_v13, %s5926_s21  ;;  %5482 = vrot.lane.b32.xlu1 %v6514_v41, %s5926_s21 }
 0x5c1   :  { %1849 = vmatpush.msrb.mxu1 %v5454_v63  ;;  %1960 = vmatpush.msra.mxu0 %v5455_v30  ;;  %v7207_v46 = vpop.eup %5667 }
 0x5c2   :  { %5303 = vmatmul.msk.f32.vlgmr.msrb.gmra.mxu3 %vm499_vm1, %v2201_v5  ;;  %5271 = vmatmul.msk.f32.vlgmr.msrb.gmra.mxu1 %vm796_vm2, %v1699_v20  ;;  %v1656_v47 = vsel %vm796_vm2, %v7207_v46, 0.0 }
 0x5c3   :  { %5277 = vmatmul.msk.f32.vlgmr.msra.gmra.mxu0 %vm796_vm2, %v1705_v19 }
 0x5c6   :  { %v2203_v37 = vpop.permute.xlu1 %2202 }
 0x5c7   :  { %2278 = vrot.lane.b32.xlu2 %v6510_v40, %s5926_s21  ;;  %2830 = vrot.lane.b32.xlu1 %v8730_v1, %s5927_s22 }
 0x5ca   :  { %5304 = vmatmul.msk.f32.gmra.mxu3 %vm499_vm1, %v2203_v37 }
 0x5ce   :  { %v2088_v55 = vpop.permute.xlu1 %2087 }
 0x5cf   :  { %5462 = vrot.lane.b32.xlu2 %v8726_v43, %s5926_s21  ;;  %5497 = vrot.lane.b32.xlu1 %v8763_v25, %s5926_s21 }
 0x5d7   :  { %5477 = vrot.lane.b32.xlu2 %v8731_v28, %s5926_s21 }
 0x5df   :  { %2789 = vrot.lane.b32.xlu2 %v6243_v18, %s5927_s22  ;;  %v1670_v1 = vpop.xlane.xlu0 %1669 }
 0x5e0   :  { %5669 = vrcp.f32 %v1670_v1 }
 0x5e3   :  { %1657 = vadd.xlane.f32.xlu0 %v1656_v47 }
 0x5e6   :  { %v5670_v45 = vpop.eup %5669 }
 0x5e7   :  { %2832 = vrot.lane.b32.xlu2 %v6357_v50, %s5927_s22  ;;  %v1706_v0 = vmul.f32 %v5670_v45, %v7092_v23 }
 0x5e9   :  { %5278 = vmatmul.msk.f32.gmra.mxu0 %vm796_vm2, %v1706_v0 }
 0x5ea   :  { %v1652_v24 = vpop.xlane.xlu2 %1651 }
 0x5eb   :  { %5671 = vrcp.f32 %v1652_v24 }
 0x5ef   :  { %5492 = vrot.lane.b32.xlu2 %v8760_v9, %s5926_s21 }
 0x5f1   :  { %v5672_v18 = vpop.eup %5671 }
 0x5f2   :  { %v1673_v2 = vpop.xlane.xlu2 %1672  ;;  %v2090_v4 = vpop.permute.xlu0 %2089  ;;  %v1700_v27 = vmul.f32 %v5672_v18, %v7097_v32 }
 0x5f3   :  { %5289 = vmatpush.xpose.msk.msrb.mxu0 %vm499_vm1, %v2090_v4  ;;  %5673 = vrcp.f32 %v1673_v2 }
 0x5f4   :  { %5272 = vmatmul.msk.f32.gmra.mxu1 %vm796_vm2, %v1700_v27  ;;  %v8769_v27 = vld [vmem:[#allocation13_spill] sm:$0xff] }
 0x5f5   :  { %v7257_v45 = vpop.f32.mrf.mxu0 }
 0x5f6   :  { %8766 = vst [vmem:[#allocation28_spill] sm:$0xff] %v7257_v45 }
 0x5f7   :  { %2795 = vrot.lane.b32.xlu0 %v8729_v58, %s5927_s22  ;;  %2873 = vrot.lane.b32.xlu2 %v8762_v33, %s5927_s22 }
 0x5f8   :  { %5290 = vmatpush.xpose.msk.msrb.mxu0 %vm499_vm1, %v2088_v55 }
 0x5f9   :  { %v1676_v50 = vpop.xlane.xlu1 %1675  ;;  %v5674_v49 = vpop.eup %5673 }
 0x5fa   :  { %v5458_v23 = vpop.permute.xlu2 %5457  ;;  %v2084_v9 = vpop.permute.xlu0 %2083  ;;  %5675 = vrcp.f32 %v1676_v50  ;;  %v1707_v6 = vmul.f32 %v5674_v49, %v7104_v35 }
 0x5fb   :  { %v5459_v42 = vunpack.i.l.bf16 %v5458_v23  ;;  %5291 = vmatmul.msk.f32.vlgmr.msrb.gmra.mxu0 %vm499_vm1, %v2084_v9  ;;  %v5460_v32 = vunpack.i.h.bf16 %v5458_v23 }
 0x5fd   :  { %1996 = vmatpush.msra.mxu1 %v5459_v42  ;;  %v8770_v42 = vld [vmem:[#allocation8_spill] sm:$0xff] }
 0x5fe   :  { %v7260_v55 = vpop.f32.mrf.mxu0 }
 0x5ff   :  { %2793 = vrot.lane.b32.xlu0 %v8728_v62, %s5927_s22  ;;  %1997 = vmatpush.msra.mxu1 %v5460_v32  ;;  %v8765_v62 = vld [vmem:[#allocation2_spill] sm:$0xff]  ;;  %8767 = vst [vmem:[#allocation26_spill] sm:$0xff] %v7260_v55 }
 0x600   :  { %5279 = vmatmul.msk.f32.vlgmr.msra.gmra.mxu1 %vm796_vm2, %v1707_v6  ;;  %v5676_v17 = vpop.eup %5675 }
 0x601   :  { %v1708_v29 = vmul.f32 %v5676_v17, %v7118_v59 }
 0x602   :  { %v2086_v58 = vpop.permute.xlu2 %2085  ;;  %v2129_v33 = vpop.permute.xlu0 %2128 }
 0x603   :  { %5292 = vmatmul.msk.f32.gmra.mxu0 %vm499_vm1, %v2086_v58  ;;  %5293 = vmatpush.xpose.msk.msrb.mxu1 %vm499_vm1, %v2129_v33  ;;  %v7269_v9 = vpop.f32.mrf.mxu3 }
 0x607   :  { %2834 = vrot.lane.b32.xlu0 %v8764_v11, %s5927_s22 }
 0x608   :  { %5280 = vmatmul.msk.f32.gmra.mxu1 %vm796_vm2, %v1708_v29  ;;  %v8771_v29 = vld [vmem:[#allocation43_spill] sm:$0xff] }
 0x60a   :  { %v2246_v35 = vpop.permute.xlu2 %2245  ;;  %v2127_v34 = vpop.permute.xlu0 %2126 }
 0x60b   :  { %5294 = vmatpush.xpose.msk.msrb.mxu1 %vm499_vm1, %v2127_v34  ;;  %5305 = vmatpush.xpose.msk.msra.mxu0 %vm499_vm1, %v2246_v35 }
 0x60f   :  { %2828 = vrot.lane.b32.xlu0 %v8765_v62, %s5927_s22 }
 0x611   :  { %v2242_v7 = vpop.permute.xlu1 %2241 }
 0x612   :  { %v2244_v61 = vpop.permute.xlu2 %2243  ;;  %v2123_v60 = vpop.permute.xlu0 %2122 }
 0x613   :  { %5295 = vmatmul.msk.f32.vlgmr.msrb.gmra.mxu1 %vm499_vm1, %v2123_v60  ;;  %5306 = vmatpush.xpose.msk.msra.mxu0 %vm499_vm1, %v2244_v61  ;;  %v7281_v58 = vpop.f32.mrf.mxu3 }
 0x617   :  { %5487 = vrot.lane.b32.xlu0 %v8759_v39, %s5926_s21 }
 0x619   :  { %v5468_v59 = vpop.permute.xlu1 %5467 }
 0x61a   :  { %v5469_v54 = vunpack.i.l.bf16 %v5468_v59  ;;  %v2240_v22 = vpop.permute.xlu2 %2239  ;;  %v2125_v16 = vpop.permute.xlu0 %2124  ;;  %v5470_v17 = vunpack.i.h.bf16 %v5468_v59 }
 0x61b   :  { %5296 = vmatmul.msk.f32.gmra.mxu1 %vm499_vm1, %v2125_v16  ;;  %5307 = vmatmul.msk.f32.vlgmr.msra.gmra.mxu0 %vm499_vm1, %v2240_v22 }
 0x61c   :  { %2570 = vmatpush.msra.mxu3 %v5469_v54 }
 0x61e   :  { %v7293_v61 = vpop.f32.mrf.mxu3 }
 0x61f   :  { %8772 = vst [vmem:[#allocation29_spill] sm:$0xff] %v7293_v61 }
 0x621   :  { %v5473_v5 = vpop.permute.xlu1 %5472 }
 0x622   :  { %v5474_v56 = vunpack.i.l.bf16 %v5473_v5  ;;  %v2285_v14 = vpop.permute.xlu2 %2284  ;;  %v2283_v36 = vpop.permute.xlu0 %2282  ;;  %v5475_v35 = vunpack.i.h.bf16 %v5473_v5 }
 0x623   :  { %5308 = vmatmul.msk.f32.gmra.mxu0 %vm499_vm1, %v2242_v7  ;;  %5309 = vmatpush.xpose.msk.msra.mxu1 %vm499_vm1, %v2285_v14 }
 0x624   :  { %2571 = vmatpush.msra.mxu3 %v5474_v56 }
 0x627   :  { %5310 = vmatpush.xpose.msk.msra.mxu1 %vm499_vm1, %v2283_v36 }
 0x629   :  { %v7253_v39 = vpop.permute.xlu1 %2791 }
 0x62a   :  { %v2279_v30 = vpop.permute.xlu2 %2278 }
 0x62b   :  { %5311 = vmatmul.msk.f32.vlgmr.msra.gmra.mxu1 %vm499_vm1, %v2279_v30  ;;  %v2281_v20 = vpop.permute.xlu0 %2280  ;;  %v7309_v14 = vpop.f32.mrf.mxu3 }
 0x631   :  { %v5483_v63 = vpop.permute.xlu1 %5482 }
 0x632   :  { %v5484_v19 = vunpack.i.l.bf16 %v5483_v63  ;;  %v5463_v37 = vpop.permute.xlu2 %5462  ;;  %v5485_v21 = vunpack.i.h.bf16 %v5483_v63 }
 0x633   :  { %5312 = vmatmul.msk.f32.gmra.mxu1 %vm499_vm1, %v2281_v20  ;;  %v5464_v2 = vunpack.i.l.bf16 %v5463_v37  ;;  %v5465_v50 = vunpack.i.h.bf16 %v5463_v37 }
 0x634   :  { %2605 = vmatpush.msrb.mxu0 %v5484_v19 }
 0x636   :  { %2606 = vmatpush.msrb.mxu0 %v5485_v21 }
 0x639   :  { %v7299_v54 = vpop.permute.xlu1 %2830 }
 0x63a   :  { %v5478_v38 = vpop.permute.xlu2 %5477 }
 0x63b   :  { %v5479_v1 = vunpack.i.l.bf16 %v5478_v38  ;;  %v5480_v47 = vunpack.i.h.bf16 %v5478_v38 }
 0x63d   :  { %2710 = vmatpush.msrb.mxu3 %v5479_v1 }
 0x63f   :  { %2711 = vmatpush.msrb.mxu3 %v5480_v47  ;;  %v7271_v49 = vpop.f32.mrf.mxu1  ;;  %v2077_v47 = vpop.f32.mrf.mxu3 }
 0x640   :  { %v7263_v4 = vpop.f32.mrf.mxu0 }
 0x641   :  { %8768 = vst [vmem:[#allocation11_spill] sm:$0xff] %v7263_v4  ;;  %v5498_v20 = vpop.permute.xlu1 %5497 }
 0x642   :  { %v7279_v6 = vpop.permute.xlu2 %2789  ;;  %v5499_v38 = vunpack.i.l.bf16 %v5498_v20  ;;  %v5500_v1 = vunpack.i.h.bf16 %v5498_v20 }
 0x64a   :  { %v7297_v59 = vpop.permute.xlu2 %2832 }
 0x652   :  { %v5493_v30 = vpop.permute.xlu2 %5492 }
 0x653   :  { %v5495_v21 = vunpack.i.h.bf16 %v5493_v30 }
 0x656   :  { %v1658_v0 = vpop.xlane.xlu0 %1657 }
 0x657   :  { %5677 = vrcp.f32 %v1658_v0 }
 0x65d   :  { %v5678_v24 = vpop.eup %5677 }
 0x65e   :  { %v1702_v18 = vmul.f32 %v5678_v24, %v7207_v46 }
 0x660   :  { %5274 = vmatmul.msk.f32.gmra.mxu2 %vm796_vm2, %v1702_v18 }
 0x666   :  { %v7273_v46 = vpop.f32.mrf.mxu0 }
 0x668   :  { %5283 = vmatmul.msk.f32.vlgmr.msrb.gmra.mxu2 %vm499_vm1, %v8769_v27 }
 0x669   :  { %2535 = vmatpush.msrb.mxu2 %v5464_v2  ;;  %v7267_v23 = vpop.permute.xlu0 %2795  ;;  %v7317_v2 = vmul.f32 0.35355338, %v2077_v47 }
 0x66b   :  { %2536 = vmatpush.msrb.mxu2 %v5465_v50 }
 0x670   :  { %5284 = vmatmul.msk.f32.gmra.mxu2 %vm499_vm1, %v8770_v42  ;;  %v2080_v42 = vpop.f32.mrf.mxu3 }
 0x671   :  { %v7277_v32 = vpop.permute.xlu0 %2793  ;;  %v7283_v33 = vpop.f32.mrf.mxu1  ;;  %v7333_v20 = vmul.f32 0.35355338, %v2080_v42 }
 0x678   :  { %5299 = vmatmul.msk.f32.vlgmr.msra.gmra.mxu2 %vm499_vm1, %v8771_v29  ;;  %v2116_v11 = vpop.f32.mrf.mxu0  ;;  %v2339_v29 = vsel %vm796_vm2, %v7317_v2, -inf }
 0x679   :  { %2675 = vmatpush.msra.mxu2 %v5470_v17  ;;  %v7287_v34 = vpop.permute.xlu0 %2834  ;;  %v7289_v62 = vmul.f32 0.35355338, %v2116_v11 }
 0x67b   :  { %2676 = vmatpush.msra.mxu2 %v5475_v35  ;;  %v2345_v7 = vsel %vm796_vm2, %v7289_v62, -inf }
 0x67c   :  { %2346 = vmax.xlane.f32.xlu2 %v2345_v7 }
 0x67d   :  { %v7295_v60 = vpop.f32.mrf.mxu1 }
 0x67e   :  { %8773 = vst [vmem:[#allocation10_spill] sm:$0xff] %v7295_v60 }
 0x680   :  { %5300 = vmatmul.msk.f32.gmra.mxu2 %vm499_vm1, %v7211_v52  ;;  %v2119_v22 = vpop.f32.mrf.mxu0  ;;  %v5494_v52 = vunpack.i.l.bf16 %v5493_v30 }
 0x681   :  { %v7303_v16 = vpop.permute.xlu0 %2828  ;;  %v7305_v5 = vmul.f32 0.35355338, %v2119_v22 }
 0x683   :  { %v2348_v56 = vsel %vm796_vm2, %v7305_v5, -inf }
 0x684   :  { %2349 = vmax.xlane.f32.xlu1 %v2348_v56 }
 0x685   :  { %v7311_v36 = vpop.f32.mrf.mxu1 }
 0x686   :  { %8774 = vst [vmem:[#allocation2_spill] sm:$0xff] %v7311_v36 }
 0x689   :  { %v5488_v63 = vpop.permute.xlu0 %5487 }
 0x68a   :  { %v5490_v19 = vunpack.i.h.bf16 %v5488_v63  ;;  %v5489_v37 = vunpack.i.l.bf16 %v5488_v63  ;;  %v2233_v63 = vpop.f32.mrf.mxu3 }
 0x68c   :  { %2640 = vmatpush.msrb.mxu1 %v5489_v37  ;;  %2745 = vmatpush.msra.mxu0 %v5490_v19  ;;  %v7335_v19 = vmul.f32 0.35355338, %v2233_v63 }
 0x68e   :  { %2641 = vmatpush.msrb.mxu1 %v5494_v52  ;;  %2746 = vmatpush.msra.mxu0 %v5495_v21  ;;  %v2342_v21 = vsel %vm796_vm2, %v7333_v20, -inf  ;;  %v2363_v52 = vsel %vm796_vm2, %v7335_v19, -inf }
 0x690   :  { %2780 = vmatpush.msra.mxu1 %v5499_v38  ;;  %v2155_v0 = vpop.f32.mrf.mxu1 }
 0x691   :  { %v7313_v24 = vmul.f32 0.35355338, %v2155_v0 }
 0x692   :  { %2781 = vmatpush.msra.mxu1 %v5500_v1 }
 0x693   :  { %v2351_v18 = vsel %vm796_vm2, %v7313_v24, -inf }
 0x694   :  { %2352 = vmax.xlane.f32.xlu1 %v2351_v18 }
 0x698   :  { %v2272_v27 = vpop.f32.mrf.mxu0  ;;  %v2158_v11 = vpop.f32.mrf.mxu1 }
 0x699   :  { %v7319_v50 = vmul.f32 0.35355338, %v2272_v27  ;;  %v7325_v35 = vmul.f32 0.35355338, %v2158_v11  ;;  %v7349_v27 = vpop.f32.mrf.mxu2 }
 0x69b   :  { %v2369_v17 = vsel %vm796_vm2, %v7319_v50, -inf  ;;  %v2354_v56 = vsel %vm796_vm2, %v7325_v35, -inf }
 0x69c   :  { %2370 = vmax.xlane.f32.xlu0 %v2369_v17  ;;  %2340 = vmax.xlane.f32.xlu1 %v2339_v29 }
 0x6a0   :  { %v2275_v7 = vpop.f32.mrf.mxu0 }
 0x6a1   :  { %v7327_v22 = vmul.f32 0.35355338, %v2275_v7  ;;  %v7351_v42 = vpop.f32.mrf.mxu2 }
 0x6a3   :  { %v2372_v30 = vsel %vm796_vm2, %v7327_v22, -inf }
 0x6a4   :  { %2355 = vmax.xlane.f32.xlu0 %v2354_v56  ;;  %2373 = vmax.xlane.f32.xlu1 %v2372_v30  ;;  %v7361_v30 = vpop.permute.xlu2 %2873 }
 0x6a8   :  { %v2311_v37 = vpop.f32.mrf.mxu1 }
 0x6a9   :  { %v7341_v38 = vmul.f32 0.35355338, %v2311_v37  ;;  %v7353_v17 = vpop.f32.mrf.mxu2 }
 0x6aa   :  { %8775 = vst [vmem:[#allocation13_spill] sm:$0xff] %v7353_v17 }
 0x6ab   :  { %v2375_v1 = vsel %vm796_vm2, %v7341_v38, -inf }
 0x6ac   :  { %2343 = vmax.xlane.f32.xlu0 %v2342_v21  ;;  %2364 = vmax.xlane.f32.xlu1 %v2363_v52  ;;  %v2236_v52 = vpop.f32.mrf.mxu3 }
 0x6b0   :  { %v2314_v47 = vpop.f32.mrf.mxu1 }
 0x6b1   :  { %v7345_v0 = vmul.f32 0.35355338, %v2314_v47 }
 0x6b3   :  { %v2378_v18 = vsel %vm796_vm2, %v7345_v0, -inf }
 0x6b4   :  { %2376 = vmax.xlane.f32.xlu0 %v2375_v1 }
 0x6bc   :  { %2379 = vmax.xlane.f32.xlu0 %v2378_v18  ;;  %v7368_v18 = vmul.f32 0.35355338, %v2236_v52 }
 0x6e3   :  { %v7355_v29 = vpop.f32.mrf.mxu2 }
 0x6e4   :  { %8776 = vst [vmem:[#allocation8_spill] sm:$0xff] %v7355_v29  ;;  %v2366_v29 = vsel %vm796_vm2, %v7368_v18, -inf }
 0x6eb   :  { %v2038_v11 = vpop.f32.mrf.mxu2 }
 0x6ec   :  { %v7357_v7 = vmul.f32 0.35355338, %v2038_v11 }
 0x6ee   :  { %v2333_v56 = vsel %vm796_vm2, %v7357_v7, -inf }
 0x6ef   :  { %2334 = vmax.xlane.f32.xlu2 %v2333_v56  ;;  %v2347_v11 = vpop.xlane.xlu2 %2346 }
 0x6f0   :  { %v2385_v61 = vsub.f32 %v7289_v62, %v2347_v11 }
 0x6f3   :  { %v2041_v63 = vpop.f32.mrf.mxu2 }
 0x6f4   :  { %v7363_v37 = vmul.f32 0.35355338, %v2041_v63 }
 0x6f6   :  { %v2336_v21 = vsel %vm796_vm2, %v7363_v37, -inf }
 0x6f7   :  { %2337 = vmax.xlane.f32.xlu0 %v2336_v21  ;;  %v2350_v1 = vpop.xlane.xlu1 %2349  ;;  %v2405_v21 = vmul.f32 1.442695, %v2385_v61 }
 0x6f8   :  { %v2386_v47 = vsub.f32 %v7305_v5, %v2350_v1 }
 0x6fa   :  { %v2407_v36 = vmul.f32 1.442695, %v2386_v47 }
 0x6fb   :  { %v2194_v60 = vpop.f32.mrf.mxu2 }
 0x6fc   :  { %5679 = vpow2.f32 %v2407_v36  ;;  %v7370_v56 = vmul.f32 0.35355338, %v2194_v60 }
 0x6fd   :  { %5681 = vpow2.f32 %v2405_v21 }
 0x6fe   :  { %v2357_v63 = vsel %vm796_vm2, %v7370_v56, -inf }
 0x6ff   :  { %2358 = vmax.xlane.f32.xlu2 %v2357_v63  ;;  %2367 = vmax.xlane.f32.xlu0 %v2366_v29 }
 0x702   :  { %v7377_v5 = vpop.eup %5679 }
 0x703   :  { %v2197_v52 = vpop.f32.mrf.mxu2  ;;  %v2444_v1 = vsel %vm796_vm2, %v7377_v5, 0.0  ;;  %v7386_v29 = vpop.eup %5681 }
 0x704   :  { %v7381_v36 = vmul.f32 0.35355338, %v2197_v52  ;;  %2445 = vadd.xlane.f32.xlu1 %v2444_v1  ;;  %v2441_v61 = vsel %vm796_vm2, %v7386_v29, 0.0 }
 0x706   :  { %v2360_v62 = vsel %vm796_vm2, %v7381_v36, -inf }
 0x707   :  { %2361 = vmax.xlane.f32.xlu2 %v2360_v62  ;;  %v2353_v60 = vpop.xlane.xlu1 %2352 }
 0x708   :  { %v2387_v47 = vsub.f32 %v7313_v24, %v2353_v60 }
 0x70a   :  { %v2409_v11 = vmul.f32 1.442695, %v2387_v47 }
 0x70c   :  { %5683 = vpow2.f32 %v2409_v11 }
 0x70f   :  { %2442 = vadd.xlane.f32.xlu2 %v2441_v61  ;;  %v2371_v63 = vpop.xlane.xlu0 %2370  ;;  %v2341_v52 = vpop.xlane.xlu1 %2340 }
 0x710   :  { %v2393_v1 = vsub.f32 %v7319_v50, %v2371_v63  ;;  %v2383_v21 = vsub.f32 %v7317_v2, %v2341_v52 }
 0x712   :  { %v7392_v17 = vpop.eup %5683  ;;  %v2421_v62 = vmul.f32 1.442695, %v2393_v1  ;;  %v2401_v4 = vmul.f32 1.442695, %v2383_v21 }
 0x713   :  { %v2447_v24 = vsel %vm796_vm2, %v7392_v17, 0.0 }
 0x714   :  { %5685 = vpow2.f32 %v2421_v62  ;;  %2448 = vadd.xlane.f32.xlu0 %v2447_v24 }
 0x715   :  { %5687 = vpow2.f32 %v2401_v4 }
 0x717   :  { %v2356_v60 = vpop.xlane.xlu0 %2355  ;;  %v2374_v47 = vpop.xlane.xlu1 %2373 }
 0x718   :  { %v2388_v11 = vsub.f32 %v7325_v35, %v2356_v60  ;;  %v2394_v61 = vsub.f32 %v7327_v22, %v2374_v47 }
 0x71a   :  { %v7398_v55 = vpop.eup %5685  ;;  %v2411_v50 = vmul.f32 1.442695, %v2388_v11  ;;  %v2423_v2 = vmul.f32 1.442695, %v2394_v61 }
 0x71b   :  { %v7400_v63 = vpop.eup %5687  ;;  %v2465_v52 = vsel %vm796_vm2, %v7398_v55, 0.0 }
 0x71c   :  { %5689 = vpow2.f32 %v2411_v50  ;;  %2466 = vadd.xlane.f32.xlu2 %v2465_v52  ;;  %v2435_v4 = vsel %vm796_vm2, %v7400_v63, 0.0 }
 0x71d   :  { %5691 = vpow2.f32 %v2423_v2  ;;  %2436 = vadd.xlane.f32.xlu0 %v2435_v4 }
 0x71f   :  { %v2344_v1 = vpop.xlane.xlu0 %2343  ;;  %v2365_v35 = vpop.xlane.xlu1 %2364 }
 0x720   :  { %v2384_v22 = vsub.f32 %v7333_v20, %v2344_v1  ;;  %v2391_v21 = vsub.f32 %v7335_v19, %v2365_v35 }
 0x722   :  { %v7408_v62 = vpop.eup %5689  ;;  %v2403_v24 = vmul.f32 1.442695, %v2384_v22  ;;  %v2417_v60 = vmul.f32 1.442695, %v2391_v21 }
 0x723   :  { %v7410_v47 = vpop.eup %5691  ;;  %v2450_v11 = vsel %vm796_vm2, %v7408_v62, 0.0 }
 0x724   :  { %5693 = vpow2.f32 %v2403_v24  ;;  %v2468_v61 = vsel %vm796_vm2, %v7410_v47, 0.0  ;;  %2451 = vadd.xlane.f32.xlu1 %v2450_v11 }
 0x725   :  { %5695 = vpow2.f32 %v2417_v60  ;;  %2469 = vadd.xlane.f32.xlu2 %v2468_v61 }
 0x727   :  { %v2377_v50 = vpop.xlane.xlu0 %2376 }
 0x728   :  { %v2395_v20 = vsub.f32 %v7341_v38, %v2377_v50 }
 0x72a   :  { %v7417_v19 = vpop.eup %5693  ;;  %v2425_v2 = vmul.f32 1.442695, %v2395_v20 }
 0x72b   :  { %v7419_v52 = vpop.eup %5695  ;;  %v2438_v4 = vsel %vm796_vm2, %v7417_v19, 0.0 }
 0x72c   :  { %5697 = vpow2.f32 %v2425_v2  ;;  %v2459_v1 = vsel %vm796_vm2, %v7419_v52, 0.0  ;;  %2439 = vadd.xlane.f32.xlu0 %v2438_v4 }
 0x72d   :  { %2460 = vadd.xlane.f32.xlu1 %v2459_v1 }
 0x72f   :  { %v7429_v38 = vpop.xlane.xlu0 %2379 }
 0x732   :  { %v7425_v35 = vpop.eup %5697 }
 0x733   :  { %v2471_v22 = vsel %vm796_vm2, %v7425_v35, 0.0 }
 0x734   :  { %2472 = vadd.xlane.f32.xlu0 %v2471_v22 }
 0x762   :  { %v2335_v21 = vpop.xlane.xlu2 %2334 }
 0x763   :  { %v2381_v24 = vsub.f32 %v7357_v7, %v2335_v21 }
 0x765   :  { %v2397_v60 = vmul.f32 1.442695, %v2381_v24 }
 0x767   :  { %5699 = vpow2.f32 %v2397_v60 }
 0x76a   :  { %v2338_v11 = vpop.xlane.xlu0 %2337 }
 0x76b   :  { %v2382_v61 = vsub.f32 %v7363_v37, %v2338_v11 }
 0x76d   :  { %v7433_v50 = vpop.eup %5699  ;;  %v2399_v20 = vmul.f32 1.442695, %v2382_v61 }
 0x76e   :  { %v2429_v2 = vsel %vm796_vm2, %v7433_v50, 0.0 }
 0x76f   :  { %5701 = vpow2.f32 %v2399_v20  ;;  %2430 = vadd.xlane.f32.xlu0 %v2429_v2 }
 0x772   :  { %v2359_v4 = vpop.xlane.xlu2 %2358  ;;  %v2368_v1 = vpop.xlane.xlu0 %2367 }
 0x773   :  { %v2389_v22 = vsub.f32 %v7370_v56, %v2359_v4  ;;  %v2392_v45 = vsub.f32 %v7368_v18, %v2368_v1 }
 0x775   :  { %v7439_v7 = vpop.eup %5701  ;;  %v2413_v21 = vmul.f32 1.442695, %v2389_v22  ;;  %v2419_v24 = vmul.f32 1.442695, %v2392_v45 }
 0x776   :  { %v2432_v37 = vsel %vm796_vm2, %v7439_v7, 0.0 }
 0x777   :  { %5703 = vpow2.f32 %v2413_v21  ;;  %2433 = vadd.xlane.f32.xlu1 %v2432_v37  ;;  %v2446_v20 = vpop.xlane.xlu1 %2445 }
 0x778   :  { %5705 = vpow2.f32 %v2419_v24 }
 0x77a   :  { %v7443_v60 = vpop.xlane.xlu2 %2361 }
 0x77d   :  { %v7445_v11 = vpop.eup %5703 }
 0x77e   :  { %v7447_v61 = vpop.eup %5705  ;;  %v2453_v56 = vsel %vm796_vm2, %v7445_v11, 0.0 }
 0x77f   :  { %2454 = vadd.xlane.f32.xlu2 %v2453_v56  ;;  %v2462_v18 = vsel %vm796_vm2, %v7447_v61, 0.0 }
 0x780   :  { %2463 = vadd.xlane.f32.xlu0 %v2462_v18 }
 0x782   :  { %v2443_v45 = vpop.xlane.xlu2 %2442 }
 0x783   :  { %5707 = vrcp.f32 %v2443_v45 }
 0x787   :  { %v2449_v2 = vpop.xlane.xlu0 %2448 }
 0x788   :  { %5709 = vrcp.f32 %v2449_v2 }
 0x789   :  { %v5708_v4 = vpop.eup %5707  ;;  %5711 = vrcp.f32 %v2446_v20 }
 0x78a   :  { %v2497_v1 = vmul.f32 %v5708_v4, %v7386_v29 }
 0x78c   :  { %5317 = vmatmul.msk.f32.vlgmr.msrb.gmra.mxu0 %vm796_vm2, %v2497_v1 }
 0x78d   :  { %5337 = vmatpush.xpose.msk.msrb.mxu0 %vm499_vm1, %v7361_v30 }
 0x78e   :  { %v5710_v22 = vpop.eup %5709 }
 0x78f   :  { %v5712_v21 = vpop.eup %5711  ;;  %v2499_v24 = vmul.f32 %v5710_v22, %v7392_v17  ;;  %v2467_v37 = vpop.xlane.xlu2 %2466  ;;  %v8777_v17 = vld [vmem:[#allocation12_spill] sm:$0xff] }
 0x790   :  { %5713 = vrcp.f32 %v2467_v37  ;;  %2869 = vrot.lane.b32.xlu1 %v6434_v8, %s5927_s22  ;;  %v2437_v56 = vpop.xlane.xlu0 %2436  ;;  %v2498_v29 = vmul.f32 %v5712_v21, %v7377_v5  ;;  %v8780_v37 = vld [vmem:[#allocation5_spill] sm:$0xff] }
 0x791   :  { %5715 = vrcp.f32 %v2437_v56  ;;  %5319 = vmatmul.msk.f32.vlgmr.msrb.gmra.mxu1 %vm796_vm2, %v2499_v24  ;;  %v8781_v56 = vld [vmem:[#allocation6_spill] sm:$0xff] }
 0x794   :  { %2867 = vrot.lane.b32.xlu0 %v6422_v3, %s5927_s22  ;;  %5318 = vmatmul.msk.f32.gmra.mxu0 %vm796_vm2, %v2498_v29 }
 0x796   :  { %v5714_v30 = vpop.eup %5713 }
 0x797   :  { %v5716_v18 = vpop.eup %5715  ;;  %2871 = vrot.lane.b32.xlu2 %v8777_v17, %s5927_s22  ;;  %v2452_v45 = vpop.xlane.xlu1 %2451  ;;  %v2505_v5 = vmul.f32 %v5714_v30, %v7398_v55  ;;  %v8778_v55 = vld [vmem:[#allocation19_spill] sm:$0xff] }
 0x798   :  { %v2495_v20 = vmul.f32 %v5716_v18, %v7400_v63  ;;  %v2470_v8 = vpop.xlane.xlu2 %2469  ;;  %2912 = vrot.lane.b32.xlu1 %v6437_v10, %s5927_s22  ;;  %5717 = vrcp.f32 %v2452_v45  ;;  %v8785_v17 = vld [vmem:[#allocation15_spill] sm:$0xff] }
 0x799   :  { %5719 = vrcp.f32 %v2470_v8  ;;  %v8787_v8 = vld [vmem:[#allocation7_spill] sm:$0xff] }
 0x79a   :  { %5315 = vmatmul.msk.f32.vlgmr.msra.gmra.mxu3 %vm796_vm2, %v2495_v20 }
 0x79b   :  { %5333 = vmatpush.xpose.msk.msra.mxu3 %vm499_vm1, %v7287_v34 }
 0x79c   :  { %2910 = vrot.lane.b32.xlu0 %v6444_v12, %s5927_s22  ;;  %5325 = vmatmul.msk.f32.vlgmr.msra.gmra.mxu0 %vm796_vm2, %v2505_v5  ;;  %v8790_v5 = vld [vmem:[#allocation21_spill] sm:$0xff] }
 0x79e   :  { %v5718_v3 = vpop.eup %5717 }
 0x79f   :  { %v5720_v63 = vpop.eup %5719  ;;  %5334 = vmatpush.xpose.msk.msra.mxu3 %vm499_vm1, %v7297_v59  ;;  %v2440_v10 = vpop.xlane.xlu0 %2439  ;;  %v2500_v2 = vmul.f32 %v5718_v3, %v7408_v62  ;;  %v8779_v62 = vld [vmem:[#allocation17_spill] sm:$0xff] }
 0x7a0   :  { %2951 = vrot.lane.b32.xlu1 %v8778_v55, %s5927_s22  ;;  %5721 = vrcp.f32 %v2440_v10  ;;  %v2506_v34 = vmul.f32 %v5720_v63, %v7410_v47  ;;  %v2461_v4 = vpop.xlane.xlu1 %2460  ;;  %v2396_v47 = vsub.f32 %v7345_v0, %v7429_v38  ;;  %v2390_v0 = vsub.f32 %v7381_v36, %v7443_v60  ;;  %v8782_v38 = vld [vmem:[#allocation18_spill] sm:$0xff]  ;;  %v8783_v36 = vld [vmem:[#allocation4_spill] sm:$0xff]  ;;  %v8793_v55 = vld [vmem:[#allocation23_spill] sm:$0xff] }
 0x7a1   :  { %5320 = vmatmul.msk.f32.gmra.mxu1 %vm796_vm2, %v2500_v2  ;;  %5723 = vrcp.f32 %v2461_v4  ;;  %v8784_v60 = vld [vmem:[#allocation14_spill] sm:$0xff] }
 0x7a2   :  { %v8786_v45 = vpack.i.bf16 %v8784_v60, %v8785_v17  ;;  %v8792_v2 = vld [vmem:[#allocation22_spill] sm:$0xff] }
 0x7a4   :  { %2906 = vrot.lane.b32.xlu0 %v6453_v15, %s5927_s22  ;;  %5326 = vmatmul.msk.f32.gmra.mxu0 %vm796_vm2, %v2506_v34  ;;  %v8794_v34 = vpack.i.bf16 %v8792_v2, %v8793_v55 }
 0x7a6   :  { %v5722_v12 = vpop.eup %5721 }
 0x7a7   :  { %v2473_v59 = vpop.xlane.xlu0 %2472  ;;  %v2496_v1 = vmul.f32 %v5722_v12, %v7417_v19  ;;  %v5724_v22 = vpop.eup %5723  ;;  %v2427_v19 = vmul.f32 1.442695, %v2396_v47 }
 0x7a8   :  { %2949 = vrot.lane.b32.xlu1 %v8779_v62, %s5927_s22  ;;  %5725 = vrcp.f32 %v2473_v59  ;;  %v2503_v15 = vmul.f32 %v5724_v22, %v7419_v52 }
 0x7a9   :  { %5316 = vmatmul.msk.f32.gmra.mxu3 %vm796_vm2, %v2496_v1  ;;  %5727 = vpow2.f32 %v2427_v19 }
 0x7ae   :  { %v5726_v21 = vpop.eup %5725 }
 0x7af   :  { %v2507_v24 = vmul.f32 %v5726_v21, %v7425_v35  ;;  %v7501_v29 = vpop.eup %5727  ;;  %v2415_v35 = vmul.f32 1.442695, %v2390_v0 }
 0x7b0   :  { %2947 = vrot.lane.b32.xlu1 %v8780_v37, %s5927_s22  ;;  %v2474_v52 = vsel %vm796_vm2, %v7501_v29, 0.0 }
 0x7b1   :  { %5323 = vmatmul.msk.f32.vlgmr.msrb.gmra.mxu3 %vm796_vm2, %v2503_v15  ;;  %5327 = vmatmul.msk.f32.vlgmr.msra.gmra.mxu1 %vm796_vm2, %v2507_v24  ;;  %5729 = vpow2.f32 %v2415_v35 }
 0x7b7   :  { %v7511_v30 = vpop.eup %5729 }
 0x7b8   :  { %2988 = vrot.lane.b32.xlu1 %v8781_v56, %s5927_s22  ;;  %v2456_v18 = vsel %vm796_vm2, %v7511_v30, 0.0 }
 0x7c0   :  { %2475 = vadd.xlane.f32.xlu2 %v2474_v52  ;;  %2986 = vrot.lane.b32.xlu1 %v8782_v38, %s5927_s22 }
 0x7c8   :  { %3023 = vrot.lane.b32.xlu1 %v6375_v53, %s5927_s22 }
 0x7ce   :  { %2457 = vadd.xlane.f32.xlu0 %v2456_v18 }
 0x7d0   :  { %3066 = vrot.lane.b32.xlu1 %v6471_v26, %s5927_s22 }
 0x7d8   :  { %2945 = vrot.lane.b32.xlu2 %v8783_v36, %s5927_s22  ;;  %5507 = vrot.lane.b32.xlu1 %v8786_v45, %s5927_s22 }
 0x7e0   :  { %3029 = vrot.lane.b32.xlu2 %v6354_v48, %s5927_s22  ;;  %5512 = vrot.lane.b32.xlu1 %v6514_v41, %s5927_s22 }
 0x7e2   :  { %2908 = vrot.lane.b32.xlu0 %v6487_v31, %s5927_s22  ;;  %v2431_v53 = vpop.xlane.xlu0 %2430  ;;  %v8788_v31 = vld [vmem:[#allocation16_spill] sm:$0xff] }
 0x7e3   :  { %5731 = vrcp.f32 %v2431_v53 }
 0x7e8   :  { %3025 = vrot.lane.b32.xlu2 %v6393_v57, %s5927_s22  ;;  %5527 = vrot.lane.b32.xlu1 %v8731_v28, %s5927_s22 }
 0x7e9   :  { %v5732_v26 = vpop.eup %5731 }
 0x7ea   :  { %v2493_v20 = vmul.f32 %v5732_v26, %v7433_v50  ;;  %2990 = vrot.lane.b32.xlu0 %v8787_v8, %s5927_s22  ;;  %v2434_v48 = vpop.xlane.xlu1 %2433 }
 0x7eb   :  { %5733 = vrcp.f32 %v2434_v48 }
 0x7ec   :  { %5313 = vmatmul.msk.f32.vlgmr.msrb.gmra.mxu2 %vm796_vm2, %v2493_v20 }
 0x7ed   :  { %5329 = vmatpush.xpose.msk.msrb.mxu2 %vm499_vm1, %v7267_v23  ;;  %v8789_v23 = vld [vmem:[#allocation20_spill] sm:$0xff] }
 0x7ee   :  { %v8791_v3 = vpack.i.bf16 %v8789_v23, %v8790_v5 }
 0x7f0   :  { %3062 = vrot.lane.b32.xlu2 %v6510_v40, %s5927_s22 }
 0x7f1   :  { %v5734_v57 = vpop.eup %5733  ;;  %5330 = vmatpush.xpose.msk.msrb.mxu2 %vm499_vm1, %v7277_v32 }
 0x7f2   :  { %2984 = vrot.lane.b32.xlu0 %v8788_v31, %s5927_s22  ;;  %v2455_v41 = vpop.xlane.xlu2 %2454  ;;  %v2494_v28 = vmul.f32 %v5734_v57, %v7439_v7 }
 0x7f3   :  { %5735 = vrcp.f32 %v2455_v41  ;;  %v2464_v50 = vpop.xlane.xlu0 %2463 }
 0x7f4   :  { %5737 = vrcp.f32 %v2464_v50  ;;  %5314 = vmatmul.msk.f32.gmra.mxu2 %vm796_vm2, %v2494_v28 }
 0x7f8   :  { %5517 = vrot.lane.b32.xlu2 %v8791_v3, %s5927_s22 }
 0x7f9   :  { %v5736_v40 = vpop.eup %5735 }
 0x7fa   :  { %v5738_v63 = vpop.eup %5737  ;;  %v2501_v32 = vmul.f32 %v5736_v40, %v7445_v11  ;;  %3027 = vrot.lane.b32.xlu0 %v6366_v51, %s5927_s22  ;;  %v2872_v10 = vpop.permute.xlu2 %2871 }
 0x7fb   :  { %5338 = vmatpush.xpose.msk.msrb.mxu0 %vm499_vm1, %v2872_v10  ;;  %v2504_v7 = vmul.f32 %v5738_v63, %v7447_v61 }
 0x7fc   :  { %5321 = vmatmul.msk.f32.vlgmr.msra.gmra.mxu2 %vm796_vm2, %v2501_v32 }
 0x7fd   :  { %5324 = vmatmul.msk.f32.gmra.mxu3 %vm796_vm2, %v2504_v7 }
 0x800   :  { %5522 = vrot.lane.b32.xlu2 %v8794_v34, %s5927_s22 }
 0x802   :  { %3068 = vrot.lane.b32.xlu0 %v6447_v13, %s5927_s22  ;;  %v2870_v11 = vpop.permute.xlu1 %2869 }
 0x805   :  { %5335 = vmatmul.msk.f32.vlgmr.msra.gmra.mxu3 %vm499_vm1, %v7303_v16  ;;  %v8795_v16 = vld [vmem:[#allocation25_spill] sm:$0xff] }
 0x806   :  { %v2868_v51 = vpop.permute.xlu0 %2867 }
 0x807   :  { %5339 = vmatmul.msk.f32.vlgmr.msrb.gmra.mxu0 %vm499_vm1, %v2868_v51 }
 0x809   :  { %v7594_v36 = vpop.f32.mrf.mxu0 }
 0x80a   :  { %3064 = vrot.lane.b32.xlu0 %v6520_v44, %s5927_s22  ;;  %v2913_v61 = vpop.permute.xlu1 %2912  ;;  %v8796_v44 = vld [vmem:[#allocation27_spill] sm:$0xff] }
 0x80b   :  { %5341 = vmatpush.xpose.msk.msrb.mxu1 %vm499_vm1, %v2913_v61  ;;  %v8797_v12 = vpack.i.bf16 %v8795_v16, %v8796_v44 }
 0x80d   :  { %5336 = vmatmul.msk.f32.gmra.mxu3 %vm499_vm1, %v7299_v54 }
 0x80e   :  { %v2911_v4 = vpop.permute.xlu0 %2910 }
 0x80f   :  { %5340 = vmatmul.msk.f32.gmra.mxu0 %vm499_vm1, %v2870_v11  ;;  %5342 = vmatpush.xpose.msk.msrb.mxu1 %vm499_vm1, %v2911_v4 }
 0x811   :  { %v7601_v20 = vpop.f32.mrf.mxu0 }
 0x812   :  { %5502 = vrot.lane.b32.xlu0 %v8726_v43, %s5927_s22  ;;  %v2952_v13 = vpop.permute.xlu1 %2951 }
 0x813   :  { %5345 = vmatpush.xpose.msk.msra.mxu2 %vm499_vm1, %v2952_v13 }
 0x816   :  { %v2907_v21 = vpop.permute.xlu0 %2906 }
 0x819   :  { %v7609_v28 = vpop.f32.mrf.mxu0 }
 0x81a   :  { %5532 = vrot.lane.b32.xlu0 %v8797_v12, %s5927_s22  ;;  %v2950_v59 = vpop.permute.xlu1 %2949 }
 0x81b   :  { %5346 = vmatpush.xpose.msk.msra.mxu2 %vm499_vm1, %v2950_v59 }
 0x821   :  { %v7616_v63 = vpop.f32.mrf.mxu0 }
 0x822   :  { %v2948_v54 = vpop.permute.xlu1 %2947 }
 0x82a   :  { %v2989_v1 = vpop.permute.xlu1 %2988 }
 0x832   :  { %v2987_v62 = vpop.permute.xlu1 %2986 }
 0x833   :  { %v2476_v22 = vpop.xlane.xlu2 %2475 }
 0x834   :  { %5739 = vrcp.f32 %v2476_v22 }
 0x83a   :  { %v5740_v47 = vpop.eup %5739  ;;  %v3024_v15 = vpop.permute.xlu1 %3023 }
 0x83b   :  { %v2946_v43 = vpop.permute.xlu2 %2945  ;;  %v2508_v24 = vmul.f32 %v5740_v47, %v7501_v29 }
 0x83d   :  { %5328 = vmatmul.msk.f32.gmra.mxu1 %vm796_vm2, %v2508_v24  ;;  %v7638_v24 = vpop.f32.mrf.mxu1 }
 0x841   :  { %v2458_v37 = vpop.xlane.xlu0 %2457 }
 0x842   :  { %5741 = vrcp.f32 %v2458_v37  ;;  %v3067_v19 = vpop.permute.xlu1 %3066 }
 0x843   :  { %v3030_v56 = vpop.permute.xlu2 %3029 }
 0x844   :  { %5353 = vmatpush.xpose.msk.msra.mxu0 %vm499_vm1, %v3030_v56 }
 0x845   :  { %5343 = vmatmul.msk.f32.vlgmr.msrb.gmra.mxu1 %vm499_vm1, %v2907_v21  ;;  %v7640_v37 = vpop.f32.mrf.mxu1 }
 0x848   :  { %v5742_v0 = vpop.eup %5741 }
 0x849   :  { %v2502_v52 = vmul.f32 %v5742_v0, %v7511_v30 }
 0x84a   :  { %v5508_v35 = vpop.permute.xlu1 %5507 }
 0x84b   :  { %5322 = vmatmul.msk.f32.gmra.mxu2 %vm796_vm2, %v2502_v52  ;;  %v5509_v60 = vunpack.i.l.bf16 %v5508_v35  ;;  %v3026_v30 = vpop.permute.xlu2 %3025  ;;  %v5510_v45 = vunpack.i.h.bf16 %v5508_v35 }
 0x852   :  { %v5513_v38 = vpop.permute.xlu1 %5512 }
 0x853   :  { %5331 = vmatmul.msk.f32.vlgmr.msrb.gmra.mxu2 %vm499_vm1, %v7279_v6  ;;  %v3063_v8 = vpop.permute.xlu2 %3062  ;;  %v5514_v48 = vunpack.i.l.bf16 %v5513_v38  ;;  %v5515_v41 = vunpack.i.h.bf16 %v5513_v38 }
 0x854   :  { %v2909_v29 = vpop.permute.xlu0 %2908 }
 0x855   :  { %5344 = vmatmul.msk.f32.gmra.mxu1 %vm499_vm1, %v2909_v29 }
 0x85a   :  { %v5528_v17 = vpop.permute.xlu1 %5527 }
 0x85b   :  { %5332 = vmatmul.msk.f32.gmra.mxu2 %vm499_vm1, %v7253_v39  ;;  %v5529_v6 = vunpack.i.l.bf16 %v5528_v17  ;;  %v7599_v39 = vpop.f32.mrf.mxu3  ;;  %v5530_v26 = vunpack.i.h.bf16 %v5528_v17  ;;  %v5518_v23 = vpop.permute.xlu2 %5517 }
 0x85c   :  { %v2991_v18 = vpop.permute.xlu0 %2990  ;;  %v5519_v3 = vunpack.i.l.bf16 %v5518_v23  ;;  %v5520_v40 = vunpack.i.h.bf16 %v5518_v23 }
 0x85d   :  { %5349 = vmatpush.xpose.msk.msrb.mxu3 %vm499_vm1, %v2991_v18 }
 0x861   :  { %5350 = vmatpush.xpose.msk.msrb.mxu3 %vm499_vm1, %v2989_v1 }
 0x863   :  { %5347 = vmatmul.msk.f32.vlgmr.msra.gmra.mxu2 %vm499_vm1, %v2946_v43  ;;  %v7606_v31 = vpop.f32.mrf.mxu3  ;;  %v5523_v55 = vpop.permute.xlu2 %5522 }
 0x864   :  { %v2985_v53 = vpop.permute.xlu0 %2984  ;;  %v5524_v4 = vunpack.i.l.bf16 %v5523_v55  ;;  %v5525_v16 = vunpack.i.h.bf16 %v5523_v55 }
 0x865   :  { %3354 = vmatpush.msra.mxu3 %v5509_v60 }
 0x866   :  { %5351 = vmatmul.msk.f32.vlgmr.msrb.gmra.mxu3 %vm499_vm1, %v2985_v53 }
 0x867   :  { %3355 = vmatpush.msra.mxu3 %v5510_v45 }
 0x869   :  { %3494 = vmatpush.msrb.mxu3 %v5529_v6 }
 0x86b   :  { %3495 = vmatpush.msrb.mxu3 %v5530_v26  ;;  %5348 = vmatmul.msk.f32.gmra.mxu2 %vm499_vm1, %v2948_v54  ;;  %v7612_v5 = vpop.f32.mrf.mxu3 }
 0x86c   :  { %v3028_v57 = vpop.permute.xlu0 %3027 }
 0x86d   :  { %5354 = vmatpush.xpose.msk.msra.mxu0 %vm499_vm1, %v3028_v57 }
 0x86e   :  { %5352 = vmatmul.msk.f32.gmra.mxu3 %vm499_vm1, %v2987_v62 }
 0x86f   :  { %v7646_v0 = vpop.f32.mrf.mxu2 }
 0x870   :  { %5355 = vmatmul.msk.f32.vlgmr.msra.gmra.mxu0 %vm499_vm1, %v3024_v15 }
 0x871   :  { %3389 = vmatpush.msrb.mxu0 %v5514_v48 }
 0x873   :  { %3390 = vmatpush.msrb.mxu0 %v5515_v41 }
 0x874   :  { %v3069_v50 = vpop.permute.xlu0 %3068 }
 0x875   :  { %5357 = vmatpush.xpose.msk.msra.mxu1 %vm499_vm1, %v3069_v50 }
 0x877   :  { %v7652_v38 = vpop.f32.mrf.mxu2 }
 0x878   :  { %5356 = vmatmul.msk.f32.gmra.mxu0 %vm499_vm1, %v3026_v30 }
 0x879   :  { %5358 = vmatpush.xpose.msk.msra.mxu1 %vm499_vm1, %v3067_v19  ;;  %v7642_v19 = vpop.f32.mrf.mxu1 }
 0x87c   :  { %5359 = vmatmul.msk.f32.vlgmr.msra.gmra.mxu1 %vm499_vm1, %v3063_v8  ;;  %v3065_v32 = vpop.permute.xlu0 %3064 }
 0x87d   :  { %3424 = vmatpush.msrb.mxu1 %v5519_v3 }
 0x87f   :  { %3425 = vmatpush.msrb.mxu1 %v5520_v40  ;;  %v7654_v18 = vpop.f32.mrf.mxu2 }
 0x880   :  { %v7619_v10 = vpop.f32.mrf.mxu3 }
 0x884   :  { %v2900_v7 = vpop.f32.mrf.mxu0  ;;  %5360 = vmatmul.msk.f32.gmra.mxu1 %vm499_vm1, %v3065_v32  ;;  %v5503_v2 = vpop.permute.xlu0 %5502 }
 0x885   :  { %v7622_v34 = vmul.f32 0.35355338, %v2900_v7  ;;  %v5504_v11 = vunpack.i.l.bf16 %v5503_v2  ;;  %v5505_v51 = vunpack.i.h.bf16 %v5503_v2 }
 0x887   :  { %3319 = vmatpush.msrb.mxu2 %v5504_v11  ;;  %v3129_v61 = vsel %vm796_vm2, %v7622_v34, -inf }
 0x888   :  { %v2861_v13 = vpop.f32.mrf.mxu3  ;;  %3130 = vmax.xlane.f32.xlu1 %v3129_v61 }
 0x889   :  { %3320 = vmatpush.msrb.mxu2 %v5505_v51  ;;  %v7632_v47 = vmul.f32 0.35355338, %v2861_v13 }
 0x88b   :  { %3459 = vmatpush.msra.mxu2 %v5524_v4  ;;  %v3123_v43 = vsel %vm796_vm2, %v7632_v47, -inf }
 0x88c   :  { %v2903_v44 = vpop.f32.mrf.mxu0  ;;  %v5533_v12 = vpop.permute.xlu0 %5532 }
 0x88d   :  { %3460 = vmatpush.msra.mxu2 %v5525_v16  ;;  %v7626_v59 = vmul.f32 0.35355338, %v2903_v44  ;;  %v5534_v54 = vunpack.i.l.bf16 %v5533_v12  ;;  %v5535_v1 = vunpack.i.h.bf16 %v5533_v12 }
 0x88f   :  { %3529 = vmatpush.msra.mxu0 %v5534_v54  ;;  %v3132_v62 = vsel %vm796_vm2, %v7626_v59, -inf }
 0x890   :  { %v2864_v22 = vpop.f32.mrf.mxu3  ;;  %3133 = vmax.xlane.f32.xlu0 %v3132_v62 }
 0x891   :  { %v7630_v21 = vmul.f32 0.35355338, %v2864_v22  ;;  %3530 = vmatpush.msra.mxu0 %v5535_v1 }
 0x893   :  { %v3126_v15 = vsel %vm796_vm2, %v7630_v21, -inf }
 0x894   :  { %3127 = vmax.xlane.f32.xlu2 %v3126_v15 }
 0x898   :  { %3124 = vmax.xlane.f32.xlu0 %v3123_v43 }
 0x8ba   :  { %v7644_v56 = vpop.f32.mrf.mxu1 }
 0x8c2   :  { %v2939_v52 = vpop.f32.mrf.mxu1 }
 0x8c3   :  { %v7648_v35 = vmul.f32 0.35355338, %v2939_v52 }
 0x8c5   :  { %v3135_v29 = vsel %vm796_vm2, %v7648_v35, -inf }
 0x8c6   :  { %3136 = vmax.xlane.f32.xlu1 %v3135_v29 }
 0x8ce   :  { %v7656_v60 = vpop.f32.mrf.mxu2 }
 0x8d2   :  { %v2942_v41 = vpop.f32.mrf.mxu1 }
 0x8d3   :  { %v7670_v23 = vmul.f32 0.35355338, %v2942_v41 }
 0x8d5   :  { %v3138_v2 = vsel %vm796_vm2, %v7670_v23, -inf }
 0x8d6   :  { %v2822_v30 = vpop.f32.mrf.mxu2 }
 0x8d7   :  { %v7682_v4 = vmul.f32 0.35355338, %v2822_v30 }
 0x8d9   :  { %v3117_v12 = vsel %vm796_vm2, %v7682_v4, -inf }
 0x8de   :  { %v2825_v53 = vpop.f32.mrf.mxu2 }
 0x8df   :  { %v7664_v48 = vmul.f32 0.35355338, %v2825_v53 }
 0x8e1   :  { %v3120_v50 = vsel %vm796_vm2, %v7664_v48, -inf }
 0x8e6   :  { %v2978_v51 = vpop.f32.mrf.mxu2 }
 0x8e7   :  { %v7686_v16 = vmul.f32 0.35355338, %v2978_v51 }
 0x8e9   :  { %v3017_v17 = vpop.f32.mrf.mxu3  ;;  %v3141_v15 = vsel %vm796_vm2, %v7686_v16, -inf }
 0x8ea   :  { %v7658_v45 = vmul.f32 0.35355338, %v3017_v17 }
 0x8ec   :  { %v3147_v6 = vsel %vm796_vm2, %v7658_v45, -inf }
 0x8ed   :  { %3148 = vmax.xlane.f32.xlu2 %v3147_v6  ;;  %v3056_v26 = vpop.f32.mrf.mxu0 }
 0x8ee   :  { %v7662_v8 = vmul.f32 0.35355338, %v3056_v26  ;;  %v2981_v43 = vpop.f32.mrf.mxu2 }
 0x8ef   :  { %v7697_v30 = vmul.f32 0.35355338, %v2981_v43 }
 0x8f0   :  { %v3153_v57 = vsel %vm796_vm2, %v7662_v8, -inf }
 0x8f1   :  { %3154 = vmax.xlane.f32.xlu1 %v3153_v57  ;;  %v3020_v3 = vpop.f32.mrf.mxu3 }
 0x8f2   :  { %v7674_v7 = vmul.f32 0.35355338, %v3020_v3 }
 0x8f4   :  { %v3150_v61 = vsel %vm796_vm2, %v7674_v7, -inf }
 0x8f5   :  { %3121 = vmax.xlane.f32.xlu2 %v3120_v50  ;;  %v3059_v40 = vpop.f32.mrf.mxu0 }
 0x8f6   :  { %v7672_v32 = vmul.f32 0.35355338, %v3059_v40 }
 0x8f8   :  { %v3156_v55 = vsel %vm796_vm2, %v7672_v32, -inf }
 0x8f9   :  { %3139 = vmax.xlane.f32.xlu1 %v3138_v2  ;;  %3157 = vmax.xlane.f32.xlu0 %v3156_v55  ;;  %v3095_v11 = vpop.f32.mrf.mxu1 }
 0x8fa   :  { %v7684_v13 = vmul.f32 0.35355338, %v3095_v11 }
 0x8fb   :  { %v3131_v44 = vpop.xlane.xlu1 %3130 }
 0x8fc   :  { %v3159_v54 = vsel %vm796_vm2, %v7684_v13, -inf  ;;  %v3169_v62 = vsub.f32 %v7622_v34, %v3131_v44  ;;  %v3144_v34 = vsel %vm796_vm2, %v7697_v30, -inf }
 0x8fd   :  { %3151 = vmax.xlane.f32.xlu2 %v3150_v61 }
 0x8fe   :  { %v3189_v29 = vmul.f32 1.442695, %v3169_v62 }
 0x900   :  { %5743 = vpow2.f32 %v3189_v29 }
 0x901   :  { %3118 = vmax.xlane.f32.xlu1 %v3117_v12  ;;  %3160 = vmax.xlane.f32.xlu0 %v3159_v54  ;;  %v3098_v1 = vpop.f32.mrf.mxu1 }
 0x902   :  { %v7695_v52 = vmul.f32 0.35355338, %v3098_v1 }
 0x903   :  { %v3134_v22 = vpop.xlane.xlu0 %3133 }
 0x904   :  { %v3162_v17 = vsel %vm796_vm2, %v7695_v52, -inf  ;;  %v3170_v6 = vsub.f32 %v7626_v59, %v3134_v22 }
 0x905   :  { %3142 = vmax.xlane.f32.xlu2 %v3141_v15 }
 0x906   :  { %v3191_v57 = vmul.f32 1.442695, %v3170_v6  ;;  %v7705_v50 = vpop.eup %5743 }
 0x907   :  { %v3225_v3 = vsel %vm796_vm2, %v7705_v50, 0.0  ;;  %v3128_v12 = vpop.xlane.xlu2 %3127 }
 0x909   :  { %3163 = vmax.xlane.f32.xlu0 %v3162_v17 }
 0x90b   :  { %v3125_v53 = vpop.xlane.xlu0 %3124 }
 0x90c   :  { %v3167_v26 = vsub.f32 %v7632_v47, %v3125_v53  ;;  %v3168_v53 = vsub.f32 %v7630_v21, %v3128_v12 }
 0x90d   :  { %3145 = vmax.xlane.f32.xlu2 %v3144_v34 }
 0x90e   :  { %v3185_v41 = vmul.f32 1.442695, %v3167_v26 }
 0x910   :  { %5745 = vpow2.f32 %v3185_v41  ;;  %v3187_v41 = vmul.f32 1.442695, %v3168_v53 }
 0x911   :  { %5747 = vpow2.f32 %v3191_v57 }
 0x915   :  { %3226 = vadd.xlane.f32.xlu2 %v3225_v3 }
 0x916   :  { %v7709_v40 = vpop.eup %5745 }
 0x917   :  { %v3219_v59 = vsel %vm796_vm2, %v7709_v40, 0.0  ;;  %v7713_v2 = vpop.eup %5747 }
 0x918   :  { %3220 = vadd.xlane.f32.xlu1 %v3219_v59  ;;  %v3228_v47 = vsel %vm796_vm2, %v7713_v2, 0.0 }
 0x91d   :  { %3229 = vadd.xlane.f32.xlu2 %v3228_v47 }
 0x939   :  { %v3137_v55 = vpop.xlane.xlu1 %3136 }
 0x93a   :  { %v3171_v11 = vsub.f32 %v7648_v35, %v3137_v55 }
 0x93c   :  { %v3193_v51 = vmul.f32 1.442695, %v3171_v11 }
 0x93e   :  { %5749 = vpow2.f32 %v3193_v51 }
 0x944   :  { %v7718_v61 = vpop.eup %5749 }
 0x945   :  { %v3231_v44 = vsel %vm796_vm2, %v7718_v61, 0.0 }
 0x946   :  { %3232 = vadd.xlane.f32.xlu2 %v3231_v44 }
 0x960   :  { %v3149_v54 = vpop.xlane.xlu2 %3148 }
 0x964   :  { %v3155_v1 = vpop.xlane.xlu1 %3154 }
 0x965   :  { %v3177_v62 = vsub.f32 %v7662_v8, %v3155_v1 }
 0x967   :  { %v3205_v22 = vmul.f32 1.442695, %v3177_v62 }
 0x968   :  { %v3122_v15 = vpop.xlane.xlu2 %3121 }
 0x969   :  { %5751 = vpow2.f32 %v3205_v22 }
 0x96c   :  { %v3140_v43 = vpop.xlane.xlu1 %3139  ;;  %v3158_v29 = vpop.xlane.xlu0 %3157 }
 0x96d   :  { %v3172_v35 = vsub.f32 %v7670_v23, %v3140_v43  ;;  %v3178_v17 = vsub.f32 %v7672_v32, %v3158_v29  ;;  %v3175_v32 = vsub.f32 %v7658_v45, %v3149_v54 }
 0x96f   :  { %v7725_v6 = vpop.eup %5751  ;;  %v3195_v34 = vmul.f32 1.442695, %v3172_v35  ;;  %v3207_v26 = vmul.f32 1.442695, %v3178_v17  ;;  %v3201_v12 = vmul.f32 1.442695, %v3175_v32 }
 0x970   :  { %v7728_v57 = vpop.xlane.xlu2 %3151  ;;  %v3249_v8 = vsel %vm796_vm2, %v7725_v6, 0.0 }
 0x971   :  { %5753 = vpow2.f32 %v3195_v34  ;;  %3250 = vadd.xlane.f32.xlu0 %v3249_v8 }
 0x972   :  { %5755 = vpow2.f32 %v3207_v26 }
 0x973   :  { %5757 = vpow2.f32 %v3187_v41 }
 0x974   :  { %v3119_v3 = vpop.xlane.xlu1 %3118  ;;  %v3161_v59 = vpop.xlane.xlu0 %3160 }
 0x975   :  { %v3165_v23 = vsub.f32 %v7682_v4, %v3119_v3  ;;  %v3179_v55 = vsub.f32 %v7684_v13, %v3161_v59  ;;  %v3166_v13 = vsub.f32 %v7664_v48, %v3122_v15 }
 0x977   :  { %v7734_v47 = vpop.eup %5753  ;;  %v3181_v21 = vmul.f32 1.442695, %v3165_v23  ;;  %v3209_v45 = vmul.f32 1.442695, %v3179_v55  ;;  %v3183_v29 = vmul.f32 1.442695, %v3166_v13 }
 0x978   :  { %v7737_v11 = vpop.xlane.xlu2 %3142  ;;  %v7739_v51 = vpop.eup %5755  ;;  %v3234_v44 = vsel %vm796_vm2, %v7734_v47, 0.0 }
 0x979   :  { %5759 = vpow2.f32 %v3181_v21  ;;  %3235 = vadd.xlane.f32.xlu0 %v3234_v44  ;;  %v3252_v4 = vsel %vm796_vm2, %v7739_v51, 0.0  ;;  %v7745_v54 = vpop.eup %5757 }
 0x97a   :  { %3253 = vadd.xlane.f32.xlu1 %v3252_v4  ;;  %5761 = vpow2.f32 %v3201_v12  ;;  %v3222_v22 = vsel %vm796_vm2, %v7745_v54, 0.0 }
 0x97b   :  { %5763 = vpow2.f32 %v3209_v45  ;;  %v8800_v45 = vld [vmem:[#allocation11_spill] sm:$0xff] }
 0x97c   :  { %5765 = vpow2.f32 %v3183_v29 }
 0x97f   :  { %v7747_v1 = vpop.eup %5759 }
 0x980   :  { %v7750_v62 = vpop.xlane.xlu2 %3145  ;;  %v3213_v43 = vsel %vm796_vm2, %v7747_v1, 0.0  ;;  %v7756_v35 = vpop.eup %5761 }
 0x981   :  { %3223 = vadd.xlane.f32.xlu0 %v3222_v22  ;;  %3214 = vadd.xlane.f32.xlu2 %v3213_v43  ;;  %v7758_v17 = vpop.eup %5763  ;;  %v3243_v48 = vsel %vm796_vm2, %v7756_v35, 0.0 }
 0x982   :  { %v3255_v15 = vsel %vm796_vm2, %v7758_v17, 0.0  ;;  %v7764_v26 = vpop.eup %5765 }
 0x983   :  { %v3216_v59 = vsel %vm796_vm2, %v7764_v26, 0.0 }
 0x988   :  { %v3227_v53 = vpop.xlane.xlu2 %3226 }
 0x989   :  { %5767 = vrcp.f32 %v3227_v53  ;;  %3244 = vadd.xlane.f32.xlu2 %v3243_v48  ;;  %3256 = vadd.xlane.f32.xlu0 %v3255_v15 }
 0x98b   :  { %v3221_v34 = vpop.xlane.xlu1 %3220 }
 0x98c   :  { %5769 = vrcp.f32 %v3221_v34 }
 0x98f   :  { %v5768_v8 = vpop.eup %5767 }
 0x990   :  { %v3281_v41 = vmul.f32 %v5768_v8, %v7705_v50  ;;  %v3230_v3 = vpop.xlane.xlu2 %3229 }
 0x991   :  { %5771 = vrcp.f32 %v3230_v3  ;;  %3217 = vadd.xlane.f32.xlu2 %v3216_v59 }
 0x992   :  { %5365 = vmatmul.msk.f32.vlgmr.msrb.gmra.mxu0 %vm796_vm2, %v3281_v41  ;;  %v5770_v23 = vpop.eup %5769  ;;  %v8801_v41 = vld [vmem:[#allocation24_spill] sm:$0xff] }
 0x993   :  { %v3279_v32 = vmul.f32 %v5770_v23, %v7709_v40  ;;  %3589 = vrot.lane.b32.xlu1 %v7349_v27, %s5928_s2 }
 0x995   :  { %5363 = vmatmul.msk.f32.vlgmr.msra.gmra.mxu3 %vm796_vm2, %v3279_v32 }
 0x997   :  { %v5772_v21 = vpop.eup %5771 }
 0x998   :  { %v3282_v50 = vmul.f32 %v5772_v21, %v7713_v2 }
 0x99a   :  { %5366 = vmatmul.msk.f32.gmra.mxu0 %vm796_vm2, %v3282_v50 }
 0x99b   :  { %3655 = vrot.lane.b32.xlu1 %v7652_v38, %s5929_s23 }
 0x99d   :  { %3653 = vrot.lane.b32.xlu0 %v7646_v0, %s5929_s23 }
 0x9a3   :  { %3657 = vrot.lane.b32.xlu1 %v7599_v39, %s5929_s23 }
 0x9a5   :  { %3591 = vrot.lane.b32.xlu0 %v7351_v42, %s5928_s2  ;;  %v3164_v42 = vpop.xlane.xlu0 %3163 }
 0x9a9   :  { %5537 = vrot.lane.b32.xlu2 %v8763_v25, %s5927_s22 }
 0x9ab   :  { %3595 = vrot.lane.b32.xlu1 %v7281_v58, %s5928_s2  ;;  %v3180_v58 = vsub.f32 %v7695_v52, %v3164_v42 }
 0x9ad   :  { %3593 = vrot.lane.b32.xlu0 %v7269_v9, %s5928_s2  ;;  %v3211_v39 = vmul.f32 1.442695, %v3180_v58 }
 0x9b3   :  { %3665 = vrot.lane.b32.xlu1 %v7638_v24, %s5929_s23 }
 0x9b5   :  { %3659 = vrot.lane.b32.xlu0 %v7606_v31, %s5929_s23 }
 0x9b9   :  { %v3233_v27 = vpop.xlane.xlu2 %3232 }
 0x9ba   :  { %5773 = vrcp.f32 %v3233_v27  ;;  %v8802_v27 = vld [vmem:[#allocation30_spill] sm:$0xff] }
 0x9bb   :  { %3671 = vrot.lane.b32.xlu1 %v7656_v60, %s5929_s23  ;;  %5775 = vpow2.f32 %v3211_v39  ;;  %v3174_v60 = vsub.f32 %v7697_v30, %v7750_v62  ;;  %v8803_v39 = vld [vmem:[#allocation3_spill] sm:$0xff] }
 0x9bd   :  { %3661 = vrot.lane.b32.xlu0 %v7594_v36, %s5929_s23 }
 0x9c0   :  { %v5774_v25 = vpop.eup %5773 }
 0x9c1   :  { %v3283_v9 = vmul.f32 %v5774_v25, %v7718_v61  ;;  %v7809_v36 = vpop.eup %5775 }
 0x9c2   :  { %v3258_v31 = vsel %vm796_vm2, %v7809_v36, 0.0 }
 0x9c3   :  { %3611 = vrot.lane.b32.xlu1 %v7309_v14, %s5928_s2  ;;  %5367 = vmatmul.msk.f32.vlgmr.msrb.gmra.mxu1 %vm796_vm2, %v3283_v9 }
 0x9c5   :  { %3663 = vrot.lane.b32.xlu0 %v7601_v20, %s5929_s23  ;;  %v8798_v20 = vld [vmem:[#allocation28_spill] sm:$0xff] }
 0x9cb   :  { %3675 = vrot.lane.b32.xlu1 %v7619_v10, %s5929_s23  ;;  %v3176_v10 = vsub.f32 %v7674_v7, %v7728_v57  ;;  %v3173_v7 = vsub.f32 %v7686_v16, %v7737_v11  ;;  %v3199_v57 = vmul.f32 1.442695, %v3174_v60  ;;  %v8807_v60 = vld [vmem:[#allocation29_spill] sm:$0xff] }
 0x9cd   :  { %3601 = vrot.lane.b32.xlu0 %v7271_v49, %s5928_s2  ;;  %v3197_v55 = vmul.f32 1.442695, %v3173_v7 }
 0x9d2   :  { %3259 = vadd.xlane.f32.xlu2 %v3258_v31 }
 0x9d3   :  { %3615 = vrot.lane.b32.xlu1 %v7273_v46, %s5928_s2  ;;  %v3203_v46 = vmul.f32 1.442695, %v3176_v10 }
 0x9d5   :  { %3603 = vrot.lane.b32.xlu0 %v7283_v33, %s5928_s2  ;;  %v8799_v33 = vld [vmem:[#allocation26_spill] sm:$0xff] }
 0x9db   :  { %3679 = vrot.lane.b32.xlu1 %v7616_v63, %s5929_s23 }
 0x9e4   :  { %v3251_v14 = vpop.xlane.xlu0 %3250 }
 0x9e5   :  { %5777 = vrcp.f32 %v3251_v14 }
 0x9ea   :  { %3597 = vrot.lane.b32.xlu2 %v8798_v20, %s5928_s2  ;;  %v8804_v20 = vld [vmem:[#allocation13_spill] sm:$0xff] }
 0x9eb   :  { %v5778_v49 = vpop.eup %5777 }
 0x9ec   :  { %v3289_v24 = vmul.f32 %v5778_v49, %v7725_v6  ;;  %v3236_v0 = vpop.xlane.xlu0 %3235 }
 0x9ed   :  { %v3254_v38 = vpop.xlane.xlu1 %3253  ;;  %5779 = vrcp.f32 %v3236_v0 }
 0x9ee   :  { %5781 = vrcp.f32 %v3254_v38  ;;  %5373 = vmatmul.msk.f32.vlgmr.msra.gmra.mxu0 %vm796_vm2, %v3289_v24  ;;  %v8805_v24 = vld [vmem:[#allocation32_spill] sm:$0xff] }
 0x9ef   :  { %5783 = vpow2.f32 %v3203_v46  ;;  %v8806_v46 = vld [vmem:[#allocation8_spill] sm:$0xff] }
 0x9f2   :  { %3599 = vrot.lane.b32.xlu2 %v8799_v33, %s5928_s2 }
 0x9f3   :  { %v5780_v63 = vpop.eup %5779 }
 0x9f4   :  { %v5782_v52 = vpop.eup %5781  ;;  %v3215_v40 = vpop.xlane.xlu2 %3214  ;;  %v3284_v61 = vmul.f32 %v5780_v63, %v7734_v47 }
 0x9f5   :  { %v3224_v2 = vpop.xlane.xlu0 %3223  ;;  %5785 = vrcp.f32 %v3215_v40  ;;  %v3290_v6 = vmul.f32 %v5782_v52, %v7739_v51  ;;  %v7835_v30 = vpop.eup %5783  ;;  %v8808_v40 = vld [vmem:[#allocation40_spill] sm:$0xff] }
 0x9f6   :  { %5787 = vrcp.f32 %v3224_v2  ;;  %5368 = vmatmul.msk.f32.gmra.mxu1 %vm796_vm2, %v3284_v61  ;;  %v3246_v4 = vsel %vm796_vm2, %v7835_v30, 0.0 }
 0x9f7   :  { %5374 = vmatmul.msk.f32.gmra.mxu0 %vm796_vm2, %v3290_v6  ;;  %5789 = vpow2.f32 %v3199_v57 }
 0x9f8   :  { %5791 = vpow2.f32 %v3197_v55  ;;  %v8809_v55 = vld [vmem:[#allocation33_spill] sm:$0xff] }
 0x9fa   :  { %3669 = vrot.lane.b32.xlu2 %v7654_v18, %s5929_s23 }
 0x9fb   :  { %v5786_v16 = vpop.eup %5785 }
 0x9fc   :  { %v5788_v11 = vpop.eup %5787  ;;  %v3277_v47 = vmul.f32 %v5786_v16, %v7747_v1  ;;  %v3245_v44 = vpop.xlane.xlu2 %3244 }
 0x9fd   :  { %5793 = vrcp.f32 %v3245_v44  ;;  %v3280_v51 = vmul.f32 %v5788_v11, %v7745_v54  ;;  %v7845_v12 = vpop.eup %5789  ;;  %v3257_v62 = vpop.xlane.xlu0 %3256 }
 0x9fe   :  { %5361 = vmatmul.msk.f32.vlgmr.msrb.gmra.mxu2 %vm796_vm2, %v3277_v47  ;;  %v7847_v18 = vpop.eup %5791  ;;  %v3240_v22 = vsel %vm796_vm2, %v7845_v12, 0.0 }
 0x9ff   :  { %5364 = vmatmul.msk.f32.gmra.mxu3 %vm796_vm2, %v3280_v51  ;;  %3247 = vadd.xlane.f32.xlu0 %v3246_v4  ;;  %v3237_v29 = vsel %vm796_vm2, %v7847_v18, 0.0  ;;  %v8811_v4 = vld [vmem:[#allocation39_spill] sm:$0xff] }
 0xa02   :  { %3613 = vrot.lane.b32.xlu2 %v8800_v45, %s5928_s2 }
 0xa03   :  { %v5794_v1 = vpop.eup %5793 }
 0xa04   :  { %v3287_v13 = vmul.f32 %v5794_v1, %v7756_v35  ;;  %v3218_v54 = vpop.xlane.xlu2 %3217 }
 0xa05   :  { %5795 = vrcp.f32 %v3218_v54  ;;  %3241 = vadd.xlane.f32.xlu1 %v3240_v22  ;;  %v3590_v43 = vpop.permute.xlu1 %3589 }
 0xa06   :  { %5797 = vrcp.f32 %v3257_v62  ;;  %v3765_v3 = vsel %vm499_vm1, %v8801_v41, %v3590_v43 }
 0xa07   :  { %5371 = vmatmul.msk.f32.vlgmr.msrb.gmra.mxu3 %vm796_vm2, %v3287_v13  ;;  %3238 = vadd.xlane.f32.xlu0 %v3237_v29 }
 0xa0b   :  { %v5796_v53 = vpop.eup %5795 }
 0xa0c   :  { %v5538_v48 = vpop.permute.xlu2 %5537  ;;  %v3278_v15 = vmul.f32 %v5796_v53, %v7764_v26  ;;  %v5798_v35 = vpop.eup %5797 }
 0xa0d   :  { %v5539_v34 = vunpack.i.l.bf16 %v5538_v48  ;;  %v3656_v8 = vpop.permute.xlu1 %3655  ;;  %v5540_v59 = vunpack.i.h.bf16 %v5538_v48  ;;  %v3291_v32 = vmul.f32 %v5798_v35, %v7758_v17 }
 0xa0e   :  { %5362 = vmatmul.msk.f32.gmra.mxu2 %vm796_vm2, %v3278_v15 }
 0xa0f   :  { %3564 = vmatpush.msra.mxu1 %v5539_v34  ;;  %v3654_v23 = vpop.permute.xlu0 %3653  ;;  %v3392_v58 = vpop.f32.mrf.mxu0 }
 0xa10   :  { %v7863_v21 = vsel %vm796_vm2, %v3765_v3, %v3654_v23 }
 0xa11   :  { %3565 = vmatpush.msra.mxu1 %v5540_v59 }
 0xa12   :  { %5375 = vmatmul.msk.f32.vlgmr.msra.gmra.mxu1 %vm796_vm2, %v3291_v32 }
 0xa15   :  { %v3658_v26 = vpop.permute.xlu1 %3657 }
 0xa17   :  { %v3592_v50 = vpop.permute.xlu0 %3591  ;;  %v3395_v49 = vpop.f32.mrf.mxu0 }
 0xa18   :  { %v3766_v42 = vsel %vm499_vm1, %v8802_v27, %v3592_v50  ;;  %v3357_v48 = vpop.f32.mrf.mxu3 }
 0xa19   :  { %v7869_v25 = vsel %vm796_vm2, %v3766_v42, %v3656_v8 }
 0xa1b   :  { %3667 = vrot.lane.b32.xlu0 %v7640_v37, %s5929_s23 }
 0xa1d   :  { %v3596_v9 = vpop.permute.xlu1 %3595 }
 0xa1e   :  { %3725 = vrot.lane.b32.xlu1 %v3392_v58, %s5930_s24  ;;  %v3768_v37 = vsel %vm499_vm1, %v8805_v24, %v3596_v9  ;;  %v8814_v24 = vld [vmem:[#allocation9_spill] sm:$0xff] }
 0xa1f   :  { %v3594_v17 = vpop.permute.xlu0 %3593 }
 0xa20   :  { %v3767_v31 = vsel %vm499_vm1, %v8803_v39, %v3594_v17 }
 0xa21   :  { %v7877_v14 = vsel %vm796_vm2, %v3767_v31, %v3658_v26  ;;  %v8813_v31 = vld [vmem:[#allocation36_spill] sm:$0xff] }
 0xa23   :  { %3605 = vrot.lane.b32.xlu0 %v8804_v20, %s5928_s2 }
 0xa25   :  { %v3666_v10 = vpop.permute.xlu1 %3665 }
 0xa26   :  { %3727 = vrot.lane.b32.xlu1 %v3395_v49, %s5930_s24 }
 0xa27   :  { %v3660_v0 = vpop.permute.xlu0 %3659 }
 0xa28   :  { %v7885_v38 = vsel %vm796_vm2, %v3768_v37, %v3660_v0 }
 0xa2b   :  { %3607 = vrot.lane.b32.xlu0 %v8806_v46, %s5928_s2 }
 0xa2d   :  { %v7889_v33 = vpop.permute.xlu1 %3671 }
 0xa2f   :  { %v7891_v63 = vpop.permute.xlu0 %3661 }
 0xa33   :  { %3609 = vrot.lane.b32.xlu0 %v8807_v60, %s5928_s2 }
 0xa35   :  { %v3612_v52 = vpop.permute.xlu1 %3611 }
 0xa36   :  { %v3776_v2 = vsel %vm499_vm1, %v8808_v40, %v3612_v52 }
 0xa37   :  { %v7895_v7 = vpop.permute.xlu0 %3663 }
 0xa3b   :  { %3673 = vrot.lane.b32.xlu0 %v7612_v5, %s5929_s23  ;;  %v8810_v5 = vld [vmem:[#allocation10_spill] sm:$0xff] }
 0xa3d   :  { %v3676_v61 = vpop.permute.xlu1 %3675 }
 0xa3e   :  { %v7902_v6 = vsel %vm796_vm2, %v3776_v2, %v3676_v61 }
 0xa3f   :  { %v3602_v57 = vpop.permute.xlu0 %3601 }
 0xa40   :  { %v3771_v16 = vsel %vm499_vm1, %v8809_v55, %v3602_v57  ;;  %v3427_v54 = vpop.f32.mrf.mxu1  ;;  %v8815_v55 = vld [vmem:[#allocation35_spill] sm:$0xff] }
 0xa41   :  { %v7907_v11 = vsel %vm796_vm2, %v3771_v16, %v3666_v10 }
 0xa43   :  { %3677 = vrot.lane.b32.xlu0 %v7609_v28, %s5929_s23 }
 0xa45   :  { %v3616_v47 = vpop.permute.xlu1 %3615  ;;  %v3260_v44 = vpop.xlane.xlu2 %3259 }
 0xa46   :  { %5799 = vrcp.f32 %v3260_v44  ;;  %v3778_v45 = vsel %vm499_vm1, %v8811_v4, %v3616_v47 }
 0xa47   :  { %v3604_v28 = vpop.permute.xlu0 %3603 }
 0xa4b   :  { %3617 = vrot.lane.b32.xlu0 %v8810_v5, %s5928_s2 }
 0xa4c   :  { %v5800_v51 = vpop.eup %5799 }
 0xa4d   :  { %v3680_v1 = vpop.permute.xlu1 %3679  ;;  %v3292_v13 = vmul.f32 %v5800_v51, %v7809_v36 }
 0xa4e   :  { %v7917_v62 = vsel %vm796_vm2, %v3778_v45, %v3680_v1 }
 0xa4f   :  { %5376 = vmatmul.msk.f32.gmra.mxu1 %vm796_vm2, %v3292_v13 }
 0xa53   :  { %3729 = vrot.lane.b32.xlu0 %v3427_v54, %s5930_s24 }
 0xa6b   :  { %v3532_v22 = vpop.f32.mrf.mxu0 }
 0xa6c   :  { %3741 = vrot.lane.b32.xlu2 %v3532_v22, %s5930_s24 }
 0xa72   :  { %v3248_v43 = vpop.xlane.xlu0 %3247 }
 0xa73   :  { %5801 = vrcp.f32 %v3248_v43  ;;  %v3430_v29 = vpop.f32.mrf.mxu1 }
 0xa74   :  { %v3535_v53 = vpop.f32.mrf.mxu0  ;;  %3731 = vrot.lane.b32.xlu0 %v3430_v29, %s5930_s24 }
 0xa75   :  { %3743 = vrot.lane.b32.xlu2 %v3535_v53, %s5930_s24 }
 0xa78   :  { %v3242_v34 = vpop.xlane.xlu1 %3241 }
 0xa79   :  { %v5802_v36 = vpop.eup %5801 }
 0xa7a   :  { %v3239_v15 = vpop.xlane.xlu0 %3238  ;;  %v3288_v35 = vmul.f32 %v5802_v36, %v7835_v30  ;;  %v8812_v30 = vld [vmem:[#allocation37_spill] sm:$0xff] }
 0xa7b   :  { %5803 = vrcp.f32 %v3239_v15  ;;  %v3772_v26 = vsel %vm499_vm1, %v8812_v30, %v3604_v28 }
 0xa7c   :  { %3721 = vrot.lane.b32.xlu0 %v3357_v48, %s5930_s24  ;;  %5372 = vmatmul.msk.f32.gmra.mxu3 %vm796_vm2, %v3288_v35  ;;  %5805 = vrcp.f32 %v3242_v34  ;;  %v8816_v34 = vld [vmem:[#allocation31_spill] sm:$0xff] }
 0xa81   :  { %v5804_v8 = vpop.eup %5803  ;;  %v3322_v23 = vpop.f32.mrf.mxu2 }
 0xa82   :  { %v3285_v41 = vmul.f32 %v5804_v8, %v7847_v18  ;;  %v3360_v3 = vpop.f32.mrf.mxu3  ;;  %v5806_v59 = vpop.eup %5805 }
 0xa83   :  { %3723 = vrot.lane.b32.xlu1 %v3360_v3, %s5930_s24  ;;  %v3286_v32 = vmul.f32 %v5806_v59, %v7845_v12  ;;  %v3598_v12 = vpop.permute.xlu2 %3597 }
 0xa84   :  { %5369 = vmatmul.msk.f32.vlgmr.msra.gmra.mxu2 %vm796_vm2, %v3285_v41  ;;  %v3769_v37 = vsel %vm499_vm1, %v8814_v24, %v3598_v12  ;;  %v8818_v24 = vld [vmem:[#allocation34_spill] sm:$0xff] }
 0xa85   :  { %v3785_v52 = vsel %vm796_vm2, %v3769_v37, %v7891_v63 }
 0xa8a   :  { %v3497_v42 = vpop.f32.mrf.mxu3 }
 0xa8b   :  { %3717 = vrot.lane.b32.xlu1 %v3322_v23, %s5930_s24  ;;  %v3600_v39 = vpop.permute.xlu2 %3599 }
 0xa8c   :  { %5370 = vmatmul.msk.f32.gmra.mxu2 %vm796_vm2, %v3286_v32  ;;  %v3770_v8 = vsel %vm499_vm1, %v8816_v34, %v3600_v39  ;;  %v5931_v32 = vmov 32.0  }
 0xa8d   :  { %v3668_v50 = vpop.permute.xlu0 %3667  ;;  %v3786_v41 = vsel %vm796_vm2, %v3770_v8, %v7895_v7  ;;  %5807 = vrcp.f32 %v5931_v32 }
 0xa8e   :  { %v3788_v27 = vsel %vm796_vm2, %v3772_v26, %v3668_v50 }
 0xa8f   :  { %v3567_v23 = vpop.f32.mrf.mxu1 }
 0xa90   :  { %v3726_v46 = vpop.permute.xlu1 %3725 }
 0xa91   :  { %v3325_v18 = vpop.f32.mrf.mxu2  ;;  %v7954_v40 = vsel %vm3797_vm3, %v3785_v52, %v3726_v46 }
 0xa92   :  { %3719 = vrot.lane.b32.xlu2 %v3325_v18, %s5930_s24  ;;  %v3826_v2 = vsel %vm245_vm0, %v7954_v40, 0.0 }
 0xa93   :  { %3737 = vrot.lane.b32.xlu1 %v3497_v42, %s5930_s24  ;;  %v7949_v0 = vpop.permute.xlu2 %3669  ;;  %v5808_v30 = vpop.eup %5807 }
 0xa94   :  { %v3863_v7 = vmul.f32 32.0, %v5808_v30  ;;  %vm3867_vm4 = vweird.f32 %v5808_v30 }
 0xa95   :  { %v7938_v58 = vpop.permute.xlu0 %3605 }
 0xa96   :  { %v3864_v50 = vsub.f32 1.0, %v3863_v7  ;;  %v3773_v37 = vsel %vm499_vm1, %v8818_v24, %v7938_v58  ;;  %v8820_v7 = vld [vmem:[#allocation41_spill] sm:$0xff] }
 0xa97   :  { %v3789_v52 = vsel %vm796_vm2, %v3773_v37, %v7949_v0 }
 0xa98   :  { %v3728_v54 = vpop.permute.xlu1 %3727  ;;  %v3865_v18 = vmul.f32 %v5808_v30, %v3864_v50 }
 0xa99   :  { %v3803_v3 = vsel %vm3797_vm3, %v3786_v41, %v3728_v54 }
 0xa9a   :  { %v3866_v42 = vadd.f32 %v5808_v30, %v3865_v18 }
 0xa9b   :  { %v3614_v57 = vpop.permute.xlu2 %3613 }
 0xa9c   :  { %v3777_v16 = vsel %vm499_vm1, %v8815_v55, %v3614_v57  ;;  %v8819_v55 = vld [vmem:[#allocation38_spill] sm:$0xff] }
 0xa9d   :  { %v7940_v9 = vpop.permute.xlu0 %3607 }
 0xa9e   :  { %v3774_v58 = vsel %vm499_vm1, %v8819_v55, %v7940_v9 }
 0xaa5   :  { %v3610_v17 = vpop.permute.xlu0 %3609 }
 0xaa6   :  { %v3775_v20 = vsel %vm499_vm1, %v8813_v31, %v3610_v17  ;;  %v8007_v17 = vsel %vm3867_vm4, %v5808_v30, %v3866_v42 }
 0xaad   :  { %v3674_v49 = vpop.permute.xlu0 %3673 }
 0xaae   :  { %v7945_v10 = vsel %vm796_vm2, %v3775_v20, %v3674_v49 }
 0xab5   :  { %v3678_v60 = vpop.permute.xlu0 %3677 }
 0xab6   :  { %v3793_v44 = vsel %vm796_vm2, %v3777_v16, %v3678_v60 }
 0xabb   :  { %3827 = vadd.xlane.f32.xlu2 %v3826_v2 }
 0xabd   :  { %v7958_v61 = vpop.permute.xlu0 %3617 }
 0xabe   :  { %v3779_v50 = vsel %vm499_vm1, %v8820_v7, %v7958_v61 }
 0xac5   :  { %v3730_v47 = vpop.permute.xlu0 %3729 }
 0xac6   :  { %v7965_v5 = vsel %vm3797_vm3, %v7907_v11, %v3730_v47  ;;  %v3742_v63 = vpop.permute.xlu2 %3741  ;;  %v3790_v47 = vsel %vm796_vm2, %v3774_v58, %v7889_v33 }
 0xac7   :  { %v7968_v51 = vsel %vm3797_vm3, %v3793_v44, %v3742_v63 }
 0xacf   :  { %v3744_v4 = vpop.permute.xlu2 %3743 }
 0xad0   :  { %v7972_v45 = vsel %vm3797_vm3, %v7917_v62, %v3744_v4 }
 0xae6   :  { %v3732_v1 = vpop.permute.xlu0 %3731 }
 0xae7   :  { %v7975_v13 = vsel %vm3797_vm3, %v3788_v27, %v3732_v1 }
 0xae8   :  { %v3835_v59 = vsel %vm245_vm0, %v7975_v13, 0.0 }
 0xaec   :  { %v3720_v26 = vpop.permute.xlu2 %3719 }
 0xaed   :  { %v8012_v31 = vsel %vm3797_vm3, %v7869_v25, %v3720_v26 }
 0xaee   :  { %v3722_v28 = vpop.permute.xlu0 %3721  ;;  %v3817_v49 = vsel %vm245_vm0, %v8012_v31, 0.0 }
 0xaef   :  { %v3800_v22 = vsel %vm3797_vm3, %v7877_v14, %v3722_v28 }
 0xaf0   :  { %v3820_v11 = vsel %vm245_vm0, %v3800_v22, 0.0 }
 0xaf1   :  { %3821 = vadd.xlane.f32.xlu2 %v3820_v11 }
 0xaf5   :  { %v3724_v43 = vpop.permute.xlu1 %3723 }
 0xaf6   :  { %v3801_v15 = vsel %vm3797_vm3, %v7885_v38, %v3724_v43  ;;  %v8817_v38 = vld [vmem:[#allocation2_spill] sm:$0xff] }
 0xaf7   :  { %v3823_v35 = vsel %vm245_vm0, %v3801_v15, 0.0 }
 0xafd   :  { %v3718_v29 = vpop.permute.xlu1 %3717 }
 0xafe   :  { %v7982_v53 = vsel %vm3797_vm3, %v7863_v21, %v3718_v29  ;;  %v3832_v21 = vsel %vm245_vm0, %v7965_v5, 0.0 }
 0xaff   :  { %v3500_v62 = vpop.f32.mrf.mxu3  ;;  %v3814_v36 = vsel %vm245_vm0, %v7982_v53, 0.0 }
 0xb00   :  { %3815 = vadd.xlane.f32.xlu2 %v3814_v36  ;;  %3739 = vrot.lane.b32.xlu1 %v3500_v62, %s5930_s24 }
 0xb05   :  { %v3738_v63 = vpop.permute.xlu1 %3737 }
 0xb06   :  { %v8043_v4 = vsel %vm3797_vm3, %v7945_v10, %v3738_v63 }
 0xb07   :  { %v3462_v48 = vpop.f32.mrf.mxu2  ;;  %v3844_v9 = vsel %vm245_vm0, %v8043_v4, 0.0 }
 0xb08   :  { %3733 = vrot.lane.b32.xlu0 %v3462_v48, %s5930_s24 }
 0xb0f   :  { %v3465_v14 = vpop.f32.mrf.mxu2 }
 0xb10   :  { %3735 = vrot.lane.b32.xlu0 %v3465_v14, %s5930_s24 }
 0xb18   :  { %3681 = vrot.lane.b32.xlu2 %v7642_v19, %s5929_s23  ;;  %v3829_v19 = vsel %vm245_vm0, %v3803_v3, 0.0 }
 0xb2a   :  { %3833 = vadd.xlane.f32.xlu1 %v3832_v21 }
 0xb2e   :  { %v3828_v27 = vpop.xlane.xlu2 %3827 }
 0xb32   :  { %3824 = vadd.xlane.f32.xlu1 %v3823_v35 }
 0xb3a   :  { %3830 = vadd.xlane.f32.xlu0 %v3829_v19 }
 0xb42   :  { %3836 = vadd.xlane.f32.xlu0 %v3835_v59 }
 0xb4b   :  { %3619 = vrot.lane.b32.xlu1 %v8817_v38, %s5928_s2 }
 0xb56   :  { %3745 = vrot.lane.b32.xlu0 %v3567_v23, %s5930_s24  ;;  %v3853_v23 = vsel %vm245_vm0, %v7972_v45, 0.0 }
 0xb64   :  { %v3822_v12 = vpop.xlane.xlu2 %3821 }
 0xb65   :  { %v3871_v39 = vmul.f32 %v8007_v17, %v3822_v12 }
 0xb67   :  { %v8014_v20 = vsub.f32 %v3800_v22, %v3871_v39 }
 0xb69   :  { %v3903_v46 = vmul.f32 %v8014_v20, %v8014_v20 }
 0xb6b   :  { %v3923_v2 = vsel %vm245_vm0, %v3903_v46, 0.0 }
 0xb72   :  { %v3740_v1 = vpop.permute.xlu1 %3739 }
 0xb73   :  { %v3816_v54 = vpop.xlane.xlu2 %3815  ;;  %v8076_v8 = vsel %vm3797_vm3, %v7902_v6, %v3740_v1  ;;  %v3850_v6 = vsel %vm245_vm0, %v7968_v51, 0.0 }
 0xb74   :  { %v3869_v11 = vmul.f32 %v8007_v17, %v3816_v54  ;;  %v4210_v54 = vld [vmem:[%s8651_s6 + $0x18] sm:$0xff] }
 0xb75   :  { %3818 = vadd.xlane.f32.xlu1 %v3817_v49  ;;  %4272 = vmatpush.msrb.mxu2 %v4210_v54 }
 0xb76   :  { %v8058_v29 = vsub.f32 %v7982_v53, %v3869_v11 }
 0xb78   :  { %v3901_v14 = vmul.f32 %v8058_v29, %v8058_v29 }
 0xb7a   :  { %v3734_v60 = vpop.permute.xlu0 %3733  ;;  %v3917_v35 = vsel %vm245_vm0, %v3901_v14, 0.0 }
 0xb7b   :  { %v8026_v25 = vsel %vm3797_vm3, %v3789_v52, %v3734_v60  ;;  %v3682_v32 = vpop.permute.xlu2 %3681 }
 0xb7c   :  { %v3838_v57 = vsel %vm245_vm0, %v8026_v25, 0.0 }
 0xb7d   :  { %3924 = vadd.xlane.f32.xlu1 %v3923_v2 }
 0xb80   :  { %3839 = vadd.xlane.f32.xlu0 %v3838_v57 }
 0xb82   :  { %v3736_v16 = vpop.permute.xlu0 %3735 }
 0xb83   :  { %v8037_v0 = vsel %vm3797_vm3, %v3790_v47, %v3736_v16 }
 0xb84   :  { %v3841_v44 = vsel %vm245_vm0, %v8037_v0, 0.0 }
 0xb88   :  { %3842 = vadd.xlane.f32.xlu0 %v3841_v44 }
 0xb90   :  { %3845 = vadd.xlane.f32.xlu0 %v3844_v9  ;;  %v3570_v9 = vpop.f32.mrf.mxu1 }
 0xb96   :  { %3683 = vrot.lane.b32.xlu1 %v7644_v56, %s5929_s23 }
 0xb9d   :  { %v8049_v33 = vpop.xlane.xlu1 %3833 }
 0xba5   :  { %v3825_v28 = vpop.xlane.xlu1 %3824 }
 0xba6   :  { %v3872_v22 = vmul.f32 %v8007_v17, %v3825_v28 }
 0xba8   :  { %v8053_v43 = vsub.f32 %v3801_v15, %v3872_v22  ;;  %v3873_v15 = vmul.f32 %v8007_v17, %v3828_v27  ;;  %v4208_v22 = vld [vmem:[%s8651_s6 + $0x8] sm:$0xff] }
 0xbaa   :  { %v3904_v10 = vmul.f32 %v8053_v43, %v8053_v43  ;;  %v8072_v34 = vsub.f32 %v7954_v40, %v3873_v15 }
 0xbac   :  { %v3926_v62 = vsel %vm245_vm0, %v3904_v10, 0.0  ;;  %v3905_v41 = vmul.f32 %v8072_v34, %v8072_v34  ;;  %v3875_v10 = vmul.f32 %v8007_v17, %v8049_v33 }
 0xbad   :  { %3927 = vadd.xlane.f32.xlu2 %v3926_v62  ;;  %v3831_v56 = vpop.xlane.xlu0 %3830  ;;  %v4207_v62 = vld [vmem:[%s8651_s6] sm:$0xff] }
 0xbae   :  { %v3874_v36 = vmul.f32 %v8007_v17, %v3831_v56  ;;  %v3929_v59 = vsel %vm245_vm0, %v3905_v41, 0.0  ;;  %v8149_v56 = vsub.f32 %v7965_v5, %v3875_v10 }
 0xbb0   :  { %v8062_v48 = vsub.f32 %v3803_v3, %v3874_v36  ;;  %v3847_v3 = vsel %vm245_vm0, %v8076_v8, 0.0 }
 0xbb2   :  { %v3906_v21 = vmul.f32 %v8062_v48, %v8062_v48 }
 0xbb4   :  { %v3932_v53 = vsel %vm245_vm0, %v3906_v21, 0.0 }
 0xbb5   :  { %3918 = vadd.xlane.f32.xlu2 %v3917_v35  ;;  %3933 = vadd.xlane.f32.xlu0 %v3932_v53  ;;  %v3837_v19 = vpop.xlane.xlu0 %3836  ;;  %v3907_v53 = vmul.f32 %v8149_v56, %v8149_v56 }
 0xbb6   :  { %v3876_v38 = vmul.f32 %v8007_v17, %v3837_v19 }
 0xbb7   :  { %v3935_v41 = vsel %vm245_vm0, %v3907_v53, 0.0 }
 0xbb8   :  { %v8085_v40 = vsub.f32 %v7975_v13, %v3876_v38  ;;  %v3795_v13 = vsel %vm796_vm2, %v3779_v50, %v3682_v32 }
 0xbba   :  { %v3908_v30 = vmul.f32 %v8085_v40, %v8085_v40 }
 0xbbc   :  { %v3938_v18 = vsel %vm245_vm0, %v3908_v30, 0.0 }
 0xbbd   :  { %3848 = vadd.xlane.f32.xlu0 %v3847_v3  ;;  %v8103_v12 = vpop.permute.xlu1 %3619 }
 0xbc0   :  { %3930 = vadd.xlane.f32.xlu1 %v3929_v59 }
 0xbc5   :  { %3851 = vadd.xlane.f32.xlu0 %v3850_v6 }
 0xbc8   :  { %3854 = vadd.xlane.f32.xlu1 %v3853_v23  ;;  %v3746_v26 = vpop.permute.xlu0 %3745 }
 0xbc9   :  { %v8098_v27 = vsel %vm3797_vm3, %v3795_v13, %v3746_v26 }
 0xbca   :  { %v3856_v42 = vsel %vm245_vm0, %v8098_v27, 0.0 }
 0xbcd   :  { %3939 = vadd.xlane.f32.xlu0 %v3938_v18 }
 0xbd0   :  { %3857 = vadd.xlane.f32.xlu1 %v3856_v42  ;;  %v8171_v42 = vld [vmem:[%s8648_s5 + $0x3] ss:$0 sm:$0xff] }
 0xbe8   :  { %v3819_v39 = vpop.xlane.xlu1 %3818 }
 0xbe9   :  { %v3870_v49 = vmul.f32 %v8007_v17, %v3819_v39 }
 0xbeb   :  { %v8107_v24 = vsub.f32 %v8012_v31, %v3870_v49 }
 0xbed   :  { %v3902_v61 = vmul.f32 %v8107_v24, %v8107_v24 }
 0xbef   :  { %v3920_v37 = vsel %vm245_vm0, %v3902_v61, 0.0  ;;  %v8179_v61 = vld [vmem:[%s8648_s5 + $0x4] ss:$0 sm:$0xff] }
 0xbf0   :  { %3921 = vadd.xlane.f32.xlu2 %v3920_v37  ;;  %v3925_v11 = vpop.xlane.xlu1 %3924 }
 0xbf3   :  { %v3840_v46 = vpop.xlane.xlu0 %3839 }
 0xbf4   :  { %v3877_v60 = vmul.f32 %v8007_v17, %v3840_v46 }
 0xbf6   :  { %v8114_v52 = vsub.f32 %v8026_v25, %v3877_v60 }
 0xbf8   :  { %v3909_v2 = vmul.f32 %v8114_v52, %v8114_v52 }
 0xbfa   :  { %v3941_v57 = vsel %vm245_vm0, %v3909_v2, 0.0 }
 0xbfb   :  { %3942 = vadd.xlane.f32.xlu0 %v3941_v57  ;;  %v3843_v31 = vpop.xlane.xlu0 %3842 }
 0xbfc   :  { %v3878_v55 = vmul.f32 %v8007_v17, %v3843_v31 }
 0xbfe   :  { %v8121_v58 = vsub.f32 %v8037_v0, %v3878_v55  ;;  %v3967_v55 = vmul.f32 %v3925_v11, %v8007_v17  ;;  %v8821_v11 = vld [vmem:[#allocation42_spill] sm:$0xff] }
 0xc00   :  { %v3910_v16 = vmul.f32 %v8121_v58, %v8121_v58 }
 0xc02   :  { %v3944_v47 = vsel %vm245_vm0, %v3910_v16, 0.0  ;;  %v3983_v16 = vadd.f32 1e-05, %v3967_v55 }
 0xc03   :  { %3945 = vadd.xlane.f32.xlu0 %v3944_v47  ;;  %v3846_v25 = vpop.xlane.xlu0 %3845 }
 0xc04   :  { %v3879_v44 = vmul.f32 %v8007_v17, %v3846_v25  ;;  %vm4023_vm12 = vweird.f32 %v3983_v16 }
 0xc06   :  { %v8128_v63 = vsub.f32 %v8043_v4, %v3879_v44  ;;  %v4209_v4 = vld [vmem:[%s8651_s6 + $0x10] sm:$0xff] }
 0xc07   :  { %4273 = vmatpush.msrb.mxu2 %v4209_v4 }
 0xc08   :  { %3747 = vrot.lane.b32.xlu2 %v3570_v9, %s5930_s24  ;;  %v3911_v1 = vmul.f32 %v8128_v63, %v8128_v63  ;;  %v3684_v15 = vpop.permute.xlu1 %3683 }
 0xc09   :  { %4274 = vmatpush.msrb.mxu2 %v4208_v22 }
 0xc0a   :  { %v3947_v0 = vsel %vm245_vm0, %v3911_v1, 0.0 }
 0xc0b   :  { %3948 = vadd.xlane.f32.xlu0 %v3947_v0  ;;  %4275 = vmatpush.msrb.mxu2 %v4207_v62 }
 0xc20   :  { %v3928_v28 = vpop.xlane.xlu2 %3927 }
 0xc21   :  { %v3968_v47 = vmul.f32 %v3928_v28, %v8007_v17  ;;  %v3780_v28 = vsel %vm499_vm1, %v8821_v11, %v8103_v12 }
 0xc23   :  { %v8197_v25 = vadd.f32 1e-05, %v3968_v47 }
 0xc25   :  { %vm4033_vm15 = vweird.f32 %v8197_v25 }
 0xc28   :  { %v3919_v36 = vpop.xlane.xlu2 %3918  ;;  %v8151_v14 = vpop.xlane.xlu0 %3933 }
 0xc29   :  { %v3965_v21 = vmul.f32 %v3919_v36, %v8007_v17  ;;  %v3796_v36 = vsel %vm796_vm2, %v3780_v28, %v3684_v15  ;;  %v3970_v12 = vmul.f32 %v8151_v14, %v8007_v17 }
 0xc2b   :  { %v3981_v35 = vadd.f32 1e-05, %v3965_v21 }
 0xc2d   :  { %5809 = vrsqrt.f32 %v3981_v35  ;;  %vm4003_vm6 = vweird.f32 %v3981_v35 }
 0xc2e   :  { %5811 = vrsqrt.f32 %v3983_v16 }
 0xc2f   :  { %5813 = vrsqrt.f32 %v8197_v25 }
 0xc30   :  { %v3849_v33 = vpop.xlane.xlu0 %3848 }
 0xc31   :  { %v3880_v3 = vmul.f32 %v8007_v17, %v3849_v33  ;;  %3936 = vadd.xlane.f32.xlu2 %v3935_v41 }
 0xc33   :  { %v5810_v19 = vpop.eup %5809  ;;  %v8159_v5 = vsub.f32 %v8076_v8, %v3880_v3  ;;  %v3931_v59 = vpop.xlane.xlu1 %3930 }
 0xc34   :  { %v3998_v38 = vmul.f32 %v5810_v19, %v3981_v35  ;;  %vm4004_vm5 = vweird.f32 %v5810_v19  ;;  %v5812_v44 = vpop.eup %5811  ;;  %v3969_v0 = vmul.f32 %v3931_v59, %v8007_v17 }
 0xc35   :  { %v3912_v6 = vmul.f32 %v8159_v5, %v8159_v5  ;;  %vm4005_vm7 = vmor %vm4003_vm6, %vm4004_vm5  ;;  %v5814_v35 = vpop.eup %5813  ;;  %vm4024_vm9 = vweird.f32 %v5812_v44 }
 0xc36   :  { %v3999_v23 = vmul.f32 %v5810_v19, %v3998_v38  ;;  %v3985_v62 = vadd.f32 1e-05, %v3969_v0  ;;  %v4028_v15 = vmul.f32 %v5814_v35, %v8197_v25  ;;  %vm4025_vm13 = vmor %vm4023_vm12, %vm4024_vm9  ;;  %vm4034_vm14 = vweird.f32 %v5814_v35 }
 0xc37   :  { %v3950_v32 = vsel %vm245_vm0, %v3912_v6, 0.0  ;;  %vm4035_vm1 = vmor %vm4033_vm15, %vm4034_vm14 }
 0xc38   :  { %v4000_v30 = vmul.f32 0.5, %v3999_v23  ;;  %v3852_v54 = vpop.xlane.xlu0 %3851  ;;  %vm4043_vm4 = vweird.f32 %v3985_v62 }
 0xc39   :  { %3951 = vadd.xlane.f32.xlu2 %v3950_v32  ;;  %v3881_v22 = vmul.f32 %v8007_v17, %v3852_v54  ;;  %v4029_v32 = vmul.f32 %v5814_v35, %v4028_v15 }
 0xc3a   :  { %v4001_v26 = vsub.f32 1.5, %v4000_v30 }
 0xc3b   :  { %v3855_v7 = vpop.xlane.xlu1 %3854  ;;  %v8211_v33 = vsub.f32 %v7968_v51, %v3881_v22  ;;  %v3986_v51 = vadd.f32 1e-05, %v3970_v12  ;;  %v4030_v14 = vmul.f32 0.5, %v4029_v32 }
 0xc3c   :  { %v4002_v50 = vmul.f32 %v5810_v19, %v4001_v26  ;;  %v3882_v13 = vmul.f32 %v8007_v17, %v3855_v7 }
 0xc3d   :  { %v3913_v6 = vmul.f32 %v8211_v33, %v8211_v33 }
 0xc3e   :  { %v4006_v8 = vsel %vm4005_vm7, %v5810_v19, %v4002_v50  ;;  %v8166_v18 = vsub.f32 %v7972_v45, %v3882_v13  ;;  %vm4053_vm7 = vweird.f32 %v3986_v51 }
 0xc3f   :  { %v4157_v39 = vmul.f32 %v4006_v8, %v8058_v29  ;;  %v3953_v50 = vsel %vm245_vm0, %v3913_v6, 0.0 }
 0xc40   :  { %v3914_v49 = vmul.f32 %v8166_v18, %v8166_v18 }
 0xc41   :  { %v4174_v37 = vmul.f32 %v8171_v42, %v4157_v39 }
 0xc42   :  { %v3956_v45 = vsel %vm245_vm0, %v3914_v49, 0.0 }
 0xc43   :  { %v8184_v46 = vadd.f32 %v8179_v61, %v4174_v37  ;;  %v3858_v60 = vpop.xlane.xlu1 %3857  ;;  %3957 = vadd.xlane.f32.xlu0 %v3956_v45 }
 0xc44   :  { %v3883_v2 = vmul.f32 %v8007_v17, %v3858_v60  ;;  %v4031_v60 = vsub.f32 1.5, %v4030_v14 }
 0xc45   :  { %5377 = vmatmul.msk.f32.vlgmr.msrb.gmra.mxu2 %vm245_vm0, %v8184_v46 }
 0xc46   :  { %v8190_v29 = vsub.f32 %v8098_v27, %v3883_v2  ;;  %v4018_v27 = vmul.f32 %v5812_v44, %v3983_v16 }
 0xc48   :  { %v3915_v57 = vmul.f32 %v8190_v29, %v8190_v29  ;;  %v4019_v10 = vmul.f32 %v5812_v44, %v4018_v27 }
 0xc4a   :  { %v3959_v31 = vsel %vm245_vm0, %v3915_v57, 0.0  ;;  %v4020_v19 = vmul.f32 0.5, %v4019_v10 }
 0xc4b   :  { %3960 = vadd.xlane.f32.xlu2 %v3959_v31 }
 0xc4c   :  { %v4021_v23 = vsub.f32 1.5, %v4020_v19 }
 0xc4e   :  { %v4022_v13 = vmul.f32 %v5812_v44, %v4021_v23 }
 0xc50   :  { %v4026_v45 = vsel %vm4025_vm13, %v5812_v44, %v4022_v13 }
 0xc51   :  { %v4159_v55 = vmul.f32 %v4026_v45, %v8014_v20 }
 0xc63   :  { %v3922_v9 = vpop.xlane.xlu2 %3921 }
 0xc64   :  { %v3966_v1 = vmul.f32 %v3922_v9, %v8007_v17  ;;  %v4032_v9 = vmul.f32 %v5814_v35, %v4031_v60 }
 0xc66   :  { %v3982_v4 = vadd.f32 1e-05, %v3966_v1  ;;  %v4036_v16 = vsel %vm4035_vm1, %v5814_v35, %v4032_v9 }
 0xc67   :  { %v4160_v20 = vmul.f32 %v4036_v16, %v8053_v43 }
 0xc68   :  { %5815 = vrsqrt.f32 %v3982_v4  ;;  %vm4013_vm10 = vweird.f32 %v3982_v4 }
 0xc69   :  { %5817 = vrsqrt.f32 %v3985_v62  ;;  %v4177_v25 = vmul.f32 %v8171_v42, %v4160_v20 }
 0xc6a   :  { %5819 = vrsqrt.f32 %v3986_v51 }
 0xc6b   :  { %v3748_v21 = vpop.permute.xlu2 %3747 }
 0xc6c   :  { %v8208_v53 = vsel %vm3797_vm3, %v3796_v36, %v3748_v21  ;;  %v8240_v36 = vadd.f32 %v8179_v61, %v4177_v25  ;;  %v3940_v21 = vpop.xlane.xlu0 %3939 }
 0xc6d   :  { %v3859_v41 = vsel %vm245_vm0, %v8208_v53, 0.0 }
 0xc6e   :  { %v5816_v3 = vpop.eup %5815  ;;  %3860 = vadd.xlane.f32.xlu1 %v3859_v41 }
 0xc6f   :  { %v4008_v59 = vmul.f32 %v5816_v3, %v3982_v4  ;;  %v5818_v26 = vpop.eup %5817  ;;  %vm4014_vm8 = vweird.f32 %v5816_v3 }
 0xc70   :  { %v4038_v8 = vmul.f32 %v5818_v26, %v3985_v62  ;;  %vm4015_vm11 = vmor %vm4013_vm10, %vm4014_vm8  ;;  %v5820_v57 = vpop.eup %5819  ;;  %vm4044_vm3 = vweird.f32 %v5818_v26 }
 0xc71   :  { %v4009_v38 = vmul.f32 %v5816_v3, %v4008_v59  ;;  %v4048_v1 = vmul.f32 %v5820_v57, %v3986_v51  ;;  %vm4045_vm5 = vmor %vm4043_vm4, %vm4044_vm3  ;;  %vm4054_vm6 = vweird.f32 %v5820_v57 }
 0xc72   :  { %v4039_v2 = vmul.f32 %v5818_v26, %v4038_v8  ;;  %vm4055_vm8 = vmor %vm4053_vm7, %vm4054_vm6 }
 0xc73   :  { %v4010_v30 = vmul.f32 0.5, %v4009_v38  ;;  %v4049_v44 = vmul.f32 %v5820_v57, %v4048_v1 }
 0xc74   :  { %v4040_v27 = vmul.f32 0.5, %v4039_v2  ;;  %v3943_v19 = vpop.xlane.xlu0 %3942 }
 0xc75   :  { %v4011_v7 = vsub.f32 1.5, %v4010_v30  ;;  %v4050_v4 = vmul.f32 0.5, %v4049_v44  ;;  %v3973_v38 = vmul.f32 %v3943_v19, %v8007_v17 }
 0xc76   :  { %3954 = vadd.xlane.f32.xlu1 %v3953_v50  ;;  %v4041_v0 = vsub.f32 1.5, %v4040_v27 }
 0xc77   :  { %v4012_v39 = vmul.f32 %v5816_v3, %v4011_v7  ;;  %v4051_v11 = vsub.f32 1.5, %v4050_v4  ;;  %v3989_v6 = vadd.f32 1e-05, %v3973_v38 }
 0xc78   :  { %v4042_v22 = vmul.f32 %v5818_v26, %v4041_v0 }
 0xc79   :  { %v4016_v49 = vsel %vm4015_vm11, %v5816_v3, %v4012_v39  ;;  %v4052_v43 = vmul.f32 %v5820_v57, %v4051_v11  ;;  %v3972_v3 = vmul.f32 %v3940_v21, %v8007_v17  ;;  %vm4083_vm1 = vweird.f32 %v3989_v6 }
 0xc7a   :  { %v4158_v37 = vmul.f32 %v4016_v49, %v8107_v24  ;;  %v4176_v24 = vmul.f32 %v8171_v42, %v4159_v55  ;;  %v4046_v28 = vsel %vm4045_vm5, %v5818_v26, %v4042_v22 }
 0xc7b   :  { %v4161_v10 = vmul.f32 %v4046_v28, %v8072_v34  ;;  %v4056_v35 = vsel %vm4055_vm8, %v5820_v57, %v4052_v43  ;;  %v3988_v12 = vadd.f32 1e-05, %v3972_v3 }
 0xc7c   :  { %v4175_v31 = vmul.f32 %v8171_v42, %v4158_v37  ;;  %v8233_v54 = vadd.f32 %v8179_v61, %v4176_v24  ;;  %v4162_v41 = vmul.f32 %v4056_v35, %v8062_v48  ;;  %v3946_v48 = vpop.xlane.xlu0 %3945 }
 0xc7d   :  { %v4178_v62 = vmul.f32 %v8171_v42, %v4161_v10  ;;  %5821 = vrsqrt.f32 %v3988_v12  ;;  %v3974_v26 = vmul.f32 %v3946_v48, %v8007_v17  ;;  %vm4073_vm13 = vweird.f32 %v3988_v12 }
 0xc7e   :  { %v8225_v47 = vadd.f32 %v8179_v61, %v4175_v31  ;;  %v4179_v15 = vmul.f32 %v8171_v42, %v4162_v41  ;;  %5823 = vrsqrt.f32 %v3989_v6 }
 0xc7f   :  { %v8248_v34 = vadd.f32 %v8179_v61, %v4178_v62  ;;  %v8261_v13 = vadd.f32 1e-05, %v3974_v26 }
 0xc80   :  { %5378 = vmatmul.msk.f32.gmra.mxu2 %vm245_vm0, %v8225_v47  ;;  %v8254_v59 = vadd.f32 %v8179_v61, %v4179_v15 }
 0xc81   :  { %vm4093_vm5 = vweird.f32 %v8261_v13 }
 0xc83   :  { %v5822_v23 = vpop.eup %5821 }
 0xc84   :  { %v4068_v30 = vmul.f32 %v5822_v23, %v3988_v12  ;;  %v3949_v14 = vpop.xlane.xlu0 %3948  ;;  %v5824_v8 = vpop.eup %5823  ;;  %vm4074_vm10 = vweird.f32 %v5822_v23 }
 0xc85   :  { %v3975_v37 = vmul.f32 %v3949_v14, %v8007_v17  ;;  %v4078_v45 = vmul.f32 %v5824_v8, %v3989_v6  ;;  %vm4075_vm14 = vmor %vm4073_vm13, %vm4074_vm10  ;;  %vm4084_vm15 = vweird.f32 %v5824_v8 }
 0xc86   :  { %v4069_v50 = vmul.f32 %v5822_v23, %v4068_v30  ;;  %vm4085_vm3 = vmor %vm4083_vm1, %vm4084_vm15 }
 0xc87   :  { %v8265_v31 = vadd.f32 1e-05, %v3975_v37  ;;  %v4079_v55 = vmul.f32 %v5824_v8, %v4078_v45 }
 0xc88   :  { %5379 = vmatmul.msk.f32.gmra.mxu2 %vm245_vm0, %v8233_v54  ;;  %v4070_v49 = vmul.f32 0.5, %v4069_v50 }
 0xc89   :  { %v4080_v0 = vmul.f32 0.5, %v4079_v55  ;;  %vm4103_vm8 = vweird.f32 %v8265_v31 }
 0xc8a   :  { %v4071_v57 = vsub.f32 1.5, %v4070_v49  ;;  %v8297_v49 = vld [vmem:[%s8652_s7 + $0x1] ss:$0 sm:$0xff] }
 0xc8b   :  { %v4081_v10 = vsub.f32 1.5, %v4080_v0 }
 0xc8c   :  { %v4072_v16 = vmul.f32 %v5822_v23, %v4071_v57 }
 0xc8d   :  { %v4082_v3 = vmul.f32 %v5824_v8, %v4081_v10 }
 0xc8e   :  { %v4076_v28 = vsel %vm4075_vm14, %v5822_v23, %v4072_v16  ;;  %v8283_v23 = vld [vmem:[%s8652_s7] ss:$0 sm:$0xff] }
 0xc8f   :  { %v4164_v35 = vmul.f32 %v4076_v28, %v8085_v40  ;;  %v4086_v15 = vsel %vm4085_vm3, %v5824_v8, %v4082_v3 }
 0xc90   :  { %5380 = vmatmul.msk.f32.gmra.mxu2 %vm245_vm0, %v8240_v36 }
 0xc98   :  { %5381 = vmatmul.msk.f32.gmra.mxu2 %vm245_vm0, %v8248_v34 }
 0xca0   :  { %5382 = vmatmul.msk.f32.gmra.mxu2 %vm245_vm0, %v8254_v59 }
 0xca4   :  { %v3937_v51 = vpop.xlane.xlu2 %3936 }
 0xca5   :  { %v3971_v32 = vmul.f32 %v3937_v51, %v8007_v17  ;;  %v4165_v51 = vmul.f32 %v4086_v15, %v8114_v52 }
 0xca7   :  { %v3987_v7 = vadd.f32 1e-05, %v3971_v32  ;;  %v4182_v14 = vmul.f32 %v8171_v42, %v4165_v51 }
 0xca9   :  { %5825 = vrsqrt.f32 %v3987_v7  ;;  %vm4063_vm11 = vweird.f32 %v3987_v7  ;;  %v8301_v45 = vadd.f32 %v8179_v61, %v4182_v14 }
 0xcaa   :  { %5827 = vrsqrt.f32 %v8261_v13 }
 0xcab   :  { %5829 = vrsqrt.f32 %v8265_v31 }
 0xcac   :  { %v3952_v1 = vpop.xlane.xlu2 %3951 }
 0xcad   :  { %v3976_v44 = vmul.f32 %v3952_v1, %v8007_v17 }
 0xcaf   :  { %v5826_v39 = vpop.eup %5825  ;;  %v3992_v11 = vadd.f32 1e-05, %v3976_v44 }
 0xcb0   :  { %v4058_v60 = vmul.f32 %v5826_v39, %v3987_v7  ;;  %v5828_v27 = vpop.eup %5827  ;;  %vm4064_vm9 = vweird.f32 %v5826_v39 }
 0xcb1   :  { %v4088_v20 = vmul.f32 %v5828_v27, %v8261_v13  ;;  %vm4065_vm12 = vmor %vm4063_vm11, %vm4064_vm9  ;;  %v5830_v21 = vpop.eup %5829  ;;  %5831 = vrsqrt.f32 %v3992_v11  ;;  %vm4094_vm4 = vweird.f32 %v5828_v27  ;;  %vm4113_vm11 = vweird.f32 %v3992_v11 }
 0xcb2   :  { %v4059_v2 = vmul.f32 %v5826_v39, %v4058_v60  ;;  %v4098_v12 = vmul.f32 %v5830_v21, %v8265_v31  ;;  %vm4095_vm6 = vmor %vm4093_vm5, %vm4094_vm4  ;;  %vm4104_vm7 = vweird.f32 %v5830_v21 }
 0xcb3   :  { %v4089_v43 = vmul.f32 %v5828_v27, %v4088_v20  ;;  %vm4105_vm9 = vmor %vm4103_vm8, %vm4104_vm7 }
 0xcb4   :  { %v4060_v9 = vmul.f32 0.5, %v4059_v2  ;;  %v4099_v48 = vmul.f32 %v5830_v21, %v4098_v12 }
 0xcb5   :  { %v4090_v19 = vmul.f32 0.5, %v4089_v43 }
 0xcb6   :  { %v4061_v24 = vsub.f32 1.5, %v4060_v9  ;;  %v4100_v6 = vmul.f32 0.5, %v4099_v48  ;;  %v3958_v44 = vpop.xlane.xlu0 %3957 }
 0xcb7   :  { %v4091_v38 = vsub.f32 1.5, %v4090_v19  ;;  %v5832_v40 = vpop.eup %5831  ;;  %v3978_v20 = vmul.f32 %v3958_v44, %v8007_v17 }
 0xcb8   :  { %v4062_v4 = vmul.f32 %v5826_v39, %v4061_v24  ;;  %v4108_v26 = vmul.f32 %v5832_v40, %v3992_v11  ;;  %v4101_v8 = vsub.f32 1.5, %v4100_v6  ;;  %vm4114_vm10 = vweird.f32 %v5832_v40 }
 0xcb9   :  { %v4092_v30 = vmul.f32 %v5828_v27, %v4091_v38 }
 0xcba   :  { %v4066_v22 = vsel %vm4065_vm12, %v5826_v39, %v4062_v4  ;;  %v4109_v39 = vmul.f32 %v5832_v40, %v4108_v26  ;;  %v4102_v60 = vmul.f32 %v5830_v21, %v4101_v8  ;;  %vm4115_vm12 = vmor %vm4113_vm11, %vm4114_vm10  ;;  %vm4423_vm11 = vcmask 7168  }
 0xcbb   :  { %v4163_v25 = vmul.f32 %v4066_v22, %v8149_v56  ;;  %v4181_v56 = vmul.f32 %v8171_v42, %v4164_v35  ;;  %v4096_v52 = vsel %vm4095_vm6, %v5828_v27, %v4092_v30  ;;  %v3994_v22 = vadd.f32 1e-05, %v3978_v20 }
 0xcbc   :  { %v4166_v37 = vmul.f32 %v4096_v52, %v8121_v58  ;;  %v4110_v13 = vmul.f32 0.5, %v4109_v39  ;;  %v4106_v9 = vsel %vm4105_vm9, %v5830_v21, %v4102_v60 }
 0xcbd   :  { %v4180_v62 = vmul.f32 %v8171_v42, %v4163_v25  ;;  %v8287_v32 = vadd.f32 %v8179_v61, %v4181_v56  ;;  %v4167_v27 = vmul.f32 %v4106_v9, %v8128_v63  ;;  %vm4133_vm3 = vweird.f32 %v3994_v22 }
 0xcbe   :  { %v4183_v55 = vmul.f32 %v8171_v42, %v4166_v37  ;;  %v4111_v1 = vsub.f32 1.5, %v4110_v13  ;;  %v3961_v25 = vpop.xlane.xlu2 %3960 }
 0xcbf   :  { %v8274_v41 = vadd.f32 %v8179_v61, %v4180_v62  ;;  %v4184_v31 = vmul.f32 %v8171_v42, %v4167_v27  ;;  %v3979_v43 = vmul.f32 %v3961_v25, %v8007_v17 }
 0xcc0   :  { %v8311_v24 = vadd.f32 %v8179_v61, %v4183_v55  ;;  %v4112_v16 = vmul.f32 %v5832_v40, %v4111_v1 }
 0xcc1   :  { %5383 = vmatmul.msk.f32.gmra.mxu2 %vm245_vm0, %v8274_v41  ;;  %v8319_v63 = vadd.f32 %v8179_v61, %v4184_v31  ;;  %v3995_v35 = vadd.f32 1e-05, %v3979_v43 }
 0xcc2   :  { %v4116_v0 = vsel %vm4115_vm12, %v5832_v40, %v4112_v16  ;;  %vm4826_vm12 = vcmask 1042434  }
 0xcc3   :  { %v4168_v4 = vmul.f32 %v4116_v0, %v8159_v5  ;;  %vm4143_vm6 = vweird.f32 %v3995_v35 }
 0xcc5   :  { %v4185_v11 = vmul.f32 %v8171_v42, %v4168_v4 }
 0xcc7   :  { %v8332_v62 = vadd.f32 %v8179_v61, %v4185_v11 }
 0xcc8   :  { %v4277_v7 = vpop.f32.mrf.mxu2 }
 0xcc9   :  { %v4278_v50 = vadd.f32 %v8283_v23, %v4277_v7  ;;  %5384 = vmatmul.msk.f32.gmra.mxu2 %vm245_vm0, %v8287_v32 }
 0xccb   :  { %5833 = vtanh.f32 %v4278_v50 }
 0xccc   :  { %5835 = vrsqrt.f32 %v3994_v22 }
 0xccd   :  { %5837 = vrsqrt.f32 %v3995_v35 }
 0xcd1   :  { %v5834_v2 = vpop.eup %5833  ;;  %5385 = vmatmul.msk.f32.gmra.mxu2 %vm245_vm0, %v8301_v45 }
 0xcd2   :  { %v4342_v57 = vmul.f32 %v5834_v2, %v8297_v49  ;;  %v5836_v12 = vpop.eup %5835 }
 0xcd3   :  { %v4128_v15 = vmul.f32 %v5836_v12, %v3994_v22  ;;  %v5838_v48 = vpop.eup %5837  ;;  %vm4134_vm14 = vweird.f32 %v5836_v12 }
 0xcd4   :  { %v4358_v58 = vsel %vm796_vm2, %v4342_v57, 0.0  ;;  %v4138_v30 = vmul.f32 %v5838_v48, %v3995_v35  ;;  %vm4135_vm4 = vmor %vm4133_vm3, %vm4134_vm14  ;;  %vm4144_vm5 = vweird.f32 %v5838_v48  ;;  %vm4830_vm14 = vcmask 1044484  }
 0xcd5   :  { %4359 = vadd.xlane.f32.xlu0 %v4358_v58  ;;  %v4129_v38 = vmul.f32 %v5836_v12, %v4128_v15  ;;  %vm4145_vm7 = vmor %vm4143_vm6, %vm4144_vm5  ;;  %vm4836_vm3 = vcmask 1047559  }
 0xcd6   :  { %v4139_v50 = vmul.f32 %v5838_v48, %v4138_v30 }
 0xcd7   :  { %v4130_v51 = vmul.f32 0.5, %v4129_v38 }
 0xcd8   :  { %v4140_v39 = vmul.f32 0.5, %v4139_v50 }
 0xcd9   :  { %5386 = vmatmul.msk.f32.gmra.mxu2 %vm245_vm0, %v8311_v24  ;;  %v4131_v7 = vsub.f32 1.5, %v4130_v51 }
 0xcda   :  { %v4141_v57 = vsub.f32 1.5, %v4140_v39 }
 0xcdb   :  { %v4132_v8 = vmul.f32 %v5836_v12, %v4131_v7 }
 0xcdc   :  { %v4142_v16 = vmul.f32 %v5838_v48, %v4141_v57 }
 0xcdd   :  { %v4136_v2 = vsel %vm4135_vm4, %v5836_v12, %v4132_v8 }
 0xcde   :  { %v4170_v1 = vmul.f32 %v4136_v2, %v8166_v18  ;;  %v4146_v44 = vsel %vm4145_vm7, %v5838_v48, %v4142_v16 }
 0xcdf   :  { %v4171_v18 = vmul.f32 %v4146_v44, %v8190_v29 }
 0xce1   :  { %v3861_v28 = vpop.xlane.xlu1 %3860  ;;  %5387 = vmatmul.msk.f32.gmra.mxu2 %vm245_vm0, %v8319_v63 }
 0xce2   :  { %v3884_v10 = vmul.f32 %v8007_v17, %v3861_v28  ;;  %v4188_v28 = vmul.f32 %v8171_v42, %v4171_v18 }
 0xce4   :  { %v8327_v21 = vsub.f32 %v8208_v53, %v3884_v10  ;;  %v8360_v43 = vadd.f32 %v8179_v61, %v4188_v28 }
 0xce6   :  { %v3916_v5 = vmul.f32 %v8327_v21, %v8327_v21 }
 0xce8   :  { %v3962_v3 = vsel %vm245_vm0, %v3916_v5, 0.0 }
 0xce9   :  { %3963 = vadd.xlane.f32.xlu1 %v3962_v3  ;;  %v3955_v19 = vpop.xlane.xlu1 %3954  ;;  %5388 = vmatmul.msk.f32.gmra.mxu2 %vm245_vm0, %v8332_v62 }
 0xcea   :  { %v3977_v56 = vmul.f32 %v3955_v19, %v8007_v17 }
 0xcec   :  { %v3993_v53 = vadd.f32 1e-05, %v3977_v56 }
 0xcee   :  { %5839 = vrsqrt.f32 %v3993_v53  ;;  %vm4123_vm15 = vweird.f32 %v3993_v53 }
 0xcf4   :  { %v5840_v40 = vpop.eup %5839 }
 0xcf5   :  { %v4118_v6 = vmul.f32 %v5840_v40, %v3993_v53  ;;  %vm4124_vm13 = vweird.f32 %v5840_v40 }
 0xcf6   :  { %vm4125_vm1 = vmor %vm4123_vm15, %vm4124_vm13  ;;  %vm4828_vm13 = vcmask 1043459   ;;  %vm4832_vm15 = vcmask 1045509  }
 0xcf7   :  { %v4119_v26 = vmul.f32 %v5840_v40, %v4118_v6 }
 0xcf9   :  { %v4120_v14 = vmul.f32 0.5, %v4119_v26 }
 0xcfb   :  { %v4121_v52 = vsub.f32 1.5, %v4120_v14 }
 0xcfd   :  { %v4122_v37 = vmul.f32 %v5840_v40, %v4121_v52 }
 0xcff   :  { %v4126_v60 = vsel %vm4125_vm1, %v5840_v40, %v4122_v37  ;;  %vm4834_vm1 = vcmask 1046534  }
 0xd00   :  { %v4169_v13 = vmul.f32 %v4126_v60, %v8211_v33  ;;  %v4187_v33 = vmul.f32 %v8171_v42, %v4170_v1 }
 0xd02   :  { %v4186_v55 = vmul.f32 %v8171_v42, %v4169_v13  ;;  %v8351_v4 = vadd.f32 %v8179_v61, %v4187_v33 }
 0xd03   :  { %v4280_v9 = vpop.f32.mrf.mxu2 }
 0xd04   :  { %v4281_v58 = vadd.f32 %v8283_v23, %v4280_v9  ;;  %v8343_v27 = vadd.f32 %v8179_v61, %v4186_v55 }
 0xd06   :  { %5841 = vtanh.f32 %v4281_v58  ;;  %5389 = vmatmul.msk.f32.gmra.mxu2 %vm245_vm0, %v8343_v27 }
 0xd0b   :  { %v4283_v31 = vpop.f32.mrf.mxu2 }
 0xd0c   :  { %v5842_v0 = vpop.eup %5841  ;;  %v4284_v20 = vadd.f32 %v8283_v23, %v4283_v31 }
 0xd0d   :  { %v4343_v22 = vmul.f32 %v5842_v0, %v8297_v49 }
 0xd0e   :  { %5843 = vtanh.f32 %v4284_v20  ;;  %5390 = vmatmul.msk.f32.gmra.mxu2 %vm245_vm0, %v8351_v4 }
 0xd0f   :  { %v4361_v25 = vsel %vm796_vm2, %v4343_v22, 0.0 }
 0xd10   :  { %4362 = vadd.xlane.f32.xlu2 %v4361_v25 }
 0xd13   :  { %v4286_v10 = vpop.f32.mrf.mxu2 }
 0xd14   :  { %v5844_v11 = vpop.eup %5843  ;;  %v4287_v29 = vadd.f32 %v8283_v23, %v4286_v10 }
 0xd15   :  { %v4344_v5 = vmul.f32 %v5844_v11, %v8297_v49 }
 0xd16   :  { %5845 = vtanh.f32 %v4287_v29  ;;  %5391 = vmatmul.msk.f32.gmra.mxu2 %vm245_vm0, %v8360_v43 }
 0xd17   :  { %v4364_v35 = vsel %vm796_vm2, %v4344_v5, 0.0 }
 0xd18   :  { %4365 = vadd.xlane.f32.xlu1 %v4364_v35 }
 0xd1b   :  { %v4289_v3 = vpop.f32.mrf.mxu2 }
 0xd1c   :  { %v5846_v19 = vpop.eup %5845  ;;  %v4290_v12 = vadd.f32 %v8283_v23, %v4289_v3 }
 0xd1d   :  { %v4345_v56 = vmul.f32 %v5846_v19, %v8297_v49 }
 0xd1e   :  { %5847 = vtanh.f32 %v4290_v12 }
 0xd1f   :  { %v4367_v53 = vsel %vm796_vm2, %v4345_v56, 0.0 }
 0xd20   :  { %4368 = vadd.xlane.f32.xlu0 %v4367_v53 }
 0xd23   :  { %v4292_v15 = vpop.f32.mrf.mxu2 }
 0xd24   :  { %v5848_v38 = vpop.eup %5847  ;;  %v4293_v48 = vadd.f32 %v8283_v23, %v4292_v15 }
 0xd25   :  { %v4346_v40 = vmul.f32 %v5848_v38, %v8297_v49 }
 0xd26   :  { %5849 = vtanh.f32 %v4293_v48 }
 0xd27   :  { %v4370_v51 = vsel %vm796_vm2, %v4346_v40, 0.0 }
 0xd28   :  { %4371 = vadd.xlane.f32.xlu2 %v4370_v51 }
 0xd2c   :  { %v5850_v30 = vpop.eup %5849 }
 0xd2d   :  { %v4347_v6 = vmul.f32 %v5850_v30, %v8297_v49 }
 0xd2f   :  { %v4373_v26 = vsel %vm796_vm2, %v4347_v6, 0.0 }
 0xd30   :  { %4374 = vadd.xlane.f32.xlu1 %v4373_v26 }
 0xd44   :  { %v4295_v7 = vpop.f32.mrf.mxu2 }
 0xd45   :  { %v4296_v50 = vadd.f32 %v8283_v23, %v4295_v7  ;;  %v8403_v7 = vld [vmem:[%s8652_s7 + $0x2] ss:$0 sm:$0xff] }
 0xd47   :  { %5851 = vtanh.f32 %v4296_v50 }
 0xd4c   :  { %v4298_v14 = vpop.f32.mrf.mxu2 }
 0xd4d   :  { %v5852_v52 = vpop.eup %5851  ;;  %v4299_v8 = vadd.f32 %v8283_v23, %v4298_v14 }
 0xd4e   :  { %v4348_v39 = vmul.f32 %v5852_v52, %v8297_v49 }
 0xd4f   :  { %5853 = vtanh.f32 %v4299_v8 }
 0xd50   :  { %v4376_v37 = vsel %vm796_vm2, %v4348_v39, 0.0 }
 0xd51   :  { %4377 = vadd.xlane.f32.xlu0 %v4376_v37 }
 0xd54   :  { %v4301_v60 = vpop.f32.mrf.mxu2 }
 0xd55   :  { %v5854_v13 = vpop.eup %5853  ;;  %v4302_v2 = vadd.f32 %v8283_v23, %v4301_v60 }
 0xd56   :  { %v4349_v57 = vmul.f32 %v5854_v13, %v8297_v49 }
 0xd57   :  { %5855 = vtanh.f32 %v4302_v2 }
 0xd58   :  { %v4379_v55 = vsel %vm796_vm2, %v4349_v57, 0.0 }
 0xd59   :  { %4380 = vadd.xlane.f32.xlu2 %v4379_v55 }
 0xd5c   :  { %v3964_v9 = vpop.xlane.xlu1 %3963  ;;  %v4304_v1 = vpop.f32.mrf.mxu2 }
 0xd5d   :  { %v5856_v58 = vpop.eup %5855  ;;  %v3980_v16 = vmul.f32 %v3964_v9, %v8007_v17  ;;  %v4305_v33 = vadd.f32 %v8283_v23, %v4304_v1 }
 0xd5e   :  { %v4350_v44 = vmul.f32 %v5856_v58, %v8297_v49 }
 0xd5f   :  { %v3996_v31 = vadd.f32 1e-05, %v3980_v16  ;;  %5857 = vtanh.f32 %v4305_v33 }
 0xd60   :  { %v4382_v0 = vsel %vm796_vm2, %v4350_v44, 0.0 }
 0xd61   :  { %5859 = vrsqrt.f32 %v3996_v31  ;;  %4383 = vadd.xlane.f32.xlu1 %v4382_v0  ;;  %vm4153_vm9 = vweird.f32 %v3996_v31 }
 0xd64   :  { %v4307_v18 = vpop.f32.mrf.mxu2 }
 0xd65   :  { %v5858_v20 = vpop.eup %5857  ;;  %v4308_v22 = vadd.f32 %v8283_v23, %v4307_v18 }
 0xd66   :  { %v4351_v25 = vmul.f32 %v5858_v20, %v8297_v49 }
 0xd67   :  { %v5860_v28 = vpop.eup %5859  ;;  %5861 = vtanh.f32 %v4308_v22 }
 0xd68   :  { %v4148_v10 = vmul.f32 %v5860_v28, %v3996_v31  ;;  %v4385_v11 = vsel %vm796_vm2, %v4351_v25, 0.0  ;;  %vm4154_vm8 = vweird.f32 %v5860_v28 }
 0xd69   :  { %4386 = vadd.xlane.f32.xlu0 %v4385_v11  ;;  %vm4155_vm10 = vmor %vm4153_vm9, %vm4154_vm8 }
 0xd6a   :  { %v4149_v29 = vmul.f32 %v5860_v28, %v4148_v10 }
 0xd6c   :  { %v4150_v5 = vmul.f32 0.5, %v4149_v29  ;;  %v4310_v35 = vpop.f32.mrf.mxu2 }
 0xd6d   :  { %v5862_v3 = vpop.eup %5861  ;;  %v4311_v19 = vadd.f32 %v8283_v23, %v4310_v35 }
 0xd6e   :  { %v4151_v12 = vsub.f32 1.5, %v4150_v5  ;;  %v4352_v56 = vmul.f32 %v5862_v3, %v8297_v49 }
 0xd6f   :  { %5863 = vtanh.f32 %v4311_v19 }
 0xd70   :  { %v4152_v53 = vmul.f32 %v5860_v28, %v4151_v12  ;;  %v4388_v15 = vsel %vm796_vm2, %v4352_v56, 0.0 }
 0xd71   :  { %4389 = vadd.xlane.f32.xlu2 %v4388_v15 }
 0xd72   :  { %v4156_v38 = vsel %vm4155_vm10, %v5860_v28, %v4152_v53 }
 0xd73   :  { %v4172_v48 = vmul.f32 %v4156_v38, %v8327_v21  ;;  %v4360_v21 = vpop.xlane.xlu0 %4359 }
 0xd74   :  { %v4407_v50 = vadd.f32 %v8403_v7, %v4360_v21 }
 0xd75   :  { %v5864_v40 = vpop.eup %5863  ;;  %v4189_v51 = vmul.f32 %v8171_v42, %v4172_v48 }
 0xd76   :  { %v4353_v30 = vmul.f32 %v5864_v40, %v8297_v49 }
 0xd77   :  { %v8395_v6 = vadd.f32 %v8179_v61, %v4189_v51  ;;  %v4424_v61 = vsel %vm4423_vm11, %v4407_v50, -inf }
 0xd78   :  { %v4391_v26 = vsel %vm796_vm2, %v4353_v30, 0.0 }
 0xd79   :  { %5392 = vmatmul.msk.f32.gmra.mxu2 %vm245_vm0, %v8395_v6  ;;  %4392 = vadd.xlane.f32.xlu1 %v4391_v26 }
 0xd83   :  { %v4363_v42 = vpop.xlane.xlu2 %4362 }
 0xd84   :  { %v4408_v14 = vadd.f32 %v8403_v7, %v4363_v42 }
 0xd86   :  { %v4425_v52 = vsel %vm4423_vm11, %v4408_v14, -inf }
 0xd87   :  { %v4426_v8 = vmax.f32 %v4424_v61, %v4425_v52 }
 0xd89   :  { %v4427_v39 = vrot.slane %v4426_v8, 4  ;;  %v4313_v37 = vpop.f32.mrf.mxu2 }
 0xd8a   :  { %v4314_v60 = vadd.f32 %v8283_v23, %v4313_v37 }
 0xd8b   :  { %v4428_v13 = vmax.f32 %v4426_v8, %v4427_v39  ;;  %v4366_v55 = vpop.xlane.xlu1 %4365 }
 0xd8c   :  { %5865 = vtanh.f32 %v4314_v60  ;;  %v4409_v16 = vadd.f32 %v8403_v7, %v4366_v55 }
 0xd8d   :  { %v4429_v2 = vrot.slane %v4428_v13, 2 }
 0xd8e   :  { %v4433_v28 = vsel %vm4423_vm11, %v4409_v16, -inf }
 0xd8f   :  { %v4430_v57 = vmax.f32 %v4428_v13, %v4429_v2 }
 0xd91   :  { %v4431_v9 = vrot.slane %v4430_v57, 1  ;;  %v4316_v1 = vpop.f32.mrf.mxu2 }
 0xd92   :  { %v5866_v58 = vpop.eup %5865  ;;  %v4317_v33 = vadd.f32 %v8283_v23, %v4316_v1 }
 0xd93   :  { %v4432_v44 = vmax.f32 %v4430_v57, %v4431_v9  ;;  %v4369_v31 = vpop.xlane.xlu0 %4368  ;;  %v4354_v0 = vmul.f32 %v5866_v58, %v8297_v49 }
 0xd94   :  { %5867 = vtanh.f32 %v4317_v33  ;;  %v4410_v18 = vadd.f32 %v8403_v7, %v4369_v31 }
 0xd95   :  { %v4496_v20 = vsub.f32 %v4407_v50, %v4432_v44  ;;  %v4497_v22 = vsub.f32 %v4408_v14, %v4432_v44  ;;  %v4394_v25 = vsel %vm796_vm2, %v4354_v0, 0.0 }
 0xd96   :  { %v4434_v10 = vsel %vm4423_vm11, %v4410_v18, -inf  ;;  %4395 = vadd.xlane.f32.xlu0 %v4394_v25 }
 0xd97   :  { %v4512_v11 = vmul.f32 1.442695, %v4496_v20  ;;  %v4514_v29 = vmul.f32 1.442695, %v4497_v22  ;;  %v4435_v5 = vmax.f32 %v4433_v28, %v4434_v10 }
 0xd99   :  { %5869 = vpow2.f32 %v4512_v11  ;;  %v4436_v35 = vrot.slane %v4435_v5, 4  ;;  %v4319_v3 = vpop.f32.mrf.mxu2 }
 0xd9a   :  { %v5868_v19 = vpop.eup %5867  ;;  %5871 = vpow2.f32 %v4514_v29  ;;  %v4320_v12 = vadd.f32 %v8283_v23, %v4319_v3 }
 0xd9b   :  { %v4437_v56 = vmax.f32 %v4435_v5, %v4436_v35  ;;  %v4355_v53 = vmul.f32 %v5868_v19, %v8297_v49  ;;  %v4372_v51 = vpop.xlane.xlu2 %4371 }
 0xd9c   :  { %5873 = vtanh.f32 %v4320_v12  ;;  %v4411_v61 = vadd.f32 %v8403_v7, %v4372_v51 }
 0xd9d   :  { %v4438_v15 = vrot.slane %v4437_v56, 2  ;;  %v4397_v38 = vsel %vm796_vm2, %v4355_v53, 0.0 }
 0xd9e   :  { %4398 = vadd.xlane.f32.xlu2 %v4397_v38  ;;  %v4442_v9 = vsel %vm4423_vm11, %v4411_v61, -inf }
 0xd9f   :  { %v5870_v48 = vpop.eup %5869  ;;  %v4439_v40 = vmax.f32 %v4437_v56, %v4438_v15 }
 0xda0   :  { %v5872_v30 = vpop.eup %5871  ;;  %v4544_v26 = vsel %vm4423_vm11, %v5870_v48, 0.0 }
 0xda1   :  { %v4545_v21 = vsel %vm4423_vm11, %v5872_v30, 0.0  ;;  %v4440_v50 = vrot.slane %v4439_v40, 1 }
 0xda2   :  { %v5874_v42 = vpop.eup %5873  ;;  %v4546_v14 = vadd.f32 %v4545_v21, %v4544_v26 }
 0xda3   :  { %v4441_v52 = vmax.f32 %v4439_v40, %v4440_v50  ;;  %v4375_v8 = vpop.xlane.xlu1 %4374  ;;  %v4356_v39 = vmul.f32 %v5874_v42, %v8297_v49 }
 0xda4   :  { %v4547_v37 = vrot.slane %v4546_v14, 4  ;;  %v4412_v60 = vadd.f32 %v8403_v7, %v4375_v8 }
 0xda5   :  { %v4498_v13 = vsub.f32 %v4409_v16, %v4441_v52  ;;  %v4499_v2 = vsub.f32 %v4410_v18, %v4441_v52  ;;  %v4400_v57 = vsel %vm796_vm2, %v4356_v39, 0.0 }
 0xda6   :  { %v4548_v55 = vadd.f32 %v4547_v37, %v4546_v14  ;;  %v4443_v1 = vsel %vm4423_vm11, %v4412_v60, -inf  ;;  %4401 = vadd.xlane.f32.xlu1 %v4400_v57 }
 0xda7   :  { %v4516_v58 = vmul.f32 1.442695, %v4498_v13  ;;  %v4518_v33 = vmul.f32 1.442695, %v4499_v2  ;;  %v4444_v44 = vmax.f32 %v4442_v9, %v4443_v1 }
 0xda8   :  { %v4549_v31 = vrot.slane %v4548_v55, 2 }
 0xda9   :  { %5875 = vpow2.f32 %v4516_v58  ;;  %v4445_v0 = vrot.slane %v4444_v44, 4 }
 0xdaa   :  { %v4550_v20 = vadd.f32 %v4549_v31, %v4548_v55  ;;  %5877 = vpow2.f32 %v4518_v33 }
 0xdab   :  { %v4446_v22 = vmax.f32 %v4444_v44, %v4445_v0 }
 0xdac   :  { %v4551_v25 = vrot.slane %v4550_v20, 1 }
 0xdad   :  { %v4447_v16 = vrot.slane %v4446_v22, 2 }
 0xdae   :  { %v4552_v18 = vadd.f32 %v4551_v25, %v4550_v20 }
 0xdaf   :  { %v5876_v28 = vpop.eup %5875  ;;  %v4448_v10 = vmax.f32 %v4446_v22, %v4447_v16 }
 0xdb0   :  { %v5878_v11 = vpop.eup %5877  ;;  %v4553_v29 = vsel %vm4423_vm11, %v5876_v28, 0.0  ;;  %v4616_v5 = vadd.f32 1e-08, %v4552_v18 }
 0xdb1   :  { %v4554_v35 = vsel %vm4423_vm11, %v5878_v11, 0.0  ;;  %v4449_v3 = vrot.slane %v4448_v10, 1 }
 0xdb2   :  { %v4555_v19 = vadd.f32 %v4554_v35, %v4553_v29  ;;  %5879 = vrcp.f32 %v4616_v5 }
 0xdb3   :  { %v4450_v12 = vmax.f32 %v4448_v10, %v4449_v3 }
 0xdb4   :  { %v4556_v56 = vrot.slane %v4555_v19, 4 }
 0xdb5   :  { %v4500_v53 = vsub.f32 %v4411_v61, %v4450_v12  ;;  %v4501_v15 = vsub.f32 %v4412_v60, %v4450_v12 }
 0xdb6   :  { %v4557_v38 = vadd.f32 %v4556_v56, %v4555_v19 }
 0xdb7   :  { %v4520_v40 = vmul.f32 1.442695, %v4500_v53  ;;  %v4522_v51 = vmul.f32 1.442695, %v4501_v15 }
 0xdb8   :  { %v5880_v26 = vpop.eup %5879  ;;  %v4558_v21 = vrot.slane %v4557_v38, 2 }
 0xdb9   :  { %5881 = vpow2.f32 %v4520_v40  ;;  %v4632_v50 = vmul.f32 %v5880_v26, %v5870_v48  ;;  %v4633_v52 = vmul.f32 %v5880_v26, %v5872_v30 }
 0xdba   :  { %v4559_v42 = vadd.f32 %v4558_v21, %v4557_v38  ;;  %5883 = vpow2.f32 %v4522_v51 }
 0xdbb   :  { %4650 = vperm.xlu2 %5420, %v4632_v50  }
 0xdbc   :  { %v4560_v14 = vrot.slane %v4559_v42, 1 }
 0xdbe   :  { %v4561_v8 = vadd.f32 %v4560_v14, %v4559_v42 }
 0xdbf   :  { %v5882_v39 = vpop.eup %5881  ;;  %4655 = vperm.xlu1 %5419, %v4633_v52  }
 0xdc0   :  { %v5884_v37 = vpop.eup %5883  ;;  %v4562_v13 = vsel %vm4423_vm11, %v5882_v39, 0.0  ;;  %v4617_v61 = vadd.f32 1e-08, %v4561_v8 }
 0xdc1   :  { %v4563_v60 = vsel %vm4423_vm11, %v5884_v37, 0.0 }
 0xdc2   :  { %v4564_v2 = vadd.f32 %v4563_v60, %v4562_v13  ;;  %5885 = vrcp.f32 %v4617_v61 }
 0xdc4   :  { %v4565_v57 = vrot.slane %v4564_v2, 4  ;;  %v4378_v1 = vpop.xlane.xlu0 %4377 }
 0xdc5   :  { %v4413_v44 = vadd.f32 %v8403_v7, %v4378_v1 }
 0xdc6   :  { %v4566_v55 = vadd.f32 %v4565_v57, %v4564_v2 }
 0xdc7   :  { %v4451_v25 = vsel %vm4423_vm11, %v4413_v44, -inf }
 0xdc8   :  { %v5886_v9 = vpop.eup %5885  ;;  %v4567_v48 = vrot.slane %v4566_v55, 2 }
 0xdc9   :  { %v4635_v58 = vmul.f32 %v5886_v9, %v5878_v11  ;;  %v8432_v33 = vmul.f32 %v5886_v9, %v5876_v28 }
 0xdca   :  { %v4568_v30 = vadd.f32 %v4567_v48, %v4566_v55 }
 0xdcb   :  { %4665 = vperm.xlu2 %5420, %v4635_v58  }
 0xdcc   :  { %v4381_v31 = vpop.xlane.xlu2 %4380  ;;  %v4569_v0 = vrot.slane %v4568_v30, 1 }
 0xdcd   :  { %v4414_v20 = vadd.f32 %v8403_v7, %v4381_v31 }
 0xdce   :  { %v4570_v22 = vadd.f32 %v4569_v0, %v4568_v30 }
 0xdcf   :  { %v4452_v16 = vsel %vm4423_vm11, %v4414_v20, -inf }
 0xdd0   :  { %v4453_v18 = vmax.f32 %v4451_v25, %v4452_v16  ;;  %v4618_v10 = vadd.f32 1e-08, %v4570_v22 }
 0xdd2   :  { %v4454_v29 = vrot.slane %v4453_v18, 4  ;;  %5887 = vrcp.f32 %v4618_v10 }
 0xdd4   :  { %v4455_v11 = vmax.f32 %v4453_v18, %v4454_v29  ;;  %v4384_v3 = vpop.xlane.xlu1 %4383 }
 0xdd5   :  { %v4415_v53 = vadd.f32 %v8403_v7, %v4384_v3 }
 0xdd6   :  { %v4456_v28 = vrot.slane %v4455_v11, 2 }
 0xdd7   :  { %v4460_v21 = vsel %vm4423_vm11, %v4415_v53, -inf }
 0xdd8   :  { %v5888_v5 = vpop.eup %5887  ;;  %v4457_v35 = vmax.f32 %v4455_v11, %v4456_v28 }
 0xdd9   :  { %v4637_v19 = vmul.f32 %v5888_v5, %v5884_v37  ;;  %v8438_v12 = vmul.f32 %v5888_v5, %v5882_v39 }
 0xdda   :  { %v4458_v56 = vrot.slane %v4457_v35, 1 }
 0xddb   :  { %4675 = vperm.xlu1 %5419, %v4637_v19  }
 0xddc   :  { %v4459_v15 = vmax.f32 %v4457_v35, %v4458_v56  ;;  %v4387_v38 = vpop.xlane.xlu0 %4386 }
 0xddd   :  { %v4416_v40 = vadd.f32 %v8403_v7, %v4387_v38 }
 0xdde   :  { %v4502_v51 = vsub.f32 %v4413_v44, %v4459_v15  ;;  %v4503_v26 = vsub.f32 %v4414_v20, %v4459_v15 }
 0xddf   :  { %v4461_v50 = vsel %vm4423_vm11, %v4416_v40, -inf }
 0xde0   :  { %v4524_v42 = vmul.f32 1.442695, %v4502_v51  ;;  %v4526_v14 = vmul.f32 1.442695, %v4503_v26  ;;  %v4462_v52 = vmax.f32 %v4460_v21, %v4461_v50 }
 0xde2   :  { %5889 = vpow2.f32 %v4524_v42  ;;  %v4463_v8 = vrot.slane %v4462_v52, 4 }
 0xde3   :  { %5891 = vpow2.f32 %v4526_v14 }
 0xde4   :  { %v4464_v39 = vmax.f32 %v4462_v52, %v4463_v8  ;;  %v4390_v60 = vpop.xlane.xlu2 %4389 }
 0xde5   :  { %v4417_v1 = vadd.f32 %v8403_v7, %v4390_v60 }
 0xde6   :  { %v4465_v37 = vrot.slane %v4464_v39, 2 }
 0xde7   :  { %v4469_v25 = vsel %vm4423_vm11, %v4417_v1, -inf }
 0xde8   :  { %v5890_v13 = vpop.eup %5889  ;;  %v4466_v61 = vmax.f32 %v4464_v39, %v4465_v37 }
 0xde9   :  { %v8444_v2 = vpop.eup %5891  ;;  %v4571_v57 = vsel %vm4423_vm11, %v5890_v13, 0.0 }
 0xdea   :  { %v4572_v55 = vsel %vm4423_vm11, %v8444_v2, 0.0  ;;  %v4467_v9 = vrot.slane %v4466_v61, 1 }
 0xdeb   :  { %v4573_v48 = vadd.f32 %v4572_v55, %v4571_v57 }
 0xdec   :  { %v4468_v58 = vmax.f32 %v4466_v61, %v4467_v9  ;;  %v4393_v30 = vpop.xlane.xlu1 %4392 }
 0xded   :  { %v4574_v44 = vrot.slane %v4573_v48, 4  ;;  %v4418_v31 = vadd.f32 %v8403_v7, %v4393_v30 }
 0xdee   :  { %v4504_v0 = vsub.f32 %v4415_v53, %v4468_v58  ;;  %v4505_v20 = vsub.f32 %v4416_v40, %v4468_v58 }
 0xdef   :  { %v4575_v22 = vadd.f32 %v4574_v44, %v4573_v48  ;;  %v4470_v16 = vsel %vm4423_vm11, %v4418_v31, -inf }
 0xdf0   :  { %v4528_v18 = vmul.f32 1.442695, %v4504_v0  ;;  %v4530_v10 = vmul.f32 1.442695, %v4505_v20  ;;  %v4471_v29 = vmax.f32 %v4469_v25, %v4470_v16 }
 0xdf1   :  { %v4576_v11 = vrot.slane %v4575_v22, 2 }
 0xdf2   :  { %5893 = vpow2.f32 %v4528_v18  ;;  %v4472_v28 = vrot.slane %v4471_v29, 4 }
 0xdf3   :  { %v4577_v5 = vadd.f32 %v4576_v11, %v4575_v22  ;;  %5895 = vpow2.f32 %v4530_v10 }
 0xdf4   :  { %v4473_v35 = vmax.f32 %v4471_v29, %v4472_v28 }
 0xdf5   :  { %v4578_v3 = vrot.slane %v4577_v5, 1 }
 0xdf6   :  { %v4474_v19 = vrot.slane %v4473_v35, 2 }
 0xdf7   :  { %v4579_v56 = vadd.f32 %v4578_v3, %v4577_v5 }
 0xdf8   :  { %v5894_v15 = vpop.eup %5893  ;;  %v4475_v53 = vmax.f32 %v4473_v35, %v4474_v19 }
 0xdf9   :  { %v5896_v38 = vpop.eup %5895  ;;  %v4580_v40 = vsel %vm4423_vm11, %v5894_v15, 0.0  ;;  %v4619_v51 = vadd.f32 1e-08, %v4579_v56 }
 0xdfa   :  { %v4581_v26 = vsel %vm4423_vm11, %v5896_v38, 0.0  ;;  %v4476_v21 = vrot.slane %v4475_v53, 1 }
 0xdfb   :  { %v4582_v50 = vadd.f32 %v4581_v26, %v4580_v40  ;;  %5897 = vrcp.f32 %v4619_v51 }
 0xdfc   :  { %v4477_v42 = vmax.f32 %v4475_v53, %v4476_v21  ;;  %v4322_v14 = vpop.f32.mrf.mxu2 }
 0xdfd   :  { %v4583_v52 = vrot.slane %v4582_v50, 4  ;;  %v4323_v8 = vadd.f32 %v8283_v23, %v4322_v14 }
 0xdfe   :  { %v4506_v39 = vsub.f32 %v4417_v1, %v4477_v42  ;;  %v4507_v37 = vsub.f32 %v4418_v31, %v4477_v42 }
 0xdff   :  { %v4584_v61 = vadd.f32 %v4583_v52, %v4582_v50  ;;  %5899 = vtanh.f32 %v4323_v8 }
 0xe00   :  { %v4532_v60 = vmul.f32 1.442695, %v4506_v39  ;;  %v4534_v57 = vmul.f32 1.442695, %v4507_v37 }
 0xe01   :  { %v5898_v55 = vpop.eup %5897  ;;  %v4585_v9 = vrot.slane %v4584_v61, 2 }
 0xe02   :  { %5901 = vpow2.f32 %v4532_v60  ;;  %v4638_v48 = vmul.f32 %v5898_v55, %v5890_v13 }
 0xe03   :  { %v4586_v58 = vadd.f32 %v4585_v9, %v4584_v61  ;;  %5903 = vpow2.f32 %v4534_v57 }
 0xe04   :  { %4680 = vperm.xlu2 %5420, %v4638_v48   ;;  %v4639_v48 = vmul.f32 %v5898_v55, %v8444_v2 }
 0xe05   :  { %v5900_v30 = vpop.eup %5899  ;;  %v4587_v44 = vrot.slane %v4586_v58, 1 }
 0xe06   :  { %v4357_v0 = vmul.f32 %v5900_v30, %v8297_v49 }
 0xe07   :  { %v4588_v20 = vadd.f32 %v4587_v44, %v4586_v58 }
 0xe08   :  { %v5902_v22 = vpop.eup %5901  ;;  %v4403_v23 = vsel %vm796_vm2, %v4357_v0, 0.0  ;;  %vm4824_vm2 = vcmask 1041409  }
 0xe09   :  { %v5904_v1 = vpop.eup %5903  ;;  %v4589_v31 = vsel %vm4423_vm11, %v5902_v22, 0.0  ;;  %4404 = vadd.xlane.f32.xlu0 %v4403_v23  ;;  %v4620_v25 = vadd.f32 1e-08, %v4588_v20  ;;  %v4396_v10 = vpop.xlane.xlu0 %4395 }
 0xe0a   :  { %v4590_v16 = vsel %vm4423_vm11, %v5904_v1, 0.0  ;;  %v4419_v11 = vadd.f32 %v8403_v7, %v4396_v10 }
 0xe0b   :  { %v4591_v18 = vadd.f32 %v4590_v16, %v4589_v31  ;;  %5905 = vrcp.f32 %v4620_v25 }
 0xe0c   :  { %v4478_v53 = vsel %vm4423_vm11, %v4419_v11, -inf }
 0xe0d   :  { %v4592_v13 = vrot.slane %v4591_v18, 4 }
 0xe0f   :  { %v4593_v29 = vadd.f32 %v4592_v13, %v4591_v18 }
 0xe11   :  { %v5906_v28 = vpop.eup %5905  ;;  %v4594_v49 = vrot.slane %v4593_v29, 2  ;;  %v4399_v5 = vpop.xlane.xlu2 %4398 }
 0xe12   :  { %v4420_v35 = vadd.f32 %v8403_v7, %v4399_v5  ;;  %v4641_v3 = vmul.f32 %v5906_v28, %v5896_v38  ;;  %v4640_v19 = vmul.f32 %v5906_v28, %v5894_v15 }
 0xe13   :  { %v4595_v56 = vadd.f32 %v4594_v49, %v4593_v29 }
 0xe14   :  { %v4479_v40 = vsel %vm4423_vm11, %v4420_v35, -inf  ;;  %4695 = vperm.xlu2 %5420, %v4641_v3   ;;  %4690 = vperm.xlu1 %5419, %v4640_v19  }
 0xe15   :  { %v4480_v51 = vmax.f32 %v4478_v53, %v4479_v40  ;;  %v4596_v26 = vrot.slane %v4595_v56, 1 }
 0xe17   :  { %v4481_v21 = vrot.slane %v4480_v51, 4  ;;  %v4597_v50 = vadd.f32 %v4596_v26, %v4595_v56 }
 0xe19   :  { %v4482_v42 = vmax.f32 %v4480_v51, %v4481_v21  ;;  %v4621_v14 = vadd.f32 1e-08, %v4597_v50  ;;  %v4402_v10 = vpop.xlane.xlu1 %4401 }
 0xe1a   :  { %v4421_v29 = vadd.f32 %v8403_v7, %v4402_v10 }
 0xe1b   :  { %v4483_v52 = vrot.slane %v4482_v42, 2  ;;  %5907 = vrcp.f32 %v4621_v14 }
 0xe1d   :  { %v4484_v8 = vmax.f32 %v4482_v42, %v4483_v52  ;;  %4660 = vperm.xlu0 %5418, %v8432_v33  }
 0xe1f   :  { %v4485_v38 = vrot.slane %v4484_v8, 1 }
 0xe21   :  { %v5908_v15 = vpop.eup %5907  ;;  %v4486_v39 = vmax.f32 %v4484_v8, %v4485_v38 }
 0xe22   :  { %v4643_v37 = vmul.f32 %v5908_v15, %v5904_v1  ;;  %v4642_v23 = vmul.f32 %v5908_v15, %v5902_v22  ;;  %v4487_v22 = vsel %vm4423_vm11, %v4421_v29, -inf }
 0xe23   :  { %v4508_v61 = vsub.f32 %v4419_v11, %v4486_v39  ;;  %v4509_v60 = vsub.f32 %v4420_v35, %v4486_v39 }
 0xe24   :  { %4705 = vperm.xlu1 %5419, %v4643_v37  }
 0xe25   :  { %v4536_v57 = vmul.f32 1.442695, %v4508_v61  ;;  %v4538_v9 = vmul.f32 1.442695, %v4509_v60  ;;  %4670 = vperm.xlu0 %5418, %v8438_v12  }
 0xe27   :  { %5909 = vpow2.f32 %v4536_v57 }
 0xe28   :  { %5911 = vpow2.f32 %v4538_v9 }
 0xe2d   :  { %v5910_v58 = vpop.eup %5909  ;;  %4685 = vperm.xlu0 %5418, %v4639_v48  }
 0xe2e   :  { %v5912_v30 = vpop.eup %5911  ;;  %v4598_v33 = vsel %vm4423_vm11, %v5910_v58, 0.0 }
 0xe2f   :  { %v4599_v44 = vsel %vm4423_vm11, %v5912_v30, 0.0 }
 0xe30   :  { %v4600_v0 = vadd.f32 %v4599_v44, %v4598_v33  ;;  %v4651_v33 = vpop.permute.xlu2 %4650 }
 0xe32   :  { %v4601_v20 = vrot.slane %v4600_v0, 4 }
 0xe34   :  { %v4602_v1 = vadd.f32 %v4601_v20, %v4600_v0  ;;  %v4656_v0 = vpop.permute.xlu1 %4655 }
 0xe35   :  { %4700 = vperm.xlu0 %5418, %v4642_v23  }
 0xe36   :  { %v4603_v31 = vrot.slane %v4602_v1, 2 }
 0xe38   :  { %v4604_v25 = vadd.f32 %v4603_v31, %v4602_v1  ;;  %v4666_v20 = vpop.permute.xlu2 %4665 }
 0xe39   :  { %v4731_v10 = vmul.f32 %v4666_v20, %v8240_v36 }
 0xe3a   :  { %v4605_v16 = vrot.slane %v4604_v25, 1 }
 0xe3c   :  { %v4606_v12 = vadd.f32 %v4605_v16, %v4604_v25 }
 0xe3e   :  { %v4622_v18 = vadd.f32 1e-08, %v4606_v12 }
 0xe40   :  { %5913 = vrcp.f32 %v4622_v18 }
 0xe46   :  { %v5914_v13 = vpop.eup %5913 }
 0xe47   :  { %v4645_v2 = vmul.f32 %v5914_v13, %v5912_v30  ;;  %v4644_v55 = vmul.f32 %v5914_v13, %v5910_v58  ;;  %v4729_v13 = vmul.f32 %v4656_v0, %v8225_v47 }
 0xe49   :  { %4715 = vperm.xlu0 %5418, %v4645_v2   ;;  %4710 = vperm.xlu2 %5420, %v4644_v55   ;;  %v4728_v55 = vmul.f32 %v4651_v33, %v8184_v46  ;;  %v4754_v46 = vsel %vm245_vm0, %v4731_v10, 0.0 }
 0xe4d   :  { %v4676_v1 = vpop.permute.xlu1 %4675 }
 0xe5e   :  { %v4681_v31 = vpop.permute.xlu2 %4680 }
 0xe6e   :  { %v4696_v12 = vpop.permute.xlu2 %4695 }
 0xe7c   :  { %v4405_v11 = vpop.xlane.xlu0 %4404 }
 0xe7d   :  { %v4422_v28 = vadd.f32 %v8403_v7, %v4405_v11  ;;  %v4733_v11 = vmul.f32 %v4676_v1, %v8254_v59 }
 0xe7f   :  { %v4488_v49 = vsel %vm4423_vm11, %v4422_v28, -inf  ;;  %v4763_v59 = vsel %vm245_vm0, %v4733_v11, 0.0 }
 0xe80   :  { %v4489_v5 = vmax.f32 %v4487_v22, %v4488_v49 }
 0xe82   :  { %v4490_v35 = vrot.slane %v4489_v5, 4 }
 0xe84   :  { %v4491_v3 = vmax.f32 %v4489_v5, %v4490_v35  ;;  %v4745_v5 = vsel %vm245_vm0, %v4729_v13, 0.0 }
 0xe86   :  { %v4492_v19 = vrot.slane %v4491_v3, 2  ;;  %v4691_v16 = vpop.permute.xlu1 %4690 }
 0xe88   :  { %v4493_v56 = vmax.f32 %v4491_v3, %v4492_v19 }
 0xe8a   :  { %v4494_v53 = vrot.slane %v4493_v56, 1 }
 0xe8c   :  { %v4495_v40 = vmax.f32 %v4493_v56, %v4494_v53 }
 0xe8e   :  { %v4510_v51 = vsub.f32 %v4421_v29, %v4495_v40  ;;  %v4511_v26 = vsub.f32 %v4422_v28, %v4495_v40  ;;  %v4734_v28 = vmul.f32 %v4681_v31, %v8274_v41  ;;  %v4736_v41 = vmul.f32 %v4691_v16, %v8301_v45 }
 0xe8f   :  { %v4661_v30 = vpop.permute.xlu0 %4660 }
 0xe90   :  { %v4540_v21 = vmul.f32 1.442695, %v4510_v51  ;;  %v4542_v50 = vmul.f32 1.442695, %v4511_v26  ;;  %v4730_v18 = vmul.f32 %v4661_v30, %v8233_v54  ;;  %v4771_v53 = vsel %vm245_vm0, %v4734_v28, 0.0 }
 0xe91   :  { %v4737_v26 = vmul.f32 %v4696_v12, %v8311_v24 }
 0xe92   :  { %5915 = vpow2.f32 %v4540_v21  ;;  %v4753_v22 = vsel %vm245_vm0, %v4730_v18, 0.0 }
 0xe93   :  { %5917 = vpow2.f32 %v4542_v50  ;;  %v4755_v3 = vadd.f32 %v4754_v46, %v4753_v22 }
 0xe96   :  { %v4706_v54 = vpop.permute.xlu1 %4705 }
 0xe97   :  { %v4671_v44 = vpop.permute.xlu0 %4670  ;;  %v4739_v40 = vmul.f32 %v4706_v54, %v8332_v62 }
 0xe98   :  { %v5916_v42 = vpop.eup %5915  ;;  %v4732_v2 = vmul.f32 %v4671_v44, %v8248_v34  ;;  %v4744_v34 = vsel %vm245_vm0, %v4728_v55, 0.0 }
 0xe99   :  { %v5918_v14 = vpop.eup %5917  ;;  %v4607_v7 = vsel %vm4423_vm11, %v5916_v42, 0.0  ;;  %v4746_v56 = vadd.f32 %v4745_v5, %v4744_v34 }
 0xe9a   :  { %v4608_v52 = vsel %vm4423_vm11, %v5918_v14, 0.0  ;;  %v4762_v47 = vsel %vm245_vm0, %v4732_v2, 0.0 }
 0xe9b   :  { %v4609_v8 = vadd.f32 %v4608_v52, %v4607_v7  ;;  %v4764_v51 = vadd.f32 %v4763_v59, %v4762_v47  ;;  %v4747_v7 = vrot.slane %v4746_v56, 4 }
 0xe9d   :  { %v4610_v38 = vrot.slane %v4609_v8, 4  ;;  %v4765_v52 = vrot.slane %v4764_v51, 4 }
 0xe9f   :  { %v4611_v15 = vadd.f32 %v4610_v38, %v4609_v8  ;;  %v4686_v23 = vpop.permute.xlu0 %4685  ;;  %v4781_v8 = vsel %vm245_vm0, %v4737_v26, 0.0 }
 0xea0   :  { %v4735_v29 = vmul.f32 %v4686_v23, %v8287_v32 }
 0xea1   :  { %v4612_v39 = vrot.slane %v4611_v15, 2 }
 0xea2   :  { %v4772_v36 = vsel %vm245_vm0, %v4735_v29, 0.0 }
 0xea3   :  { %v4613_v37 = vadd.f32 %v4612_v39, %v4611_v15  ;;  %v4711_v35 = vpop.permute.xlu2 %4710  ;;  %v4773_v21 = vadd.f32 %v4772_v36, %v4771_v53 }
 0xea4   :  { %v4740_v50 = vmul.f32 %v4711_v35, %v8343_v27 }
 0xea5   :  { %v4614_v61 = vrot.slane %v4613_v37, 1  ;;  %v4774_v62 = vrot.slane %v4773_v21, 4 }
 0xea6   :  { %v4798_v38 = vsel %vm245_vm0, %v4740_v50, 0.0 }
 0xea7   :  { %v4615_v60 = vadd.f32 %v4614_v61, %v4613_v37  ;;  %v4701_v25 = vpop.permute.xlu0 %4700  ;;  %v4748_v37 = vadd.f32 %v4747_v7, %v4746_v56  ;;  %v4766_v61 = vadd.f32 %v4765_v52, %v4764_v51 }
 0xea8   :  { %v4738_v32 = vmul.f32 %v4701_v25, %v8319_v63 }
 0xea9   :  { %v4623_v57 = vadd.f32 1e-08, %v4615_v60  ;;  %v4775_v60 = vadd.f32 %v4774_v62, %v4773_v21  ;;  %v4749_v30 = vrot.slane %v4748_v37, 2  ;;  %v4767_v33 = vrot.slane %v4766_v61, 2 }
 0xeaa   :  { %v4789_v63 = vsel %vm245_vm0, %v4738_v32, 0.0 }
 0xeab   :  { %5919 = vrcp.f32 %v4623_v57  ;;  %v4776_v44 = vrot.slane %v4775_v60, 2  ;;  %v4750_v25 = vadd.f32 %v4749_v30, %v4748_v37  ;;  %v4768_v16 = vadd.f32 %v4767_v33, %v4766_v61 }
 0xead   :  { %v4777_v18 = vadd.f32 %v4776_v44, %v4775_v60  ;;  %v4751_v28 = vrot.slane %v4750_v25, 1  ;;  %v4769_v22 = vrot.slane %v4768_v16, 1 }
 0xeaf   :  { %v4778_v54 = vrot.slane %v4777_v18, 1  ;;  %v4752_v32 = vadd.f32 %v4751_v28, %v4750_v25  ;;  %v4770_v59 = vadd.f32 %v4769_v22, %v4768_v16 }
 0xeb1   :  { %v5920_v9 = vpop.eup %5919 }
 0xeb2   :  { %v4647_v48 = vmul.f32 %v5920_v9, %v5918_v14  ;;  %v4646_v58 = vmul.f32 %v5920_v9, %v5916_v42  ;;  %v4780_v42 = vsel %vm245_vm0, %v4736_v41, 0.0  ;;  %v4756_v14 = vrot.slane %v4755_v3, 4 }
 0xeb3   :  { %v4782_v15 = vadd.f32 %v4781_v8, %v4780_v42  ;;  %v4779_v41 = vadd.f32 %v4778_v54, %v4777_v18 }
 0xeb4   :  { %4725 = vperm.xlu2 %5420, %v4647_v48   ;;  %4720 = vperm.xlu1 %5419, %v4646_v58   ;;  %v4757_v27 = vadd.f32 %v4756_v14, %v4755_v3 }
 0xeb5   :  { %v4783_v9 = vrot.slane %v4782_v15, 4 }
 0xeb6   :  { %v4758_v58 = vrot.slane %v4757_v27, 2 }
 0xeb7   :  { %v4784_v23 = vadd.f32 %v4783_v9, %v4782_v15 }
 0xeb8   :  { %v4759_v31 = vadd.f32 %v4758_v58, %v4757_v27 }
 0xeb9   :  { %v4785_v55 = vrot.slane %v4784_v23, 2 }
 0xeba   :  { %v4760_v11 = vrot.slane %v4759_v31, 1 }
 0xebb   :  { %v4716_v49 = vpop.permute.xlu0 %4715  ;;  %v4786_v46 = vadd.f32 %v4785_v55, %v4784_v23 }
 0xebc   :  { %v4741_v19 = vmul.f32 %v4716_v49, %v8351_v4  ;;  %v4790_v4 = vsel %vm245_vm0, %v4739_v40, 0.0 }
 0xebd   :  { %v4791_v24 = vadd.f32 %v4790_v4, %v4789_v63 }
 0xebe   :  { %v4799_v45 = vsel %vm245_vm0, %v4741_v19, 0.0  ;;  %v4787_v19 = vrot.slane %v4786_v46, 1 }
 0xebf   :  { %v4800_v39 = vadd.f32 %v4799_v45, %v4798_v38  ;;  %v4792_v57 = vrot.slane %v4791_v24, 4 }
 0xec0   :  { %v4788_v63 = vadd.f32 %v4787_v19, %v4786_v46  ;;  %v4955_v19 = vld [vmem:[%s8653_s8] sm:$0xff] }
 0xec1   :  { %v4801_v48 = vrot.slane %v4800_v39, 4  ;;  %v4793_v0 = vadd.f32 %v4792_v57, %v4791_v24 }
 0xec3   :  { %v4802_v1 = vadd.f32 %v4801_v48, %v4800_v39  ;;  %v4794_v13 = vrot.slane %v4793_v0, 2 }
 0xec5   :  { %v4803_v10 = vrot.slane %v4802_v1, 2  ;;  %v4795_v47 = vadd.f32 %v4794_v13, %v4793_v0 }
 0xec7   :  { %v4804_v36 = vadd.f32 %v4803_v10, %v4802_v1  ;;  %v4796_v3 = vrot.slane %v4795_v47, 1 }
 0xec9   :  { %v4805_v56 = vrot.slane %v4804_v36, 1  ;;  %v4797_v26 = vadd.f32 %v4796_v3, %v4795_v47  ;;  %v4959_v3 = vld [vmem:[%s8653_s8 + $0x20] sm:$0xff] }
 0xecb   :  { %v4806_v42 = vadd.f32 %v4805_v56, %v4804_v36  ;;  %v4956_v56 = vld [vmem:[%s8653_s8 + $0x8] sm:$0xff] }
 0xf0e   :  { %v4726_v20 = vpop.permute.xlu2 %4725 }
 0xf0f   :  { %v4743_v12 = vmul.f32 %v4726_v20, %v8395_v6  ;;  %v4761_v6 = vadd.f32 %v4760_v11, %v4759_v31 }
 0xf11   :  { %v4808_v49 = vsel %vm245_vm0, %v4743_v12, 0.0  ;;  %v4825_v53 = vsel %vm4824_vm2, %v4761_v6, %v4752_v32 }
 0xf12   :  { %v4827_v51 = vsel %vm4826_vm12, %v4770_v59, %v4825_v53 }
 0xf13   :  { %v4829_v50 = vsel %vm4828_vm13, %v4779_v41, %v4827_v51 }
 0xf14   :  { %v4831_v45 = vsel %vm4830_vm14, %v4788_v63, %v4829_v50  ;;  %v4965_v50 = vld [vmem:[%s8653_s8 + $0x50] sm:$0xff] }
 0xf15   :  { %v4833_v4 = vsel %vm4832_vm15, %v4797_v26, %v4831_v45 }
 0xf16   :  { %v4835_v52 = vsel %vm4834_vm1, %v4806_v42, %v4833_v4  ;;  %v4958_v4 = vld [vmem:[%s8653_s8 + $0x18] sm:$0xff] }
 0xf26   :  { %v4721_v2 = vpop.permute.xlu1 %4720 }
 0xf27   :  { %v4742_v29 = vmul.f32 %v4721_v2, %v8360_v43 }
 0xf29   :  { %v4807_v5 = vsel %vm245_vm0, %v4742_v29, 0.0 }
 0xf2a   :  { %v4809_v34 = vadd.f32 %v4808_v49, %v4807_v5 }
 0xf2c   :  { %v4810_v35 = vrot.slane %v4809_v34, 4 }
 0xf2e   :  { %v4811_v43 = vadd.f32 %v4810_v35, %v4809_v34  ;;  %v4967_v35 = vld [vmem:[%s8653_s8 + $0x60] sm:$0xff] }
 0xf2f   :  { %5017 = vmatpush.msra.mxu3 %v4967_v35 }
 0xf30   :  { %v4812_v40 = vrot.slane %v4811_v43, 2 }
 0xf32   :  { %v4813_v21 = vadd.f32 %v4812_v40, %v4811_v43  ;;  %v4960_v43 = vld [vmem:[%s8653_s8 + $0x28] sm:$0xff] }
 0xf34   :  { %v4814_v14 = vrot.slane %v4813_v21, 1 }
 0xf36   :  { %v4815_v7 = vadd.f32 %v4814_v14, %v4813_v21  ;;  %v4970_v21 = vld [vmem:[%s8653_s8 + $0x78] sm:$0xff] }
 0xf38   :  { %v4837_v8 = vsel %vm4836_vm3, %v4815_v7, %v4835_v52 }
 0xf39   :  { %v4839_v62 = vsel %vm245_vm0, %v4837_v8, 0.0 }
 0xf3a   :  { %4840 = vadd.xlane.f32.xlu0 %v4839_v62 }
 0xfad   :  { %v4841_v38 = vpop.xlane.xlu0 %4840 }
 0xfae   :  { %v4842_v24 = vmul.f32 %v4841_v38, %v8007_v17 }
 0xfb0   :  { %v4844_v15 = vrot.slane %v4842_v24, 1  ;;  %v4845_v39 = vrot.slane %v4842_v24, 2  ;;  %v4846_v27 = vrot.slane %v4842_v24, 3  ;;  %v4847_v37 = vrot.slane %v4842_v24, 4 }
 0xfb1   :  { %v4848_v61 = vrot.slane %v4842_v24, 5  ;;  %v4849_v60 = vrot.slane %v4842_v24, 6  ;;  %v4850_v57 = vrot.slane %v4842_v24, 7  ;;  %v8516_v9 = vsub.f32 %v4752_v32, %v4842_v24  ;;  %v4968_v32 = vld [vmem:[%s8653_s8 + $0x68] sm:$0xff]  ;;  %v5549_v24 = vld [vmem:[%s8648_s5 + $0x5] ss:$0 sm:$0xff] }
 0xfb2   :  { %v8518_v48 = vsub.f32 %v4761_v6, %v4844_v15  ;;  %v8520_v58 = vsub.f32 %v4770_v59, %v4845_v39  ;;  %v8522_v30 = vsub.f32 %v4779_v41, %v4846_v27  ;;  %v8524_v33 = vsub.f32 %v4788_v63, %v4847_v37  ;;  %v4963_v59 = vld [vmem:[%s8653_s8 + $0x40] sm:$0xff]  ;;  %5037 = vmatpush.msrb.mxu0 %v4968_v32  ;;  %v4964_v41 = vld [vmem:[%s8653_s8 + $0x48] sm:$0xff]  ;;  %v4961_v63 = vld [vmem:[%s8653_s8 + $0x30] sm:$0xff] }
 0xfb3   :  { %v8526_v44 = vsub.f32 %v4797_v26, %v4848_v61  ;;  %v8528_v0 = vsub.f32 %v4806_v42, %v4849_v60  ;;  %v8530_v20 = vsub.f32 %v4815_v7, %v4850_v57  ;;  %v4867_v16 = vmul.f32 %v8516_v9, %v8516_v9  ;;  %5018 = vmatpush.msra.mxu3 %v4963_v59  ;;  %v4969_v26 = vld [vmem:[%s8653_s8 + $0x70] sm:$0xff]  ;;  %v4962_v42 = vld [vmem:[%s8653_s8 + $0x38] sm:$0xff] }
 0xfb4   :  { %v4868_v23 = vmul.f32 %v8518_v48, %v8518_v48  ;;  %v4869_v1 = vmul.f32 %v8520_v58, %v8520_v58  ;;  %v4870_v31 = vmul.f32 %v8522_v30, %v8522_v30  ;;  %v4871_v25 = vmul.f32 %v8524_v33, %v8524_v33  ;;  %5038 = vmatpush.msrb.mxu0 %v4964_v41  ;;  %v4957_v7 = vld [vmem:[%s8653_s8 + $0x10] sm:$0xff] }
 0xfb5   :  { %v4872_v12 = vmul.f32 %v8526_v44, %v8526_v44  ;;  %v4873_v2 = vmul.f32 %v8528_v0, %v8528_v0  ;;  %v4874_v55 = vmul.f32 %v8530_v20, %v8530_v20  ;;  %5019 = vmatpush.msra.mxu3 %v4959_v3 }
 0xfb6   :  { %v4883_v18 = vrot.slane %v4868_v23, 7  ;;  %v4885_v13 = vrot.slane %v4869_v1, 6  ;;  %v4887_v29 = vrot.slane %v4870_v31, 5  ;;  %v4889_v28 = vrot.slane %v4871_v25, 4  ;;  %5039 = vmatpush.msrb.mxu0 %v4960_v43 }
 0xfb7   :  { %v4891_v49 = vrot.slane %v4872_v12, 3  ;;  %v4893_v54 = vrot.slane %v4873_v2, 2  ;;  %v4895_v34 = vrot.slane %v4874_v55, 1  ;;  %5020 = vmatpush.msra.mxu3 %v4955_v19 }
 0xfb8   :  { %v4884_v10 = vsel %vm4824_vm2, %v4883_v18, %v4867_v16  ;;  %5040 = vmatpush.msrb.mxu0 %v4956_v56 }
 0xfb9   :  { %v4886_v11 = vsel %vm4826_vm12, %v4885_v13, %v4884_v10  ;;  %5057 = vmatpush.msrb.mxu3 %v4969_v26 }
 0xfba   :  { %v4888_v22 = vsel %vm4828_vm13, %v4887_v29, %v4886_v11  ;;  %5077 = vmatpush.msra.mxu0 %v4970_v21 }
 0xfbb   :  { %v4890_v5 = vsel %vm4830_vm14, %v4889_v28, %v4888_v22  ;;  %5058 = vmatpush.msrb.mxu3 %v4965_v50 }
 0xfbc   :  { %v4892_v47 = vsel %vm4832_vm15, %v4891_v49, %v4890_v5 }
 0xfbd   :  { %v4894_v46 = vsel %vm4834_vm1, %v4893_v54, %v4892_v47  ;;  %5059 = vmatpush.msrb.mxu3 %v4961_v63 }
 0xfbe   :  { %v4896_v36 = vsel %vm4836_vm3, %v4895_v34, %v4894_v46 }
 0xfbf   :  { %v4898_v6 = vsel %vm245_vm0, %v4896_v36, 0.0  ;;  %5060 = vmatpush.msrb.mxu3 %v4957_v7 }
 0xfc0   :  { %4899 = vadd.xlane.f32.xlu1 %v4898_v6 }
0x1033   :  { %v4900_v53 = vpop.xlane.xlu1 %4899 }
0x1034   :  { %v4901_v40 = vmul.f32 %v4900_v53, %v8007_v17  ;;  %v4966_v17 = vld [vmem:[%s8653_s8 + $0x58] sm:$0xff] }
0x1035   :  { %5078 = vmatpush.msra.mxu0 %v4966_v17 }
0x1036   :  { %v4902_v51 = vadd.f32 1e-05, %v4901_v40  ;;  %v4971_v40 = vld [vmem:[%s8654_s9] sm:$0xf] }
0x1037   :  { %5079 = vmatpush.msra.mxu0 %v4962_v42  ;;  %v4973_v17 = vperm.slane %v4971_v40, 0  ;;  %v4976_v42 = vperm.slane %v4971_v40, 3 }
0x1038   :  { %5921 = vrsqrt.f32 %v4902_v51  ;;  %vm4909_vm5 = vweird.f32 %v4902_v51 }
0x1039   :  { %5080 = vmatpush.msra.mxu0 %v4958_v4 }
0x103e   :  { %v5922_v14 = vpop.eup %5921 }
0x103f   :  { %v4904_v45 = vmul.f32 %v5922_v14, %v4902_v51  ;;  %vm4910_vm4 = vweird.f32 %v5922_v14  ;;  %v4974_v51 = vperm.slane %v4971_v40, 1 }
0x1040   :  { %vm4911_vm6 = vmor %vm4909_vm5, %vm4910_vm4 }
0x1041   :  { %v4905_v52 = vmul.f32 %v5922_v14, %v4904_v45 }
0x1043   :  { %v4906_v8 = vmul.f32 0.5, %v4905_v52 }
0x1045   :  { %v4907_v62 = vsub.f32 1.5, %v4906_v8 }
0x1047   :  { %v4908_v38 = vmul.f32 %v5922_v14, %v4907_v62 }
0x1049   :  { %v4912_v15 = vsel %vm4911_vm6, %v5922_v14, %v4908_v38  ;;  %v4975_v38 = vperm.slane %v4971_v40, 2 }
0x104a   :  { %v4914_v39 = vrot.slane %v4912_v15, 1  ;;  %v4915_v27 = vrot.slane %v4912_v15, 2  ;;  %v4916_v37 = vrot.slane %v4912_v15, 3  ;;  %v4917_v61 = vrot.slane %v4912_v15, 4 }
0x104b   :  { %v4929_v60 = vmul.f32 %v4912_v15, %v8516_v9  ;;  %v4918_v57 = vrot.slane %v4912_v15, 5  ;;  %v4919_v23 = vrot.slane %v4912_v15, 6  ;;  %v4920_v1 = vrot.slane %v4912_v15, 7 }
0x104c   :  { %v4930_v31 = vmul.f32 %v4914_v39, %v8518_v48  ;;  %v4931_v25 = vmul.f32 %v4915_v27, %v8520_v58  ;;  %v4932_v16 = vmul.f32 %v4916_v37, %v8522_v30  ;;  %v4933_v12 = vmul.f32 %v4917_v61, %v8524_v33  ;;  %v5550_v48 = vld [vmem:[%s8648_s5 + $0x6] ss:$0 sm:$0xff] }
0x104d   :  { %v4938_v18 = vmul.f32 %v5549_v24, %v4929_v60  ;;  %v4934_v13 = vmul.f32 %v4918_v57, %v8526_v44  ;;  %v4935_v2 = vmul.f32 %v4919_v23, %v8528_v0  ;;  %v4936_v55 = vmul.f32 %v4920_v1, %v8530_v20 }
0x104e   :  { %v4939_v10 = vmul.f32 %v5549_v24, %v4930_v31  ;;  %v4940_v9 = vmul.f32 %v5549_v24, %v4931_v25  ;;  %v4941_v29 = vmul.f32 %v5549_v24, %v4932_v16  ;;  %v4942_v11 = vmul.f32 %v5549_v24, %v4933_v12 }
0x104f   :  { %v4943_v58 = vmul.f32 %v5549_v24, %v4934_v13  ;;  %v4944_v28 = vmul.f32 %v5549_v24, %v4935_v2  ;;  %v4945_v30 = vmul.f32 %v5549_v24, %v4936_v55  ;;  %v4947_v44 = vadd.f32 %v5550_v48, %v4938_v18 }
0x1050   :  { %v4948_v22 = vadd.f32 %v5550_v48, %v4939_v10  ;;  %v4949_v33 = vadd.f32 %v5550_v48, %v4940_v9  ;;  %v4950_v49 = vadd.f32 %v5550_v48, %v4941_v29  ;;  %v4951_v5 = vadd.f32 %v5550_v48, %v4942_v11 }
0x1051   :  { %v4952_v54 = vadd.f32 %v5550_v48, %v4943_v58  ;;  %v4953_v20 = vadd.f32 %v5550_v48, %v4944_v28  ;;  %v4954_v34 = vadd.f32 %v5550_v48, %v4945_v30 }
0x1052   :  { %v4989_v0 = vrot.slane %v4948_v22, 7  ;;  %v4991_v47 = vrot.slane %v4949_v33, 6  ;;  %v4993_v36 = vrot.slane %v4950_v49, 5  ;;  %v4995_v35 = vrot.slane %v4951_v5, 4 }
0x1053   :  { %v4997_v59 = vrot.slane %v4952_v54, 3  ;;  %v4999_v3 = vrot.slane %v4953_v20, 2  ;;  %v5001_v19 = vrot.slane %v4954_v34, 1 }
0x1054   :  { %v4990_v46 = vsel %vm4824_vm2, %v4989_v0, %v4947_v44 }
0x1055   :  { %v4992_v6 = vsel %vm4826_vm12, %v4991_v47, %v4990_v46 }
0x1056   :  { %v4994_v32 = vsel %vm4828_vm13, %v4993_v36, %v4992_v6 }
0x1057   :  { %v4996_v41 = vsel %vm4830_vm14, %v4995_v35, %v4994_v32 }
0x1058   :  { %v4998_v43 = vsel %vm4832_vm15, %v4997_v59, %v4996_v41 }
0x1059   :  { %v5000_v56 = vsel %vm4834_vm1, %v4999_v3, %v4998_v43 }
0x105a   :  { %v5002_v53 = vsel %vm4836_vm3, %v5001_v19, %v5000_v56 }
0x105b   :  { %5393 = vmatmul.msk.f32.vlgmr.msra.gmra.mxu3 %vm245_vm0, %v5002_v53  ;;  %5394 = vmatmul.msk.f32.vlgmr.msrb.gmra.mxu0 %vm245_vm0, %v5002_v53 }
0x1063   :  { %5395 = vmatmul.msk.f32.vlgmr.msrb.gmra.mxu3 %vm245_vm0, %v5002_v53  ;;  %5396 = vmatmul.msk.f32.vlgmr.msra.gmra.mxu0 %vm245_vm0, %v5002_v53 }
0x10d8   :  { %v5042_v26 = vpop.f32.mrf.mxu0 }
0x10d9   :  { %v5043_v21 = vadd.f32 %v5042_v26, %v4974_v51 }
0x10db   :  { %vm5086_vm7 = vcmp.gt.f32.partialorder %v5043_v21, 0.0  ;;  %v5090_v50 = vmul.f32 0.2, %v5043_v21 }
0x10dd   :  { %v5094_v63 = vsel %vm5086_vm7, %v5043_v21, %v5090_v50 }
0x10de   :  { %5098 = vst [vmem:[%s8655_s10 + $0x8] sm:$0xff] %v5094_v63  ;;  %v5022_v14 = vpop.f32.mrf.mxu3 }
0x10df   :  { %v5023_v45 = vadd.f32 %v5022_v14, %v4973_v17 }
0x10e0   :  { %v5082_v7 = vpop.f32.mrf.mxu0 }
0x10e1   :  { %vm5085_vm0 = vcmp.gt.f32.partialorder %v5023_v45, 0.0  ;;  %v5089_v4 = vmul.f32 0.2, %v5023_v45  ;;  %v5083_v52 = vadd.f32 %v5082_v7, %v4976_v42 }
0x10e3   :  { %v5093_v8 = vsel %vm5085_vm0, %v5023_v45, %v5089_v4  ;;  %vm5088_vm8 = vcmp.gt.f32.partialorder %v5083_v52, 0.0  ;;  %v5092_v62 = vmul.f32 0.2, %v5083_v52 }
0x10e4   :  { %5097 = vst [vmem:[%s8655_s10] sm:$0xff] %v5093_v8 }
0x10e5   :  { %v5096_v24 = vsel %vm5088_vm8, %v5083_v52, %v5092_v62 }
0x10e6   :  { %5100 = vst [vmem:[%s8655_s10 + $0x18] sm:$0xff] %v5096_v24  ;;  %v5062_v15 = vpop.f32.mrf.mxu3 }
0x10e7   :  { %v5063_v39 = vadd.f32 %v5062_v15, %v4975_v38 }
0x10e9   :  { %vm5087_vm9 = vcmp.gt.f32.partialorder %v5063_v39, 0.0  ;;  %v5091_v27 = vmul.f32 0.2, %v5063_v39 }
0x10eb   :  { %v5095_v37 = vsel %vm5087_vm9, %v5063_v39, %v5091_v27 }
0x10ec   :  { %5099 = vst [vmem:[%s8655_s10 + $0x10] sm:$0xff] %v5095_v37 }

</bundles_post_ra>
